<compile_context>
chip_gen: v7x
topology: tpu7x:2x2x1
jax: 0.10.0
libtpu: 0.0.40
codegen_flags: <defaults>
</compile_context>

<pallas_src>
import jax
import jax.numpy as jnp
from jax.experimental import pallas as pl
from jax.experimental.pallas import tpu as pltpu


def _round_up(x, m):
    return (x + m - 1) // m * m


def _attention_block_kernel(
    g_ref, x_ref,
    gs_ref, gh_ref, gw_ref, gb_ref,      # g path: BN scale/shift, conv W/b
    xs_ref, xh_ref, xw_ref, xb_ref,      # x path: BN scale/shift, conv W/b
    cs_ref, ch_ref, cw_ref, cb_ref,      # gc path: BN scale/shift, conv W/b
    out_ref,
    gpad_ref, xpad_ref,                  # zero-halo padded activations (f32)
    colg_ref, colx_ref,                  # im2col scratches (bf16)
    hpool_ref,                           # H-pooled g-conv, flat (Hx*Wg, C)
):
    Hg, Wg, Cg = g_ref.shape[1], g_ref.shape[2], g_ref.shape[3]
    Hx, Wx, Cx = x_ref.shape[1], x_ref.shape[2], x_ref.shape[3]
    Co = out_ref.shape[3]

    def zero_halo(pref, H, W, C):
        # Interior is always fully overwritten below, so only the 1-pixel halo
        # needs to be zero; far cheaper than zero-filling the whole buffer.
        zr = jnp.zeros((1, W + 2, C), jnp.float32)
        pref[0:1, :, :] = zr
        pref[H + 1:H + 2, :, :] = zr
        zc = jnp.zeros((H + 2, 1, C), jnp.float32)
        pref[:, 0:1, :] = zc
        pref[:, W + 1:W + 2, :] = zc

    def conv3x3(pad_ref, col_ref, w_ref, b_ref, H, W, Cin):
        # Build the im2col matrix once (9 shifted windows, cast to bf16 at the
        # matmul boundary), then ONE MXU matmul with K = 9*Cin.
        for dy in range(3):
            for dx in range(3):
                tap = dy * 3 + dx
                win = pad_ref[dy:dy + H, dx:dx + W, :]
                col_ref[:, tap * Cin:(tap + 1) * Cin] = (
                    win.reshape(H * W, Cin).astype(col_ref.dtype))
        acc = jnp.dot(col_ref[...], w_ref[...],
                      preferred_element_type=jnp.float32)
        return acc + b_ref[...]                      # (H*W, Co), f32

    zero_halo(gpad_ref, Hg, Wg, Cg)
    zero_halo(xpad_ref, Hx, Wx, Cx)

    # ---------------- g path: BN -> ReLU -> Conv3x3 -> MaxPool2x2 -------------
    g = g_ref[0]                                     # (Hg, Wg, Cg)
    gpad_ref[1:Hg + 1, 1:Wg + 1, :] = jnp.maximum(
        g * gs_ref[...] + gh_ref[...], 0.0)
    g_conv = conv3x3(gpad_ref, colg_ref, gw_ref, gb_ref, Hg, Wg, Cg)  # (Hg*Wg, Co)

    # 2x2 stride-2 max pool, pure VPU + strided loads (no selection matmuls):
    #  H direction: tile-aligned reshape (Hg*Wg,Co) -> (Hx, 2*Wg, Co) and max
    #  of the two Wg-wide halves (rows 2*ho and 2*ho+1).
    g2 = g_conv.reshape(Hx, 2 * Wg, Co)
    hmax = jnp.maximum(g2[:, :Wg, :], g2[:, Wg:, :])          # (Hx, Wg, Co)
    hpool_ref[...] = hmax.reshape(Hx * Wg, Co)
    #  W direction: even/odd columns become stride-2 rows of the flat scratch.
    g_pool = jnp.maximum(
        hpool_ref[pl.ds(0, Hx * Wx, stride=2), :],
        hpool_ref[pl.ds(1, Hx * Wx, stride=2), :])            # (Hx*Wx, Co)

    # ---------------- x path: BN -> ReLU -> Conv3x3 ---------------------------
    x = x_ref[0]                                     # (Hx, Wx, Cx)
    xpad_ref[1:Hx + 1, 1:Wx + 1, :] = jnp.maximum(
        x * xs_ref[...] + xh_ref[...], 0.0)
    x_conv = conv3x3(xpad_ref, colx_ref, xw_ref, xb_ref, Hx, Wx, Cx)  # (Hx*Wx, Co)

    # ---------------- gc path: (pool + conv) -> BN -> ReLU -> Conv3x3 ---------
    gc_sum = g_pool + x_conv                                   # (Hx*Wx, Co)
    gc_act = jnp.maximum(gc_sum * cs_ref[...] + ch_ref[...], 0.0)
    # Reuse the x-path pad buffer (same shape, halo already zero).
    xpad_ref[1:Hx + 1, 1:Wx + 1, :] = gc_act.reshape(Hx, Wx, Co)
    gc_conv = conv3x3(xpad_ref, colx_ref, cw_ref, cb_ref, Hx, Wx, Co)  # (Hx*Wx, Co)

    # ---------------- attention gate: y = gc_conv * x (original x) ------------
    out_ref[0] = (gc_conv.reshape(Hx, Wx, Co) * x).astype(out_ref.dtype)


def attention_block_pallas(g_nhwc, x_nhwc, params):
    N, Hg, Wg, C0 = g_nhwc.shape
    Nx, Hx, Wx, C1 = x_nhwc.shape
    assert N == Nx and Hg == 2 * Hx and Wg == 2 * Wx
    # in-kernel (H, W, C) <-> (H*W, C) reshapes require W to be a multiple of 8
    assert Wg % 8 == 0 and Wx % 8 == 0
    Cout = C1

    LANE = 128
    C0p = _round_up(C0, LANE)
    C1p = _round_up(C1, LANE)
    Cop = _round_up(Cout, LANE)
    assert Cop == C1p                      # module has out_c == in_c[1]

    def fold_bn(gamma, beta, mean, var, cpad, eps=1e-5):
        scale = (gamma / jnp.sqrt(var + eps)).astype(jnp.float32)
        shift = (beta - mean * scale).astype(jnp.float32)
        c = scale.shape[0]
        sp = jnp.zeros((1, cpad), jnp.float32).at[0, :c].set(scale)
        hp = jnp.zeros((1, cpad), jnp.float32).at[0, :c].set(shift)
        return sp, hp

    def prep_conv(w, b, cinp, coutp):
        kh, kw, cin, cout = w.shape
        wp = jnp.zeros((kh, kw, cinp, coutp), jnp.float32)
        wp = wp.at[:, :, :cin, :cout].set(w.astype(jnp.float32))
        w2 = wp.reshape(kh * kw * cinp, coutp).astype(jnp.bfloat16)
        bp = jnp.zeros((1, coutp), jnp.float32).at[0, :cout].set(b)
        return w2, bp

    gs, gh = fold_bn(*params['g_bn'], C0p)
    xs, xh = fold_bn(*params['x_bn'], C1p)
    cs, ch = fold_bn(*params['gc_bn'], Cop)
    gw, gb = prep_conv(params['g_w'], params['g_b'], C0p, Cop)
    xw, xb = prep_conv(params['x_w'], params['x_b'], C1p, Cop)
    cw, cb = prep_conv(params['gc_w'], params['gc_b'], Cop, Cop)

    # Lane-dense channel padding (zeros in the padded channels stay zero
    # through BN/ReLU/conv, and the final gate multiplies by zero there).
    gp = jnp.pad(g_nhwc.astype(jnp.float32),
                 ((0, 0), (0, 0), (0, 0), (0, C0p - C0)))
    xp = jnp.pad(x_nhwc.astype(jnp.float32),
                 ((0, 0), (0, 0), (0, 0), (0, C1p - C1)))

    def rep(shape):                                  # replicated (broadcast) spec
        nd = len(shape)
        return pl.BlockSpec(shape, lambda n, _nd=nd: (0,) * _nd)

    grid_spec = pltpu.PrefetchScalarGridSpec(
        num_scalar_prefetch=0,
        grid=(N,),
        in_specs=[
            pl.BlockSpec((1, Hg, Wg, C0p), lambda n: (n, 0, 0, 0)),
            pl.BlockSpec((1, Hx, Wx, C1p), lambda n: (n, 0, 0, 0)),
            rep(gs.shape), rep(gh.shape), rep(gw.shape), rep(gb.shape),
            rep(xs.shape), rep(xh.shape), rep(xw.shape), rep(xb.shape),
            rep(cs.shape), rep(ch.shape), rep(cw.shape), rep(cb.shape),
        ],
        out_specs=pl.BlockSpec((1, Hx, Wx, Cop), lambda n: (n, 0, 0, 0)),
        scratch_shapes=[
            pltpu.VMEM((Hg + 2, Wg + 2, C0p), jnp.float32),   # gpad
            pltpu.VMEM((Hx + 2, Wx + 2, C1p), jnp.float32),   # xpad (reused by gc)
            pltpu.VMEM((Hg * Wg, 9 * C0p), jnp.bfloat16),     # im2col (g)
            pltpu.VMEM((Hx * Wx, 9 * C1p), jnp.bfloat16),     # im2col (x / gc)
            pltpu.VMEM((Hx * Wg, Cop), jnp.float32),          # H-pooled g conv
        ],
    )

    flops = 2 * N * (Hg * Wg * 9 * C0p * Cop
                     + Hx * Wx * 9 * C1p * Cop
                     + Hx * Wx * 9 * Cop * Cop)
    bytes_accessed = int((gp.size + xp.size + N * Hx * Wx * Cop) * 4
                         + (gw.size + xw.size + cw.size) * 2
                         + (gs.size + gh.size + xs.size + xh.size
                            + cs.size + ch.size + gb.size + xb.size + cb.size) * 4)

    out = pl.pallas_call(
        _attention_block_kernel,
        out_shape=jax.ShapeDtypeStruct((N, Hx, Wx, Cop), jnp.float32),
        grid_spec=grid_spec,
        compiler_params=pltpu.CompilerParams(
            dimension_semantics=("parallel",),
            vmem_limit_bytes=48 * 1024 * 1024),
        cost_estimate=pl.CostEstimate(
            flops=int(flops), transcendentals=0, bytes_accessed=bytes_accessed),
    )(gp, xp, gs, gh, gw, gb, xs, xh, xw, xb, cs, ch, cw, cb)

    return out[..., :Cout]


def attention_block_ref(g, x, p):
    """Pure-JAX (NHWC) reference of the PyTorch module (eval-mode BN)."""
    def bn(a, stats):
        gamma, beta, mean, var = stats
        return (a - mean) / jnp.sqrt(var + 1e-5) * gamma + beta

    def conv(a, w, b):
        out = jax.lax.conv_general_dilated(
            a, w, window_strides=(1, 1), padding='SAME',
            dimension_numbers=('NHWC', 'HWIO', 'NHWC'))
        return out + b

    def pool(a):
        return jax.lax.reduce_window(a, -jnp.inf, jax.lax.max,
                                     (1, 2, 2, 1), (1, 2, 2, 1), 'VALID')

    g_pool = pool(conv(jax.nn.relu(bn(g, p['g_bn'])), p['g_w'], p['g_b']))
    x_conv = conv(jax.nn.relu(bn(x, p['x_bn'])), p['x_w'], p['x_b'])
    gc_sum = g_pool + x_conv
    gc_conv = conv(jax.nn.relu(bn(gc_sum, p['gc_bn'])), p['gc_w'], p['gc_b'])
    return gc_conv * x


def init_params(key, c_in_g, c_in_x):
    c_out = c_in_x

    def bn_params(k, c):
        k1, k2, k3, k4 = jax.random.split(k, 4)
        gamma = 1.0 + 0.1 * jax.random.normal(k1, (c,), jnp.float32)
        beta = 0.1 * jax.random.normal(k2, (c,), jnp.float32)
        mean = 0.1 * jax.random.normal(k3, (c,), jnp.float32)
        var = jax.random.uniform(k4, (c,), jnp.float32, 0.5, 1.5)
        return (gamma, beta, mean, var)

    def conv_params(k, cin, cout):
        k1, k2 = jax.random.split(k)
        w = 0.1 * jax.random.normal(k1, (3, 3, cin, cout), jnp.float32)  # HWIO
        b = 0.1 * jax.random.normal(k2, (cout,), jnp.float32)
        return w, b

    ks = jax.random.split(key, 6)
    p = {}
    p['g_bn'] = bn_params(ks[0], c_in_g)
    p['g_w'], p['g_b'] = conv_params(ks[1], c_in_g, c_out)
    p['x_bn'] = bn_params(ks[2], c_in_x)
    p['x_w'], p['x_b'] = conv_params(ks[3], c_in_x, c_out)
    p['gc_bn'] = bn_params(ks[4], c_out)
    p['gc_w'], p['gc_b'] = conv_params(ks[5], c_out, c_out)
    return p


if __name__ == "__main__":
    key = jax.random.PRNGKey(0)
    kg, kx, kp = jax.random.split(key, 3)

    # Module config: in_c = (4, 4) -> out_c = 4.  PyTorch-style NCHW inputs:
    # g is the gating (higher-res) feature map, x is the skip feature map at
    # half the spatial resolution of g.
    N, C0, C1 = 2, 4, 4
    Hg, Wg = 16, 16
    Hx, Wx = 8, 8
    g_nchw = jax.random.normal(kg, (N, C0, Hg, Wg), jnp.float32)
    x_nchw = jax.random.normal(kx, (N, C1, Hx, Wx), jnp.float32)

    params = init_params(kp, C0, C1)

    # NCHW -> NHWC for the kernel.
    g_nhwc = jnp.transpose(g_nchw, (0, 2, 3, 1))
    x_nhwc = jnp.transpose(x_nchw, (0, 2, 3, 1))

    y = attention_block_pallas(g_nhwc, x_nhwc, params)
    y = jax.block_until_ready(y)

    y_ref = jax.block_until_ready(attention_block_ref(g_nhwc, x_nhwc, params))
    max_err = float(jnp.max(jnp.abs(y - y_ref)))
    # bf16 matmul operands -> slightly looser tolerance than a pure-f32 kernel.
    assert max_err < 1e-1, f"mismatch vs reference: max abs err {max_err}"

    print("KERNEL_OK")
</pallas_src>

<mosaic_0001>
module attributes {stable_mosaic.version = 11 : i64} {
  func.func @_attention_block_kernel(%arg0: i32, %arg1: memref<1x16x16x128xf32, #tpu.memory_space<vmem>>, %arg2: memref<1x8x8x128xf32, #tpu.memory_space<vmem>>, %arg3: memref<1x128xf32, #tpu.memory_space<vmem>>, %arg4: memref<1x128xf32, #tpu.memory_space<vmem>>, %arg5: memref<1152x128xbf16, #tpu.memory_space<vmem>>, %arg6: memref<1x128xf32, #tpu.memory_space<vmem>>, %arg7: memref<1x128xf32, #tpu.memory_space<vmem>>, %arg8: memref<1x128xf32, #tpu.memory_space<vmem>>, %arg9: memref<1152x128xbf16, #tpu.memory_space<vmem>>, %arg10: memref<1x128xf32, #tpu.memory_space<vmem>>, %arg11: memref<1x128xf32, #tpu.memory_space<vmem>>, %arg12: memref<1x128xf32, #tpu.memory_space<vmem>>, %arg13: memref<1152x128xbf16, #tpu.memory_space<vmem>>, %arg14: memref<1x128xf32, #tpu.memory_space<vmem>>, %arg15: memref<1x8x8x128xf32, #tpu.memory_space<vmem>>, %arg16: memref<18x18x128xf32, #tpu.memory_space<vmem>>, %arg17: memref<10x10x128xf32, #tpu.memory_space<vmem>>, %arg18: memref<256x1152xbf16, #tpu.memory_space<vmem>>, %arg19: memref<64x1152xbf16, #tpu.memory_space<vmem>>, %arg20: memref<128x128xf32, #tpu.memory_space<vmem>>) attributes {dimension_semantics = [#tpu.dimension_semantics<parallel>], iteration_bounds = array<i64: 2>, scalar_prefetch = 0 : i64, scratch_operands = 5 : i64, tpu.core_type = #tpu.core_type<tc>, window_params = [{transform_indices = @transform_0, window_bounds = array<i64: 1, 16, 16, 128>}, {transform_indices = @transform_1, window_bounds = array<i64: 1, 8, 8, 128>}, {pipeline_mode = #tpu.pipeline_mode<synchronous>, transform_indices = @transform_2, window_bounds = array<i64: 1, 128>}, {pipeline_mode = #tpu.pipeline_mode<synchronous>, transform_indices = @transform_3, window_bounds = array<i64: 1, 128>}, {pipeline_mode = #tpu.pipeline_mode<synchronous>, transform_indices = @transform_4, window_bounds = array<i64: 1152, 128>}, {pipeline_mode = #tpu.pipeline_mode<synchronous>, transform_indices = @transform_5, window_bounds = array<i64: 1, 128>}, {pipeline_mode = #tpu.pipeline_mode<synchronous>, transform_indices = @transform_6, window_bounds = array<i64: 1, 128>}, {pipeline_mode = #tpu.pipeline_mode<synchronous>, transform_indices = @transform_7, window_bounds = array<i64: 1, 128>}, {pipeline_mode = #tpu.pipeline_mode<synchronous>, transform_indices = @transform_8, window_bounds = array<i64: 1152, 128>}, {pipeline_mode = #tpu.pipeline_mode<synchronous>, transform_indices = @transform_9, window_bounds = array<i64: 1, 128>}, {pipeline_mode = #tpu.pipeline_mode<synchronous>, transform_indices = @transform_10, window_bounds = array<i64: 1, 128>}, {pipeline_mode = #tpu.pipeline_mode<synchronous>, transform_indices = @transform_11, window_bounds = array<i64: 1, 128>}, {pipeline_mode = #tpu.pipeline_mode<synchronous>, transform_indices = @transform_12, window_bounds = array<i64: 1152, 128>}, {pipeline_mode = #tpu.pipeline_mode<synchronous>, transform_indices = @transform_13, window_bounds = array<i64: 1, 128>}, {transform_indices = @transform_14, window_bounds = array<i64: 1, 8, 8, 128>}]} {
    %cst = arith.constant 0.000000e+00 : f32
    %0 = vector.broadcast %cst : f32 to vector<1x18x128xf32>
    %c0 = arith.constant 0 : index
    %c0_0 = arith.constant 0 : index
    %c0_1 = arith.constant 0 : index
    %1 = vector.load %arg16[%c0, %c0_0, %c0_1] : memref<18x18x128xf32, #tpu.memory_space<vmem>>, vector<1x18x128xf32>
    tpu.vector_store %arg16[%c0, %c0_0, %c0_1], %0 {strides = array<i32>} : memref<18x18x128xf32, #tpu.memory_space<vmem>>, vector<1x18x128xf32>,
    %c17 = arith.constant 17 : index
    %c0_2 = arith.constant 0 : index
    %c0_3 = arith.constant 0 : index
    %2 = vector.load %arg16[%c17, %c0_2, %c0_3] : memref<18x18x128xf32, #tpu.memory_space<vmem>>, vector<1x18x128xf32>
    tpu.vector_store %arg16[%c17, %c0_2, %c0_3], %0 {strides = array<i32>} : memref<18x18x128xf32, #tpu.memory_space<vmem>>, vector<1x18x128xf32>,
    %cst_4 = arith.constant 0.000000e+00 : f32
    %3 = vector.broadcast %cst_4 : f32 to vector<18x1x128xf32>
    %c0_5 = arith.constant 0 : index
    %c0_6 = arith.constant 0 : index
    %c0_7 = arith.constant 0 : index
    %4 = vector.load %arg16[%c0_5, %c0_6, %c0_7] : memref<18x18x128xf32, #tpu.memory_space<vmem>>, vector<18x1x128xf32>
    tpu.vector_store %arg16[%c0_5, %c0_6, %c0_7], %3 {strides = array<i32>} : memref<18x18x128xf32, #tpu.memory_space<vmem>>, vector<18x1x128xf32>,
    %c0_8 = arith.constant 0 : index
    %c17_9 = arith.constant 17 : index
    %c0_10 = arith.constant 0 : index
    %5 = vector.load %arg16[%c0_8, %c17_9, %c0_10] : memref<18x18x128xf32, #tpu.memory_space<vmem>>, vector<18x1x128xf32>
    tpu.vector_store %arg16[%c0_8, %c17_9, %c0_10], %3 {strides = array<i32>} : memref<18x18x128xf32, #tpu.memory_space<vmem>>, vector<18x1x128xf32>,
    %cst_11 = arith.constant 0.000000e+00 : f32
    %6 = vector.broadcast %cst_11 : f32 to vector<1x10x128xf32>
    %c0_12 = arith.constant 0 : index
    %c0_13 = arith.constant 0 : index
    %c0_14 = arith.constant 0 : index
    %7 = vector.load %arg17[%c0_12, %c0_13, %c0_14] : memref<10x10x128xf32, #tpu.memory_space<vmem>>, vector<1x10x128xf32>
    tpu.vector_store %arg17[%c0_12, %c0_13, %c0_14], %6 {strides = array<i32>} : memref<10x10x128xf32, #tpu.memory_space<vmem>>, vector<1x10x128xf32>,
    %c9 = arith.constant 9 : index
    %c0_15 = arith.constant 0 : index
    %c0_16 = arith.constant 0 : index
    %8 = vector.load %arg17[%c9, %c0_15, %c0_16] : memref<10x10x128xf32, #tpu.memory_space<vmem>>, vector<1x10x128xf32>
    tpu.vector_store %arg17[%c9, %c0_15, %c0_16], %6 {strides = array<i32>} : memref<10x10x128xf32, #tpu.memory_space<vmem>>, vector<1x10x128xf32>,
    %cst_17 = arith.constant 0.000000e+00 : f32
    %9 = vector.broadcast %cst_17 : f32 to vector<10x1x128xf32>
    %c0_18 = arith.constant 0 : index
    %c0_19 = arith.constant 0 : index
    %c0_20 = arith.constant 0 : index
    %10 = vector.load %arg17[%c0_18, %c0_19, %c0_20] : memref<10x10x128xf32, #tpu.memory_space<vmem>>, vector<10x1x128xf32>
    tpu.vector_store %arg17[%c0_18, %c0_19, %c0_20], %9 {strides = array<i32>} : memref<10x10x128xf32, #tpu.memory_space<vmem>>, vector<10x1x128xf32>,
    %c0_21 = arith.constant 0 : index
    %c9_22 = arith.constant 9 : index
    %c0_23 = arith.constant 0 : index
    %11 = vector.load %arg17[%c0_21, %c9_22, %c0_23] : memref<10x10x128xf32, #tpu.memory_space<vmem>>, vector<10x1x128xf32>
    tpu.vector_store %arg17[%c0_21, %c9_22, %c0_23], %9 {strides = array<i32>} : memref<10x10x128xf32, #tpu.memory_space<vmem>>, vector<10x1x128xf32>,
    %c0_24 = arith.constant 0 : index
    %c0_25 = arith.constant 0 : index
    %c0_26 = arith.constant 0 : index
    %c0_27 = arith.constant 0 : index
    %12 = vector.load %arg1[%c0_24, %c0_25, %c0_26, %c0_27] : memref<1x16x16x128xf32, #tpu.memory_space<vmem>>, vector<1x16x16x128xf32>
    %13 = vector.shape_cast %12 : vector<1x16x16x128xf32> to vector<16x16x128xf32>
    %c0_28 = arith.constant 0 : index
    %c0_29 = arith.constant 0 : index
    %14 = vector.load %arg3[%c0_28, %c0_29] : memref<1x128xf32, #tpu.memory_space<vmem>>, vector<1x128xf32>
    %15 = vector.shape_cast %14 : vector<1x128xf32> to vector<1x1x128xf32>
    %16 = vector.broadcast %15 : vector<1x1x128xf32> to vector<16x16x128xf32>
    %17 = arith.mulf %13, %16 : vector<16x16x128xf32>
    %c0_30 = arith.constant 0 : index
    %c0_31 = arith.constant 0 : index
    %18 = vector.load %arg4[%c0_30, %c0_31] : memref<1x128xf32, #tpu.memory_space<vmem>>, vector<1x128xf32>
    %19 = vector.shape_cast %18 : vector<1x128xf32> to vector<1x1x128xf32>
    %20 = vector.broadcast %19 : vector<1x1x128xf32> to vector<16x16x128xf32>
    %21 = arith.addf %17, %20 : vector<16x16x128xf32>
    %cst_32 = arith.constant 0.000000e+00 : f32
    %22 = vector.broadcast %cst_32 : f32 to vector<16x16x128xf32>
    %23 = arith.maximumf %21, %22 : vector<16x16x128xf32>
    %c1 = arith.constant 1 : index
    %c1_33 = arith.constant 1 : index
    %c0_34 = arith.constant 0 : index
    %24 = vector.load %arg16[%c1, %c1_33, %c0_34] : memref<18x18x128xf32, #tpu.memory_space<vmem>>, vector<16x16x128xf32>
    tpu.vector_store %arg16[%c1, %c1_33, %c0_34], %23 {strides = array<i32>} : memref<18x18x128xf32, #tpu.memory_space<vmem>>, vector<16x16x128xf32>,
    %c0_35 = arith.constant 0 : index
    %c0_36 = arith.constant 0 : index
    %c0_37 = arith.constant 0 : index
    %25 = vector.load %arg16[%c0_35, %c0_36, %c0_37] : memref<18x18x128xf32, #tpu.memory_space<vmem>>, vector<16x16x128xf32>
    %26 = vector.shape_cast %25 : vector<16x16x128xf32> to vector<256x128xf32>
    %27 = arith.truncf %26 : vector<256x128xf32> to vector<256x128xbf16>
    %c0_38 = arith.constant 0 : index
    %c0_39 = arith.constant 0 : index
    %28 = vector.load %arg18[%c0_38, %c0_39] : memref<256x1152xbf16, #tpu.memory_space<vmem>>, vector<256x128xbf16>
    tpu.vector_store %arg18[%c0_38, %c0_39], %27 {strides = array<i32>} : memref<256x1152xbf16, #tpu.memory_space<vmem>>, vector<256x128xbf16>,
    %c0_40 = arith.constant 0 : index
    %c1_41 = arith.constant 1 : index
    %c0_42 = arith.constant 0 : index
    %29 = vector.load %arg16[%c0_40, %c1_41, %c0_42] : memref<18x18x128xf32, #tpu.memory_space<vmem>>, vector<16x16x128xf32>
    %30 = vector.shape_cast %29 : vector<16x16x128xf32> to vector<256x128xf32>
    %31 = arith.truncf %30 : vector<256x128xf32> to vector<256x128xbf16>
    %c0_43 = arith.constant 0 : index
    %c128 = arith.constant 128 : index
    %32 = vector.load %arg18[%c0_43, %c128] : memref<256x1152xbf16, #tpu.memory_space<vmem>>, vector<256x128xbf16>
    tpu.vector_store %arg18[%c0_43, %c128], %31 {strides = array<i32>} : memref<256x1152xbf16, #tpu.memory_space<vmem>>, vector<256x128xbf16>,
    %c0_44 = arith.constant 0 : index
    %c2 = arith.constant 2 : index
    %c0_45 = arith.constant 0 : index
    %33 = vector.load %arg16[%c0_44, %c2, %c0_45] : memref<18x18x128xf32, #tpu.memory_space<vmem>>, vector<16x16x128xf32>
    %34 = vector.shape_cast %33 : vector<16x16x128xf32> to vector<256x128xf32>
    %35 = arith.truncf %34 : vector<256x128xf32> to vector<256x128xbf16>
    %c0_46 = arith.constant 0 : index
    %c256 = arith.constant 256 : index
    %36 = vector.load %arg18[%c0_46, %c256] : memref<256x1152xbf16, #tpu.memory_space<vmem>>, vector<256x128xbf16>
    tpu.vector_store %arg18[%c0_46, %c256], %35 {strides = array<i32>} : memref<256x1152xbf16, #tpu.memory_space<vmem>>, vector<256x128xbf16>,
    %c1_47 = arith.constant 1 : index
    %c0_48 = arith.constant 0 : index
    %c0_49 = arith.constant 0 : index
    %37 = vector.load %arg16[%c1_47, %c0_48, %c0_49] : memref<18x18x128xf32, #tpu.memory_space<vmem>>, vector<16x16x128xf32>
    %38 = vector.shape_cast %37 : vector<16x16x128xf32> to vector<256x128xf32>
    %39 = arith.truncf %38 : vector<256x128xf32> to vector<256x128xbf16>
    %c0_50 = arith.constant 0 : index
    %c384 = arith.constant 384 : index
    %40 = vector.load %arg18[%c0_50, %c384] : memref<256x1152xbf16, #tpu.memory_space<vmem>>, vector<256x128xbf16>
    tpu.vector_store %arg18[%c0_50, %c384], %39 {strides = array<i32>} : memref<256x1152xbf16, #tpu.memory_space<vmem>>, vector<256x128xbf16>,
    %c1_51 = arith.constant 1 : index
    %c1_52 = arith.constant 1 : index
    %c0_53 = arith.constant 0 : index
    %41 = vector.load %arg16[%c1_51, %c1_52, %c0_53] : memref<18x18x128xf32, #tpu.memory_space<vmem>>, vector<16x16x128xf32>
    %42 = vector.shape_cast %41 : vector<16x16x128xf32> to vector<256x128xf32>
    %43 = arith.truncf %42 : vector<256x128xf32> to vector<256x128xbf16>
    %c0_54 = arith.constant 0 : index
    %c512 = arith.constant 512 : index
    %44 = vector.load %arg18[%c0_54, %c512] : memref<256x1152xbf16, #tpu.memory_space<vmem>>, vector<256x128xbf16>
    tpu.vector_store %arg18[%c0_54, %c512], %43 {strides = array<i32>} : memref<256x1152xbf16, #tpu.memory_space<vmem>>, vector<256x128xbf16>,
    %c1_55 = arith.constant 1 : index
    %c2_56 = arith.constant 2 : index
    %c0_57 = arith.constant 0 : index
    %45 = vector.load %arg16[%c1_55, %c2_56, %c0_57] : memref<18x18x128xf32, #tpu.memory_space<vmem>>, vector<16x16x128xf32>
    %46 = vector.shape_cast %45 : vector<16x16x128xf32> to vector<256x128xf32>
    %47 = arith.truncf %46 : vector<256x128xf32> to vector<256x128xbf16>
    %c0_58 = arith.constant 0 : index
    %c640 = arith.constant 640 : index
    %48 = vector.load %arg18[%c0_58, %c640] : memref<256x1152xbf16, #tpu.memory_space<vmem>>, vector<256x128xbf16>
    tpu.vector_store %arg18[%c0_58, %c640], %47 {strides = array<i32>} : memref<256x1152xbf16, #tpu.memory_space<vmem>>, vector<256x128xbf16>,
    %c2_59 = arith.constant 2 : index
    %c0_60 = arith.constant 0 : index
    %c0_61 = arith.constant 0 : index
    %49 = vector.load %arg16[%c2_59, %c0_60, %c0_61] : memref<18x18x128xf32, #tpu.memory_space<vmem>>, vector<16x16x128xf32>
    %50 = vector.shape_cast %49 : vector<16x16x128xf32> to vector<256x128xf32>
    %51 = arith.truncf %50 : vector<256x128xf32> to vector<256x128xbf16>
    %c0_62 = arith.constant 0 : index
    %c768 = arith.constant 768 : index
    %52 = vector.load %arg18[%c0_62, %c768] : memref<256x1152xbf16, #tpu.memory_space<vmem>>, vector<256x128xbf16>
    tpu.vector_store %arg18[%c0_62, %c768], %51 {strides = array<i32>} : memref<256x1152xbf16, #tpu.memory_space<vmem>>, vector<256x128xbf16>,
    %c2_63 = arith.constant 2 : index
    %c1_64 = arith.constant 1 : index
    %c0_65 = arith.constant 0 : index
    %53 = vector.load %arg16[%c2_63, %c1_64, %c0_65] : memref<18x18x128xf32, #tpu.memory_space<vmem>>, vector<16x16x128xf32>
    %54 = vector.shape_cast %53 : vector<16x16x128xf32> to vector<256x128xf32>
    %55 = arith.truncf %54 : vector<256x128xf32> to vector<256x128xbf16>
    %c0_66 = arith.constant 0 : index
    %c896 = arith.constant 896 : index
    %56 = vector.load %arg18[%c0_66, %c896] : memref<256x1152xbf16, #tpu.memory_space<vmem>>, vector<256x128xbf16>
    tpu.vector_store %arg18[%c0_66, %c896], %55 {strides = array<i32>} : memref<256x1152xbf16, #tpu.memory_space<vmem>>, vector<256x128xbf16>,
    %c2_67 = arith.constant 2 : index
    %c2_68 = arith.constant 2 : index
    %c0_69 = arith.constant 0 : index
    %57 = vector.load %arg16[%c2_67, %c2_68, %c0_69] : memref<18x18x128xf32, #tpu.memory_space<vmem>>, vector<16x16x128xf32>
    %58 = vector.shape_cast %57 : vector<16x16x128xf32> to vector<256x128xf32>
    %59 = arith.truncf %58 : vector<256x128xf32> to vector<256x128xbf16>
    %c0_70 = arith.constant 0 : index
    %c1024 = arith.constant 1024 : index
    %60 = vector.load %arg18[%c0_70, %c1024] : memref<256x1152xbf16, #tpu.memory_space<vmem>>, vector<256x128xbf16>
    tpu.vector_store %arg18[%c0_70, %c1024], %59 {strides = array<i32>} : memref<256x1152xbf16, #tpu.memory_space<vmem>>, vector<256x128xbf16>,
    %c0_71 = arith.constant 0 : index
    %c0_72 = arith.constant 0 : index
    %61 = vector.load %arg18[%c0_71, %c0_72] : memref<256x1152xbf16, #tpu.memory_space<vmem>>, vector<256x1152xbf16>
    %c0_73 = arith.constant 0 : index
    %c0_74 = arith.constant 0 : index
    %62 = vector.load %arg5[%c0_73, %c0_74] : memref<1152x128xbf16, #tpu.memory_space<vmem>>, vector<1152x128xbf16>
    %cst_75 = arith.constant dense<0.000000e+00> : vector<256x128xf32>
    %63 = tpu.matmul %61, %62, %cst_75 {dimension_numbers = #tpu.dot_dimension_numbers<[1], [0], [0], [1], [0, 0, 1, 1], [], []>} : vector<256x1152xbf16>, vector<1152x128xbf16>, vector<256x128xf32> -> vector<256x128xf32>
    %c0_76 = arith.constant 0 : index
    %c0_77 = arith.constant 0 : index
    %64 = vector.load %arg6[%c0_76, %c0_77] : memref<1x128xf32, #tpu.memory_space<vmem>>, vector<1x128xf32>
    %65 = vector.broadcast %64 : vector<1x128xf32> to vector<256x128xf32>
    %66 = arith.addf %63, %65 : vector<256x128xf32>
    %67 = vector.shape_cast %66 : vector<256x128xf32> to vector<8x32x128xf32>
    %68 = vector.extract_strided_slice %67 {offsets = [0, 0, 0], sizes = [8, 16, 128], strides = [1, 1, 1]} : vector<8x32x128xf32> to vector<8x16x128xf32>
    %69 = vector.extract_strided_slice %67 {offsets = [0, 16, 0], sizes = [8, 16, 128], strides = [1, 1, 1]} : vector<8x32x128xf32> to vector<8x16x128xf32>
    %70 = arith.maximumf %68, %69 : vector<8x16x128xf32>
    %71 = vector.shape_cast %70 : vector<8x16x128xf32> to vector<128x128xf32>
    %c0_78 = arith.constant 0 : index
    %c0_79 = arith.constant 0 : index
    %72 = vector.load %arg20[%c0_78, %c0_79] : memref<128x128xf32, #tpu.memory_space<vmem>>, vector<128x128xf32>
    tpu.vector_store %arg20[%c0_78, %c0_79], %71 {strides = array<i32>} : memref<128x128xf32, #tpu.memory_space<vmem>>, vector<128x128xf32>,
    %c0_80 = arith.constant 0 : index
    %c0_81 = arith.constant 0 : index
    %73 = tpu.strided_load %arg20[%c0_80, %c0_81] {strides = array<i32: 2, 1>} : memref<128x128xf32, #tpu.memory_space<vmem>>, vector<64x128xf32>
    %c1_82 = arith.constant 1 : index
    %c0_83 = arith.constant 0 : index
    %74 = tpu.strided_load %arg20[%c1_82, %c0_83] {strides = array<i32: 2, 1>} : memref<128x128xf32, #tpu.memory_space<vmem>>, vector<64x128xf32>
    %75 = arith.maximumf %73, %74 : vector<64x128xf32>
    %c0_84 = arith.constant 0 : index
    %c0_85 = arith.constant 0 : index
    %c0_86 = arith.constant 0 : index
    %c0_87 = arith.constant 0 : index
    %76 = vector.load %arg2[%c0_84, %c0_85, %c0_86, %c0_87] : memref<1x8x8x128xf32, #tpu.memory_space<vmem>>, vector<1x8x8x128xf32>
    %77 = vector.shape_cast %76 : vector<1x8x8x128xf32> to vector<8x8x128xf32>
    %c0_88 = arith.constant 0 : index
    %c0_89 = arith.constant 0 : index
    %78 = vector.load %arg7[%c0_88, %c0_89] : memref<1x128xf32, #tpu.memory_space<vmem>>, vector<1x128xf32>
    %79 = vector.shape_cast %78 : vector<1x128xf32> to vector<1x1x128xf32>
    %80 = vector.broadcast %79 : vector<1x1x128xf32> to vector<8x8x128xf32>
    %81 = arith.mulf %77, %80 : vector<8x8x128xf32>
    %c0_90 = arith.constant 0 : index
    %c0_91 = arith.constant 0 : index
    %82 = vector.load %arg8[%c0_90, %c0_91] : memref<1x128xf32, #tpu.memory_space<vmem>>, vector<1x128xf32>
    %83 = vector.shape_cast %82 : vector<1x128xf32> to vector<1x1x128xf32>
    %84 = vector.broadcast %83 : vector<1x1x128xf32> to vector<8x8x128xf32>
    %85 = arith.addf %81, %84 : vector<8x8x128xf32>
    %cst_92 = arith.constant 0.000000e+00 : f32
    %86 = vector.broadcast %cst_92 : f32 to vector<8x8x128xf32>
    %87 = arith.maximumf %85, %86 : vector<8x8x128xf32>
    %c1_93 = arith.constant 1 : index
    %c1_94 = arith.constant 1 : index
    %c0_95 = arith.constant 0 : index
    %88 = vector.load %arg17[%c1_93, %c1_94, %c0_95] : memref<10x10x128xf32, #tpu.memory_space<vmem>>, vector<8x8x128xf32>
    tpu.vector_store %arg17[%c1_93, %c1_94, %c0_95], %87 {strides = array<i32>} : memref<10x10x128xf32, #tpu.memory_space<vmem>>, vector<8x8x128xf32>,
    %c0_96 = arith.constant 0 : index
    %c0_97 = arith.constant 0 : index
    %c0_98 = arith.constant 0 : index
    %89 = vector.load %arg17[%c0_96, %c0_97, %c0_98] : memref<10x10x128xf32, #tpu.memory_space<vmem>>, vector<8x8x128xf32>
    %90 = vector.shape_cast %89 : vector<8x8x128xf32> to vector<64x128xf32>
    %91 = arith.truncf %90 : vector<64x128xf32> to vector<64x128xbf16>
    %c0_99 = arith.constant 0 : index
    %c0_100 = arith.constant 0 : index
    %92 = vector.load %arg19[%c0_99, %c0_100] : memref<64x1152xbf16, #tpu.memory_space<vmem>>, vector<64x128xbf16>
    tpu.vector_store %arg19[%c0_99, %c0_100], %91 {strides = array<i32>} : memref<64x1152xbf16, #tpu.memory_space<vmem>>, vector<64x128xbf16>,
    %c0_101 = arith.constant 0 : index
    %c1_102 = arith.constant 1 : index
    %c0_103 = arith.constant 0 : index
    %93 = vector.load %arg17[%c0_101, %c1_102, %c0_103] : memref<10x10x128xf32, #tpu.memory_space<vmem>>, vector<8x8x128xf32>
    %94 = vector.shape_cast %93 : vector<8x8x128xf32> to vector<64x128xf32>
    %95 = arith.truncf %94 : vector<64x128xf32> to vector<64x128xbf16>
    %c0_104 = arith.constant 0 : index
    %c128_105 = arith.constant 128 : index
    %96 = vector.load %arg19[%c0_104, %c128_105] : memref<64x1152xbf16, #tpu.memory_space<vmem>>, vector<64x128xbf16>
    tpu.vector_store %arg19[%c0_104, %c128_105], %95 {strides = array<i32>} : memref<64x1152xbf16, #tpu.memory_space<vmem>>, vector<64x128xbf16>,
    %c0_106 = arith.constant 0 : index
    %c2_107 = arith.constant 2 : index
    %c0_108 = arith.constant 0 : index
    %97 = vector.load %arg17[%c0_106, %c2_107, %c0_108] : memref<10x10x128xf32, #tpu.memory_space<vmem>>, vector<8x8x128xf32>
    %98 = vector.shape_cast %97 : vector<8x8x128xf32> to vector<64x128xf32>
    %99 = arith.truncf %98 : vector<64x128xf32> to vector<64x128xbf16>
    %c0_109 = arith.constant 0 : index
    %c256_110 = arith.constant 256 : index
    %100 = vector.load %arg19[%c0_109, %c256_110] : memref<64x1152xbf16, #tpu.memory_space<vmem>>, vector<64x128xbf16>
    tpu.vector_store %arg19[%c0_109, %c256_110], %99 {strides = array<i32>} : memref<64x1152xbf16, #tpu.memory_space<vmem>>, vector<64x128xbf16>,
    %c1_111 = arith.constant 1 : index
    %c0_112 = arith.constant 0 : index
    %c0_113 = arith.constant 0 : index
    %101 = vector.load %arg17[%c1_111, %c0_112, %c0_113] : memref<10x10x128xf32, #tpu.memory_space<vmem>>, vector<8x8x128xf32>
    %102 = vector.shape_cast %101 : vector<8x8x128xf32> to vector<64x128xf32>
    %103 = arith.truncf %102 : vector<64x128xf32> to vector<64x128xbf16>
    %c0_114 = arith.constant 0 : index
    %c384_115 = arith.constant 384 : index
    %104 = vector.load %arg19[%c0_114, %c384_115] : memref<64x1152xbf16, #tpu.memory_space<vmem>>, vector<64x128xbf16>
    tpu.vector_store %arg19[%c0_114, %c384_115], %103 {strides = array<i32>} : memref<64x1152xbf16, #tpu.memory_space<vmem>>, vector<64x128xbf16>,
    %c1_116 = arith.constant 1 : index
    %c1_117 = arith.constant 1 : index
    %c0_118 = arith.constant 0 : index
    %105 = vector.load %arg17[%c1_116, %c1_117, %c0_118] : memref<10x10x128xf32, #tpu.memory_space<vmem>>, vector<8x8x128xf32>
    %106 = vector.shape_cast %105 : vector<8x8x128xf32> to vector<64x128xf32>
    %107 = arith.truncf %106 : vector<64x128xf32> to vector<64x128xbf16>
    %c0_119 = arith.constant 0 : index
    %c512_120 = arith.constant 512 : index
    %108 = vector.load %arg19[%c0_119, %c512_120] : memref<64x1152xbf16, #tpu.memory_space<vmem>>, vector<64x128xbf16>
    tpu.vector_store %arg19[%c0_119, %c512_120], %107 {strides = array<i32>} : memref<64x1152xbf16, #tpu.memory_space<vmem>>, vector<64x128xbf16>,
    %c1_121 = arith.constant 1 : index
    %c2_122 = arith.constant 2 : index
    %c0_123 = arith.constant 0 : index
    %109 = vector.load %arg17[%c1_121, %c2_122, %c0_123] : memref<10x10x128xf32, #tpu.memory_space<vmem>>, vector<8x8x128xf32>
    %110 = vector.shape_cast %109 : vector<8x8x128xf32> to vector<64x128xf32>
    %111 = arith.truncf %110 : vector<64x128xf32> to vector<64x128xbf16>
    %c0_124 = arith.constant 0 : index
    %c640_125 = arith.constant 640 : index
    %112 = vector.load %arg19[%c0_124, %c640_125] : memref<64x1152xbf16, #tpu.memory_space<vmem>>, vector<64x128xbf16>
    tpu.vector_store %arg19[%c0_124, %c640_125], %111 {strides = array<i32>} : memref<64x1152xbf16, #tpu.memory_space<vmem>>, vector<64x128xbf16>,
    %c2_126 = arith.constant 2 : index
    %c0_127 = arith.constant 0 : index
    %c0_128 = arith.constant 0 : index
    %113 = vector.load %arg17[%c2_126, %c0_127, %c0_128] : memref<10x10x128xf32, #tpu.memory_space<vmem>>, vector<8x8x128xf32>
    %114 = vector.shape_cast %113 : vector<8x8x128xf32> to vector<64x128xf32>
    %115 = arith.truncf %114 : vector<64x128xf32> to vector<64x128xbf16>
    %c0_129 = arith.constant 0 : index
    %c768_130 = arith.constant 768 : index
    %116 = vector.load %arg19[%c0_129, %c768_130] : memref<64x1152xbf16, #tpu.memory_space<vmem>>, vector<64x128xbf16>
    tpu.vector_store %arg19[%c0_129, %c768_130], %115 {strides = array<i32>} : memref<64x1152xbf16, #tpu.memory_space<vmem>>, vector<64x128xbf16>,
    %c2_131 = arith.constant 2 : index
    %c1_132 = arith.constant 1 : index
    %c0_133 = arith.constant 0 : index
    %117 = vector.load %arg17[%c2_131, %c1_132, %c0_133] : memref<10x10x128xf32, #tpu.memory_space<vmem>>, vector<8x8x128xf32>
    %118 = vector.shape_cast %117 : vector<8x8x128xf32> to vector<64x128xf32>
    %119 = arith.truncf %118 : vector<64x128xf32> to vector<64x128xbf16>
    %c0_134 = arith.constant 0 : index
    %c896_135 = arith.constant 896 : index
    %120 = vector.load %arg19[%c0_134, %c896_135] : memref<64x1152xbf16, #tpu.memory_space<vmem>>, vector<64x128xbf16>
    tpu.vector_store %arg19[%c0_134, %c896_135], %119 {strides = array<i32>} : memref<64x1152xbf16, #tpu.memory_space<vmem>>, vector<64x128xbf16>,
    %c2_136 = arith.constant 2 : index
    %c2_137 = arith.constant 2 : index
    %c0_138 = arith.constant 0 : index
    %121 = vector.load %arg17[%c2_136, %c2_137, %c0_138] : memref<10x10x128xf32, #tpu.memory_space<vmem>>, vector<8x8x128xf32>
    %122 = vector.shape_cast %121 : vector<8x8x128xf32> to vector<64x128xf32>
    %123 = arith.truncf %122 : vector<64x128xf32> to vector<64x128xbf16>
    %c0_139 = arith.constant 0 : index
    %c1024_140 = arith.constant 1024 : index
    %124 = vector.load %arg19[%c0_139, %c1024_140] : memref<64x1152xbf16, #tpu.memory_space<vmem>>, vector<64x128xbf16>
    tpu.vector_store %arg19[%c0_139, %c1024_140], %123 {strides = array<i32>} : memref<64x1152xbf16, #tpu.memory_space<vmem>>, vector<64x128xbf16>,
    %c0_141 = arith.constant 0 : index
    %c0_142 = arith.constant 0 : index
    %125 = vector.load %arg19[%c0_141, %c0_142] : memref<64x1152xbf16, #tpu.memory_space<vmem>>, vector<64x1152xbf16>
    %c0_143 = arith.constant 0 : index
    %c0_144 = arith.constant 0 : index
    %126 = vector.load %arg9[%c0_143, %c0_144] : memref<1152x128xbf16, #tpu.memory_space<vmem>>, vector<1152x128xbf16>
    %cst_145 = arith.constant dense<0.000000e+00> : vector<64x128xf32>
    %127 = tpu.matmul %125, %126, %cst_145 {dimension_numbers = #tpu.dot_dimension_numbers<[1], [0], [0], [1], [0, 0, 1, 1], [], []>} : vector<64x1152xbf16>, vector<1152x128xbf16>, vector<64x128xf32> -> vector<64x128xf32>
    %c0_146 = arith.constant 0 : index
    %c0_147 = arith.constant 0 : index
    %128 = vector.load %arg10[%c0_146, %c0_147] : memref<1x128xf32, #tpu.memory_space<vmem>>, vector<1x128xf32>
    %129 = vector.broadcast %128 : vector<1x128xf32> to vector<64x128xf32>
    %130 = arith.addf %127, %129 : vector<64x128xf32>
    %131 = arith.addf %75, %130 : vector<64x128xf32>
    %c0_148 = arith.constant 0 : index
    %c0_149 = arith.constant 0 : index
    %132 = vector.load %arg11[%c0_148, %c0_149] : memref<1x128xf32, #tpu.memory_space<vmem>>, vector<1x128xf32>
    %133 = vector.broadcast %132 : vector<1x128xf32> to vector<64x128xf32>
    %134 = arith.mulf %131, %133 : vector<64x128xf32>
    %c0_150 = arith.constant 0 : index
    %c0_151 = arith.constant 0 : index
    %135 = vector.load %arg12[%c0_150, %c0_151] : memref<1x128xf32, #tpu.memory_space<vmem>>, vector<1x128xf32>
    %136 = vector.broadcast %135 : vector<1x128xf32> to vector<64x128xf32>
    %137 = arith.addf %134, %136 : vector<64x128xf32>
    %cst_152 = arith.constant 0.000000e+00 : f32
    %138 = vector.broadcast %cst_152 : f32 to vector<64x128xf32>
    %139 = arith.maximumf %137, %138 : vector<64x128xf32>
    %140 = vector.shape_cast %139 : vector<64x128xf32> to vector<8x8x128xf32>
    %c1_153 = arith.constant 1 : index
    %c1_154 = arith.constant 1 : index
    %c0_155 = arith.constant 0 : index
    %141 = vector.load %arg17[%c1_153, %c1_154, %c0_155] : memref<10x10x128xf32, #tpu.memory_space<vmem>>, vector<8x8x128xf32>
    tpu.vector_store %arg17[%c1_153, %c1_154, %c0_155], %140 {strides = array<i32>} : memref<10x10x128xf32, #tpu.memory_space<vmem>>, vector<8x8x128xf32>,
    %c0_156 = arith.constant 0 : index
    %c0_157 = arith.constant 0 : index
    %c0_158 = arith.constant 0 : index
    %142 = vector.load %arg17[%c0_156, %c0_157, %c0_158] : memref<10x10x128xf32, #tpu.memory_space<vmem>>, vector<8x8x128xf32>
    %143 = vector.shape_cast %142 : vector<8x8x128xf32> to vector<64x128xf32>
    %144 = arith.truncf %143 : vector<64x128xf32> to vector<64x128xbf16>
    %c0_159 = arith.constant 0 : index
    %c0_160 = arith.constant 0 : index
    %145 = vector.load %arg19[%c0_159, %c0_160] : memref<64x1152xbf16, #tpu.memory_space<vmem>>, vector<64x128xbf16>
    tpu.vector_store %arg19[%c0_159, %c0_160], %144 {strides = array<i32>} : memref<64x1152xbf16, #tpu.memory_space<vmem>>, vector<64x128xbf16>,
    %c0_161 = arith.constant 0 : index
    %c1_162 = arith.constant 1 : index
    %c0_163 = arith.constant 0 : index
    %146 = vector.load %arg17[%c0_161, %c1_162, %c0_163] : memref<10x10x128xf32, #tpu.memory_space<vmem>>, vector<8x8x128xf32>
    %147 = vector.shape_cast %146 : vector<8x8x128xf32> to vector<64x128xf32>
    %148 = arith.truncf %147 : vector<64x128xf32> to vector<64x128xbf16>
    %c0_164 = arith.constant 0 : index
    %c128_165 = arith.constant 128 : index
    %149 = vector.load %arg19[%c0_164, %c128_165] : memref<64x1152xbf16, #tpu.memory_space<vmem>>, vector<64x128xbf16>
    tpu.vector_store %arg19[%c0_164, %c128_165], %148 {strides = array<i32>} : memref<64x1152xbf16, #tpu.memory_space<vmem>>, vector<64x128xbf16>,
    %c0_166 = arith.constant 0 : index
    %c2_167 = arith.constant 2 : index
    %c0_168 = arith.constant 0 : index
    %150 = vector.load %arg17[%c0_166, %c2_167, %c0_168] : memref<10x10x128xf32, #tpu.memory_space<vmem>>, vector<8x8x128xf32>
    %151 = vector.shape_cast %150 : vector<8x8x128xf32> to vector<64x128xf32>
    %152 = arith.truncf %151 : vector<64x128xf32> to vector<64x128xbf16>
    %c0_169 = arith.constant 0 : index
    %c256_170 = arith.constant 256 : index
    %153 = vector.load %arg19[%c0_169, %c256_170] : memref<64x1152xbf16, #tpu.memory_space<vmem>>, vector<64x128xbf16>
    tpu.vector_store %arg19[%c0_169, %c256_170], %152 {strides = array<i32>} : memref<64x1152xbf16, #tpu.memory_space<vmem>>, vector<64x128xbf16>,
    %c1_171 = arith.constant 1 : index
    %c0_172 = arith.constant 0 : index
    %c0_173 = arith.constant 0 : index
    %154 = vector.load %arg17[%c1_171, %c0_172, %c0_173] : memref<10x10x128xf32, #tpu.memory_space<vmem>>, vector<8x8x128xf32>
    %155 = vector.shape_cast %154 : vector<8x8x128xf32> to vector<64x128xf32>
    %156 = arith.truncf %155 : vector<64x128xf32> to vector<64x128xbf16>
    %c0_174 = arith.constant 0 : index
    %c384_175 = arith.constant 384 : index
    %157 = vector.load %arg19[%c0_174, %c384_175] : memref<64x1152xbf16, #tpu.memory_space<vmem>>, vector<64x128xbf16>
    tpu.vector_store %arg19[%c0_174, %c384_175], %156 {strides = array<i32>} : memref<64x1152xbf16, #tpu.memory_space<vmem>>, vector<64x128xbf16>,
    %c1_176 = arith.constant 1 : index
    %c1_177 = arith.constant 1 : index
    %c0_178 = arith.constant 0 : index
    %158 = vector.load %arg17[%c1_176, %c1_177, %c0_178] : memref<10x10x128xf32, #tpu.memory_space<vmem>>, vector<8x8x128xf32>
    %159 = vector.shape_cast %158 : vector<8x8x128xf32> to vector<64x128xf32>
    %160 = arith.truncf %159 : vector<64x128xf32> to vector<64x128xbf16>
    %c0_179 = arith.constant 0 : index
    %c512_180 = arith.constant 512 : index
    %161 = vector.load %arg19[%c0_179, %c512_180] : memref<64x1152xbf16, #tpu.memory_space<vmem>>, vector<64x128xbf16>
    tpu.vector_store %arg19[%c0_179, %c512_180], %160 {strides = array<i32>} : memref<64x1152xbf16, #tpu.memory_space<vmem>>, vector<64x128xbf16>,
    %c1_181 = arith.constant 1 : index
    %c2_182 = arith.constant 2 : index
    %c0_183 = arith.constant 0 : index
    %162 = vector.load %arg17[%c1_181, %c2_182, %c0_183] : memref<10x10x128xf32, #tpu.memory_space<vmem>>, vector<8x8x128xf32>
    %163 = vector.shape_cast %162 : vector<8x8x128xf32> to vector<64x128xf32>
    %164 = arith.truncf %163 : vector<64x128xf32> to vector<64x128xbf16>
    %c0_184 = arith.constant 0 : index
    %c640_185 = arith.constant 640 : index
    %165 = vector.load %arg19[%c0_184, %c640_185] : memref<64x1152xbf16, #tpu.memory_space<vmem>>, vector<64x128xbf16>
    tpu.vector_store %arg19[%c0_184, %c640_185], %164 {strides = array<i32>} : memref<64x1152xbf16, #tpu.memory_space<vmem>>, vector<64x128xbf16>,
    %c2_186 = arith.constant 2 : index
    %c0_187 = arith.constant 0 : index
    %c0_188 = arith.constant 0 : index
    %166 = vector.load %arg17[%c2_186, %c0_187, %c0_188] : memref<10x10x128xf32, #tpu.memory_space<vmem>>, vector<8x8x128xf32>
    %167 = vector.shape_cast %166 : vector<8x8x128xf32> to vector<64x128xf32>
    %168 = arith.truncf %167 : vector<64x128xf32> to vector<64x128xbf16>
    %c0_189 = arith.constant 0 : index
    %c768_190 = arith.constant 768 : index
    %169 = vector.load %arg19[%c0_189, %c768_190] : memref<64x1152xbf16, #tpu.memory_space<vmem>>, vector<64x128xbf16>
    tpu.vector_store %arg19[%c0_189, %c768_190], %168 {strides = array<i32>} : memref<64x1152xbf16, #tpu.memory_space<vmem>>, vector<64x128xbf16>,
    %c2_191 = arith.constant 2 : index
    %c1_192 = arith.constant 1 : index
    %c0_193 = arith.constant 0 : index
    %170 = vector.load %arg17[%c2_191, %c1_192, %c0_193] : memref<10x10x128xf32, #tpu.memory_space<vmem>>, vector<8x8x128xf32>
    %171 = vector.shape_cast %170 : vector<8x8x128xf32> to vector<64x128xf32>
    %172 = arith.truncf %171 : vector<64x128xf32> to vector<64x128xbf16>
    %c0_194 = arith.constant 0 : index
    %c896_195 = arith.constant 896 : index
    %173 = vector.load %arg19[%c0_194, %c896_195] : memref<64x1152xbf16, #tpu.memory_space<vmem>>, vector<64x128xbf16>
    tpu.vector_store %arg19[%c0_194, %c896_195], %172 {strides = array<i32>} : memref<64x1152xbf16, #tpu.memory_space<vmem>>, vector<64x128xbf16>,
    %c2_196 = arith.constant 2 : index
    %c2_197 = arith.constant 2 : index
    %c0_198 = arith.constant 0 : index
    %174 = vector.load %arg17[%c2_196, %c2_197, %c0_198] : memref<10x10x128xf32, #tpu.memory_space<vmem>>, vector<8x8x128xf32>
    %175 = vector.shape_cast %174 : vector<8x8x128xf32> to vector<64x128xf32>
    %176 = arith.truncf %175 : vector<64x128xf32> to vector<64x128xbf16>
    %c0_199 = arith.constant 0 : index
    %c1024_200 = arith.constant 1024 : index
    %177 = vector.load %arg19[%c0_199, %c1024_200] : memref<64x1152xbf16, #tpu.memory_space<vmem>>, vector<64x128xbf16>
    tpu.vector_store %arg19[%c0_199, %c1024_200], %176 {strides = array<i32>} : memref<64x1152xbf16, #tpu.memory_space<vmem>>, vector<64x128xbf16>,
    %c0_201 = arith.constant 0 : index
    %c0_202 = arith.constant 0 : index
    %178 = vector.load %arg19[%c0_201, %c0_202] : memref<64x1152xbf16, #tpu.memory_space<vmem>>, vector<64x1152xbf16>
    %c0_203 = arith.constant 0 : index
    %c0_204 = arith.constant 0 : index
    %179 = vector.load %arg13[%c0_203, %c0_204] : memref<1152x128xbf16, #tpu.memory_space<vmem>>, vector<1152x128xbf16>
    %cst_205 = arith.constant dense<0.000000e+00> : vector<64x128xf32>
    %180 = tpu.matmul %178, %179, %cst_205 {dimension_numbers = #tpu.dot_dimension_numbers<[1], [0], [0], [1], [0, 0, 1, 1], [], []>} : vector<64x1152xbf16>, vector<1152x128xbf16>, vector<64x128xf32> -> vector<64x128xf32>
    %c0_206 = arith.constant 0 : index
    %c0_207 = arith.constant 0 : index
    %181 = vector.load %arg14[%c0_206, %c0_207] : memref<1x128xf32, #tpu.memory_space<vmem>>, vector<1x128xf32>
    %182 = vector.broadcast %181 : vector<1x128xf32> to vector<64x128xf32>
    %183 = arith.addf %180, %182 : vector<64x128xf32>
    %184 = vector.shape_cast %183 : vector<64x128xf32> to vector<8x8x128xf32>
    %185 = arith.mulf %184, %77 : vector<8x8x128xf32>
    %c0_208 = arith.constant 0 : index
    %c0_209 = arith.constant 0 : index
    %c0_210 = arith.constant 0 : index
    %c0_211 = arith.constant 0 : index
    %186 = vector.load %arg15[%c0_208, %c0_209, %c0_210, %c0_211] : memref<1x8x8x128xf32, #tpu.memory_space<vmem>>, vector<1x8x8x128xf32>
    %187 = vector.shape_cast %186 : vector<1x8x8x128xf32> to vector<8x8x128xf32>
    %188 = vector.shape_cast %185 : vector<8x8x128xf32> to vector<1x8x8x128xf32>
    tpu.vector_store %arg15[%c0_208, %c0_209, %c0_210, %c0_211], %188 {strides = array<i32>} : memref<1x8x8x128xf32, #tpu.memory_space<vmem>>, vector<1x8x8x128xf32>,
    return
  }
  func.func @transform_0(%arg0: i32) -> (i32, i32, i32, i32) {
    %c0_i32 = arith.constant 0 : i32
    %c0_i32_0 = arith.constant 0 : i32
    %c0_i32_1 = arith.constant 0 : i32
    %c0_i32_2 = arith.constant 0 : i32
    return %arg0, %c0_i32, %c0_i32_0, %c0_i32_1 : i32, i32, i32, i32
  }
  func.func @transform_1(%arg0: i32) -> (i32, i32, i32, i32) {
    %c0_i32 = arith.constant 0 : i32
    %c0_i32_0 = arith.constant 0 : i32
    %c0_i32_1 = arith.constant 0 : i32
    %c0_i32_2 = arith.constant 0 : i32
    return %arg0, %c0_i32, %c0_i32_0, %c0_i32_1 : i32, i32, i32, i32
  }
  func.func @transform_2(%arg0: i32) -> (i32, i32) {
    %c0_i32 = arith.constant 0 : i32
    %c0_i32_0 = arith.constant 0 : i32
    %c0_i32_1 = arith.constant 0 : i32
    return %c0_i32, %c0_i32_0 : i32, i32
  }
  func.func @transform_3(%arg0: i32) -> (i32, i32) {
    %c0_i32 = arith.constant 0 : i32
    %c0_i32_0 = arith.constant 0 : i32
    %c0_i32_1 = arith.constant 0 : i32
    return %c0_i32, %c0_i32_0 : i32, i32
  }
  func.func @transform_4(%arg0: i32) -> (i32, i32) {
    %c0_i32 = arith.constant 0 : i32
    %c0_i32_0 = arith.constant 0 : i32
    %c0_i32_1 = arith.constant 0 : i32
    return %c0_i32, %c0_i32_0 : i32, i32
  }
  func.func @transform_5(%arg0: i32) -> (i32, i32) {
    %c0_i32 = arith.constant 0 : i32
    %c0_i32_0 = arith.constant 0 : i32
    %c0_i32_1 = arith.constant 0 : i32
    return %c0_i32, %c0_i32_0 : i32, i32
  }
  func.func @transform_6(%arg0: i32) -> (i32, i32) {
    %c0_i32 = arith.constant 0 : i32
    %c0_i32_0 = arith.constant 0 : i32
    %c0_i32_1 = arith.constant 0 : i32
    return %c0_i32, %c0_i32_0 : i32, i32
  }
  func.func @transform_7(%arg0: i32) -> (i32, i32) {
    %c0_i32 = arith.constant 0 : i32
    %c0_i32_0 = arith.constant 0 : i32
    %c0_i32_1 = arith.constant 0 : i32
    return %c0_i32, %c0_i32_0 : i32, i32
  }
  func.func @transform_8(%arg0: i32) -> (i32, i32) {
    %c0_i32 = arith.constant 0 : i32
    %c0_i32_0 = arith.constant 0 : i32
    %c0_i32_1 = arith.constant 0 : i32
    return %c0_i32, %c0_i32_0 : i32, i32
  }
  func.func @transform_9(%arg0: i32) -> (i32, i32) {
    %c0_i32 = arith.constant 0 : i32
    %c0_i32_0 = arith.constant 0 : i32
    %c0_i32_1 = arith.constant 0 : i32
    return %c0_i32, %c0_i32_0 : i32, i32
  }
  func.func @transform_10(%arg0: i32) -> (i32, i32) {
    %c0_i32 = arith.constant 0 : i32
    %c0_i32_0 = arith.constant 0 : i32
    %c0_i32_1 = arith.constant 0 : i32
    return %c0_i32, %c0_i32_0 : i32, i32
  }
  func.func @transform_11(%arg0: i32) -> (i32, i32) {
    %c0_i32 = arith.constant 0 : i32
    %c0_i32_0 = arith.constant 0 : i32
    %c0_i32_1 = arith.constant 0 : i32
    return %c0_i32, %c0_i32_0 : i32, i32
  }
  func.func @transform_12(%arg0: i32) -> (i32, i32) {
    %c0_i32 = arith.constant 0 : i32
    %c0_i32_0 = arith.constant 0 : i32
    %c0_i32_1 = arith.constant 0 : i32
    return %c0_i32, %c0_i32_0 : i32, i32
  }
  func.func @transform_13(%arg0: i32) -> (i32, i32) {
    %c0_i32 = arith.constant 0 : i32
    %c0_i32_0 = arith.constant 0 : i32
    %c0_i32_1 = arith.constant 0 : i32
    return %c0_i32, %c0_i32_0 : i32, i32
  }
  func.func @transform_14(%arg0: i32) -> (i32, i32, i32, i32) {
    %c0_i32 = arith.constant 0 : i32
    %c0_i32_0 = arith.constant 0 : i32
    %c0_i32_1 = arith.constant 0 : i32
    %c0_i32_2 = arith.constant 0 : i32
    return %arg0, %c0_i32, %c0_i32_0, %c0_i32_1 : i32, i32, i32, i32
  }
}

</mosaic_0001>

<bundles_post_ra>
// kernel: tpu_custom_call.1
= control target key start
LH: loop header
LB: loop body
LE: loop exit
PB: predicated region body
PF: predicated region fallthrough
CT: control target
= control target key end

     0   :  { %s8748_s0 = inlined_call_operand.hbm [shape: f32[2,16,16,128], index: 0, kind: input, shape index: {}]   ;;  %s8749_s1 = inlined_call_operand.hbm [shape: f32[2,8,8,128], index: 1, kind: input, shape index: {}]   ;;  %s8750_s2 = inlined_call_operand.vmem [shape: f32[1,128], index: 2, kind: input, shape index: {}]   ;;  %s8751_s3 = inlined_call_operand.vmem [shape: f32[1,128], index: 3, kind: input, shape index: {}]   ;;  %s8752_s4 = inlined_call_operand.hbm [shape: bf16[1152,128], index: 4, kind: input, shape index: {}]   ;;  %s8753_s5 = inlined_call_operand.vmem [shape: f32[1,128], index: 5, kind: input, shape index: {}]   ;;  %s8754_s6 = inlined_call_operand.vmem [shape: f32[1,128], index: 6, kind: input, shape index: {}]   ;;  %s8755_s7 = inlined_call_operand.vmem [shape: f32[1,128], index: 7, kind: input, shape index: {}]   ;;  %s8756_s8 = inlined_call_operand.hbm [shape: bf16[1152,128], index: 8, kind: input, shape index: {}]   ;;  %s8757_s9 = inlined_call_operand.vmem [shape: f32[1,128], index: 9, kind: input, shape index: {}]   ;;  %s8758_s10 = inlined_call_operand.vmem [shape: f32[1,128], index: 10, kind: input, shape index: {}]   ;;  %s8759_s11 = inlined_call_operand.vmem [shape: f32[1,128], index: 11, kind: input, shape index: {}]   ;;  %s8760_s12 = inlined_call_operand.hbm [shape: bf16[1152,128], index: 12, kind: input, shape index: {}]   ;;  %s8761_s13 = inlined_call_operand.vmem [shape: f32[1,128], index: 13, kind: input, shape index: {}]   ;;  %s8762_s14 = inlined_call_operand.hbm [shape: f32[2,8,8,128], index: 14, kind: output, shape index: {}]  }
   0x1   :  { %8771 = sst [smem:[#allocation24_spill]] %s8748_s0 }
   0x2   :  { %8772 = sst [smem:[#allocation25_spill]] %s8752_s4 }
   0x3   :  { %8773 = sst [smem:[#allocation26_spill]] %s8753_s5 }
   0x4   :  { %8774 = sst [smem:[#allocation27_spill]] %s8756_s8 }
   0x5   :  { %8775 = sst [smem:[#allocation28_spill]] %s8757_s9 }
   0x6   :  { %8776 = sst [smem:[#allocation29_spill]] %s8758_s10 }
   0x7   :  { %8777 = sst [smem:[#allocation30_spill]] %s8759_s11 }
   0x8   :  { %8778 = sst [smem:[#allocation31_spill]] %s8760_s12 }
   0x9   :  { %8779 = sst [smem:[#allocation32_spill]] %s8761_s13 }
   0xa   :  { %8780 = sst [smem:[#allocation33_spill]] %s8762_s14 }
   0xb   :  { %19 = vsyncpa [#allocation8], 0 }
   0xc   :  { %21 = vsyncpa [#allocation8 + $0x1], 0 }
   0xd   :  { %22 = vsyncpa [#allocation11], 0 }
   0xe   :  { %24 = vsyncpa [#allocation11 + $0x1], 0 }
   0xf   :  { %25 = vsyncpa [#allocation14], 0 }
  0x10   :  { %26 = vsyncpa [#allocation9], 0 }
  0x11   :  { %28 = vsyncpa [#allocation9 + $0x1], 0  ;;  %s7232_s29 = smov 0   ;;  %s7234_s30 = smov 0  }
  0x12   :  { %s7236_s15 = smov 0   ;;  %s7238_s16 = smov 0  }
  0x13 LB: > { %8781 = sst [smem:[#allocation22_spill]] %s7130_s29  ;;  %s7253_s17 = sadd.s32 4294967295, %s7142_s16   ;;  %s7142_s16 = sphi %s7238_s16, %s8815_s16   ;;  %s7138_s15 = sphi %s7236_s15, %s8814_s15   ;;  %s7134_s30 = sphi %s7234_s30, %s8813_s30   ;;  %s7130_s29 = sphi %s7232_s29, %s8812_s29  }
  0x14   : > { %s5433_s18 = sadd.s32 4294967294, %s7142_s16   ;;  %p54_p0 = scmp.ne.s32.totalorder %s7134_s30, %s7130_s29 }
  0x15   : > { %p8766_p1 = scmp.eq.s32.totalorder %s7253_s17, 0  ;;  %p362_p3 = scmp.eq.s32.totalorder %s5433_s18, 1 }
  0x16   : > { %p5434_p5 = scmp.ge.s32.totalorder %s7142_s16, 1  ;;  %p369_p7 = scmp.lt.s32.totalorder %s7142_s16, 3 }
  0x17   : > { %p7262_p4 = por %p8766_p1, %p54_p0  ;;  %p7267_p6 = por %p362_p3, %p54_p0 }
  0x18   : > { %p7272_p8 = pnand %p5434_p5, %p369_p7  ;;  %s7144_s22 = smov [#allocation12]  }
  0x19   : > { %s8782_s19 = scalar_select %p7262_p4, 1, 0 }
  0x1a   : > { %s8783_s20 = scalar_select %p7267_p6, 1, 0 }
  0x1b   : > { %s8785_s21 = scalar_select %p7272_p8, 1, 0 }
  0x1c   : > { %8784 = sst [smem:[#allocation23_spill]] %s8783_s20  ;;  %s387_s23 = sshll.u32 %s7144_s22, 4  ;;  %s7276_s23 = int_to_ptr.vmem [resolvable:$true] %s387_s23 }
  0x1d   : > { %p6615_p9 = pneg %p7272_p8  ;;  %s7145_s25 = smov [#allocation13]  }
  0x1e   : > { %s409_s26 = sshll.u32 %s7145_s25, 4  ;;  %s7146_s27 = smov [#allocation15]   ;;  %s7287_s26 = int_to_ptr.vmem [resolvable:$true] %s409_s26 }
  0x1f   : > { %p7283_p11 = pnand %p6615_p9, %p8766_p1  ;;  %s7289_s28 = sshll.u32 %s7146_s27, 4  ;;  %s432_s28 = int_to_ptr.vmem [resolvable:$true] %s7289_s28 }
  0x20   : > { %s8787_s4 = sld [smem:[#allocation25_spill]] }
  0x21   : > { %p7299_p13 = pneg %p7283_p11 }
  0x26   : > { %s6920_s20 = scalar_lea.hbm %s8787_s4, 9216 }
  0x27   : > { %p6921_p12 = scmp.ne.s32.totalorder %s8787_s4, %s6920_s20  ;;  %p6927_p5 = scmp.lt.u32.totalorder %s6920_s20, %s8787_s4 }
  0x29   : > { %p6923_p0 = pnand %p7299_p13, %p6921_p12 }
  0x2b   : > { %p6924_p3 = pneg %p6923_p0 }
  0x2d   : > { %p6929_p7 = pnand %p6927_p5, %p6924_p3 }
  0x2f   : > { %6932 = shalt.err (!%p6929_p7)
}
  0x30   : > { %s6933_s14 = scalar_lea.vmem %s7276_s23, 9216  ;;  %p6941_p2 = scmp.lt.s32.totalorder %s7276_s23, %s7276_s23 }
  0x31   : > { %p6934_p9 = scmp.ne.s32.totalorder %s7276_s23, %s6933_s14  ;;  %p6942_p6 = scmp.lt.s32.totalorder %s6933_s14, %s6933_s14 }
  0x33   : > { %p6936_p10 = pnand %p6934_p9, %p7299_p13  ;;  %p6943_p12 = por %p6942_p6, %p6941_p2 }
  0x35   : > { %p6937_p1 = pneg %p6936_p10 }
  0x37   : > { %p6944_p0 = pnand %p6943_p12, %p6937_p1 }
  0x39   : > { %6947 = shalt.err (!%p6944_p0)
}
  0x3a   : > { %s7147_s29 = smov 64   ;;  %s7148_s20 = smov 4  }
  0x3b   : > { %6618 = dma.hbm_to_vmem [thread:$0]  (!%p7283_p11), %s8787_s4, 9216, %s7276_s23, [#allocation11], %s7147_s29, %s7147_s29, %s7148_s20  }
  0x3c   : > { %s8789_s8 = sld [smem:[#allocation27_spill]] }
  0x42   : > { %s6948_s14 = scalar_lea.hbm %s8789_s8, 9216 }
  0x43   : > { %p6949_p1 = scmp.ne.s32.totalorder %s8789_s8, %s6948_s14  ;;  %p6955_p10 = scmp.lt.u32.totalorder %s6948_s14, %s8789_s8 }
  0x45   : > { %p6951_p2 = pnand %p6949_p1, %p7299_p13 }
  0x47   : > { %p6952_p6 = pneg %p6951_p2 }
  0x49   : > { %p6957_p3 = pnand %p6955_p10, %p6952_p6 }
  0x4b   : > { %6960 = shalt.err (!%p6957_p3)
}
  0x4c   : > { %s6961_s23 = scalar_lea.vmem %s7287_s26, 9216  ;;  %p6969_p12 = scmp.lt.s32.totalorder %s7287_s26, %s7287_s26 }
  0x4d   : > { %p6962_p5 = scmp.ne.s32.totalorder %s7287_s26, %s6961_s23  ;;  %p6970_p0 = scmp.lt.s32.totalorder %s6961_s23, %s6961_s23 }
  0x4f   : > { %p6964_p7 = pnand %p6962_p5, %p7299_p13  ;;  %p6971_p1 = por %p6970_p0, %p6969_p12 }
  0x51   : > { %p6965_p9 = pneg %p6964_p7 }
  0x53   : > { %p6972_p2 = pnand %p6971_p1, %p6965_p9 }
  0x55   : > { %6975 = shalt.err (!%p6972_p2)
}
  0x56   : > { %6621 = dma.hbm_to_vmem [thread:$0]  (!%p7283_p11), %s8789_s8, 9216, %s7287_s26, [#allocation14], %s7147_s29, %s7147_s29, %s7148_s20  }
  0x57   : > { %s8790_s12 = sld [smem:[#allocation31_spill]] }
  0x5d   : > { %s6976_s18 = scalar_lea.hbm %s8790_s12, 9216 }
  0x5e   : > { %p6977_p6 = scmp.ne.s32.totalorder %s8790_s12, %s6976_s18  ;;  %p6983_p5 = scmp.lt.u32.totalorder %s6976_s18, %s8790_s12 }
  0x60   : > { %p6979_p10 = pnand %p6977_p6, %p7299_p13 }
  0x62   : > { %p6980_p3 = pneg %p6979_p10 }
  0x64   : > { %p6985_p7 = pnand %p6983_p5, %p6980_p3 }
  0x66   : > { %6988 = shalt.err (!%p6985_p7)
}
  0x67   : > { %s6989_s23 = scalar_lea.vmem %s432_s28, 9216  ;;  %p6997_p1 = scmp.lt.s32.totalorder %s432_s28, %s432_s28 }
  0x68   : > { %p6990_p9 = scmp.ne.s32.totalorder %s432_s28, %s6989_s23  ;;  %p6998_p2 = scmp.lt.s32.totalorder %s6989_s23, %s6989_s23 }
  0x6a   : > { %p6992_p12 = pnand %p6990_p9, %p7299_p13  ;;  %p6999_p4 = por %p6998_p2, %p6997_p1 }
  0x6c   : > { %p6993_p0 = pneg %p6992_p12 }
  0x6e   : > { %p7000_p8 = pnand %p6999_p4, %p6993_p0 }
  0x70   : > { %7003 = shalt.err (!%p7000_p8)
}
  0x71   : > { %6624 = dma.hbm_to_vmem [thread:$0]  (!%p7283_p11), %s8790_s12, 9216, %s432_s28, [#allocation14], %s7147_s29, %s7147_s29, %s7148_s20  }
  0x72   : > { %s7372_s13 = sadd.s32 1, %s7142_s16   ;;  %s41_s9 = sadd.s32 1, %s7138_s15 }
  0x73   : > { %s38_s24 = ssub.s32 %s7142_s16, %s7372_s13  ;;  %p48_p8 = scmp.ne.s32.totalorder %s7138_s15, %s7134_s30 }
  0x74   : > { %p39_p4 = scmp.eq.s32.totalorder %s38_s24, 0  ;;  %p49_p13 = scmp.eq.s32.totalorder %s7142_s16, 0 }
  0x75   : > { %p6639_p6 = scmp.lt.s32.totalorder %s7142_s16, 2  ;;  %p8791_p3 = scmp.eq.s32.totalorder %s7253_s17, 1 }
  0x76   : > { %s7382_s10 = scalar_select %p39_p4, %s7138_s15, %s41_s9  }
  0x77   : > { %p50_p10 = por %p49_p13, %p48_p8  ;;  %p7386_p5 = por %p8791_p3, %p48_p8 }
  0x78   : > { %s7391_s18 = sand.u32 1, %s7138_s15   ;;  %s5682_s28 = sshll.u32 %s7142_s16, 12 }
  0x79   : > { %s5439_s29 = sshll.u32 %s7391_s18, 8  ;;  %s8793_s0 = sld [smem:[#allocation24_spill]] }
  0x7a   : > { %s452_s27 = scalar_lea.vmem [#allocation7], %s5439_s29  ;;  %p7400_p11 = pnand %p6639_p6, %p50_p10 }
  0x7b   : > { %s459_s14 = sshll.u32 %s452_s27, 4  ;;  %s449_s26 = scalar_lea.sflag [#allocation8], %s7391_s18  ;;  %s7404_s14 = int_to_ptr.vmem [resolvable:$true] %s459_s14 }
  0x7c   : > { %p7006_p9 = pneg %p7400_p11 }
  0x7f   : > { %s7398_s25 = scalar_lea.hbm %s8793_s0, %s5682_s28  ;;  %s7009_s28 = scalar_lea.hbm %s8793_s0, 8192 }
  0x80   : > { %s7004_s5 = scalar_lea.hbm %s7398_s25, 4096  ;;  %p7010_p1 = scmp.lt.u32.totalorder %s7398_s25, %s8793_s0 }
  0x81   : > { %p7005_p7 = scmp.ne.s32.totalorder %s7398_s25, %s7004_s5  ;;  %p7011_p2 = scmp.lt.u32.totalorder %s7009_s28, %s7004_s5 }
  0x82   : > { %p7013_p8 = scmp.lt.u32.totalorder %s7004_s5, %s7398_s25 }
  0x83   : > { %p7007_p12 = pnand %p7006_p9, %p7005_p7  ;;  %p7012_p4 = por %p7011_p2, %p7010_p1 }
  0x85   : > { %p7008_p0 = pneg %p7007_p12  ;;  %p7014_p13 = por %p7013_p8, %p7012_p4 }
  0x87   : > { %p7015_p6 = pnand %p7014_p13, %p7008_p0 }
  0x89   : > { %7018 = shalt.err (!%p7015_p6)
}
  0x8a   : > { %s7019_s22 = scalar_lea.vmem %s7404_s14, 4096  ;;  %s7149_s27 = smov [#allocation7]  }
  0x8b   : > { %p7020_p10 = scmp.ne.s32.totalorder %s7404_s14, %s7019_s22  ;;  %s7024_s24 = sshll.u32 %s7149_s27, 4  ;;  %s7025_s24 = int_to_ptr.vmem [resolvable:$false] %s7024_s24 }
  0x8c   : > { %s7026_s9 = scalar_lea.vmem %s7025_s24, 8192  ;;  %p7027_p12 = scmp.lt.s32.totalorder %s7404_s14, %s7025_s24 }
  0x8d   : > { %p7022_p3 = pnand %p7020_p10, %p7006_p9  ;;  %p7028_p1 = scmp.lt.s32.totalorder %s7026_s9, %s7019_s22 }
  0x8f   : > { %p7023_p7 = pneg %p7022_p3  ;;  %p7029_p2 = por %p7028_p1, %p7027_p12 }
  0x91   : > { %p7030_p4 = pnand %p7029_p2, %p7023_p7 }
  0x93   : > { %7033 = shalt.err (!%p7030_p4)
}
  0x94   : > { %s7150_s5 = smov 128   ;;  %s7151_s28 = smov 8  }
  0x95   : > { %6628 = dma.hbm_to_vmem [thread:$0]  (!%p7400_p11), %s7398_s25, 4096, %s7404_s14, %s449_s26, %s7150_s5, %s7150_s5, %s7151_s28  }
  0x96   : > { %s469_s29 = sand.u32 1, %s7142_s16   ;;  %s5442_s20 = sshll.u32 %s7391_s18, 6 }
  0x97   : > { %s5683_s22 = sshll.u32 %s7142_s16, 10  ;;  %s473_s27 = scalar_lea.vmem [#allocation10], %s5442_s20 }
  0x98   : > { %s480_s24 = sshll.u32 %s473_s27, 4  ;;  %s7443_s4 = scalar_lea.hbm %s8749_s1, %s5683_s22  ;;  %s7445_s24 = int_to_ptr.vmem [resolvable:$true] %s480_s24 }
  0x99   : > { %s7447_s8 = scalar_lea.sflag [#allocation11], %s469_s29  ;;  %s7034_s12 = scalar_lea.hbm %s7443_s4, 1024 }
  0x9a   : > { %p7035_p0 = scmp.ne.s32.totalorder %s7443_s4, %s7034_s12  ;;  %s7039_s0 = scalar_lea.hbm %s8749_s1, 2048 }
  0x9b   : > { %p7040_p6 = scmp.lt.u32.totalorder %s7443_s4, %s8749_s1  ;;  %p7041_p10 = scmp.lt.u32.totalorder %s7039_s0, %s7034_s12 }
  0x9c   : > { %p7037_p8 = pnand %p7035_p0, %p7006_p9  ;;  %p7043_p7 = scmp.lt.u32.totalorder %s7034_s12, %s7443_s4 }
  0x9d   : > { %p7042_p3 = por %p7041_p10, %p7040_p6 }
  0x9e   : > { %p7038_p13 = pneg %p7037_p8 }
  0x9f   : > { %p7044_p12 = por %p7043_p7, %p7042_p3 }
  0xa1   : > { %p7045_p1 = pnand %p7044_p12, %p7038_p13 }
  0xa3   : > { %7048 = shalt.err (!%p7045_p1)
}
  0xa4   : > { %s7049_s29 = scalar_lea.vmem %s7445_s24, 1024  ;;  %s7152_s20 = smov [#allocation10]  }
  0xa5   : > { %p7050_p2 = scmp.ne.s32.totalorder %s7445_s24, %s7049_s29  ;;  %s7054_s22 = sshll.u32 %s7152_s20, 4  ;;  %s7055_s22 = int_to_ptr.vmem [resolvable:$false] %s7054_s22 }
  0xa6   : > { %s7056_s27 = scalar_lea.vmem %s7055_s22, 2048  ;;  %p7057_p8 = scmp.lt.s32.totalorder %s7445_s24, %s7055_s22 }
  0xa7   : > { %p7052_p4 = pnand %p7050_p2, %p7006_p9  ;;  %p7058_p6 = scmp.lt.s32.totalorder %s7056_s27, %s7049_s29 }
  0xa9   : > { %p7053_p0 = pneg %p7052_p4  ;;  %p7059_p10 = por %p7058_p6, %p7057_p8 }
  0xab   : > { %p7060_p3 = pnand %p7059_p10, %p7053_p0 }
  0xad   : > { %7063 = shalt.err (!%p7060_p3)
}
  0xae   : > { %6631 = dma.hbm_to_vmem [thread:$0]  (!%p7400_p11), %s7443_s4, 1024, %s7445_s24, %s7447_s8, %s7150_s5, %s7150_s5, %s7151_s28  }
  0xaf   : > { %p8795_p9 = scmp.ne.s32.totalorder %s8785_s21, 0 }
  0xb0   : > { %s7479_s12 = sand.u32 (!%p8795_p9), 1, %s7134_s30   ;;  %p8796_p13 = scmp.ne.s32.totalorder (!%p8795_p9), %s8782_s19, 0 }
  0xb1   : > { %492 = sbr.rel (%p8795_p9) target bundleno = 1126 (0x466), region = 76  ;;  %s5446_s9 = sshll.u32 (!%p8795_p9), %s7479_s12, 8 }
  0xb2   : > { %s495_s18 = scalar_lea.sflag (!%p8795_p9), [#allocation8], %s7479_s12  ;;  %s7483_s25 = scalar_lea.vmem (!%p8795_p9), [#allocation7], %s5446_s9 }
  0xb8   : > { %7109 = dma.done.wait (%p8796_p13), %s495_s18, 4096  }
  0xb9   : > { %7111 = vsyncadd (%p8796_p13), %s495_s18, 4294963200  ;;  %s503_s4 = sand.u32 1, %s7253_s17   ;;  %s5447_s8 = sshll.u32 %s7479_s12, 6 }
  0xba   : > { %s504_s21 = scalar_lea.sflag [#allocation11], %s503_s4  ;;  %s7493_s23 = scalar_lea.vmem [#allocation10], %s5447_s8 }
  0xbb   : > { %7113 = dma.done.wait (%p8796_p13), %s504_s21, 1024  }
  0xbc   : > { %7115 = vsyncadd (%p8796_p13), %s504_s21, 4294966272  ;;  %p8797_p11 = scmp.eq.s32.totalorder %s7253_s17, 0 }
  0xbe   : > { %7117 = dma.done.wait (%p8797_p11), [#allocation11], 9216   ;;  %p8798_p7 = pmov %p8797_p11 }
  0xc0   : > { %7119 = vsyncadd (%p8798_p7), [#allocation11], 4294958080  ;;  %p8799_p12 = pmov %p8798_p7 }
  0xc1   : > { %p8800_p1 = pmov %p8798_p7 }
  0xc2   : > { %7121 = dma.done.wait (%p8799_p12), [#allocation14], 18432  }
  0xc3   : > { %7123 = vsyncadd (%p8800_p1), [#allocation14], 4294948864  ;;  %v7153_v0 = vmov 0.0   ;;  %v6686_v1 = vld [vmem:[#allocation12 + $0x40] sm:$0xff]   ;;  %v6690_v5 = vld [vmem:[#allocation12 + $0x48] sm:$0xff]   ;;  %s8802_s27 = sld [smem:[#allocation26_spill]] }
  0xc4   : > { %570 = vst [vmem:[#allocation2] sm:$0xff] %v7153_v0  ;;  %571 = vst [vmem:[#allocation2 + $0x8] sm:$0xff] %v7153_v0  ;;  %v6687_v2 = vld [vmem:[#allocation12 + $0xc0] sm:$0xff]   ;;  %5685 = vmatprep.subr.bf16.mxu0 %v6686_v1  ;;  %v6691_v6 = vld [vmem:[#allocation12 + $0xc8] sm:$0xff]   ;;  %s8803_s21 = sld [smem:[#allocation28_spill]]  ;;  %s8804_s28 = sld [smem:[#allocation29_spill]] }
  0xc5   : > { %572 = vst [vmem:[#allocation2 + $0x10] sm:$0x3] %v7153_v0  ;;  %574 = vst [vmem:[#allocation2 + $0x198] sm:$0xff] %v7153_v0  ;;  %v6688_v3 = vld [vmem:[#allocation12] sm:$0xff]   ;;  %5797 = vmatprep.subr.bf16.mxu1 %v6687_v2  ;;  %v6692_v7 = vld [vmem:[#allocation12 + $0x8] sm:$0xff]   ;;  %s8805_s14 = sld [smem:[#allocation30_spill]] }
  0xc6   : > { %575 = vst [vmem:[#allocation2 + $0x1a0] sm:$0xff] %v7153_v0  ;;  %576 = vst [vmem:[#allocation2 + $0x1a8] sm:$0x3] %v7153_v0  ;;  %v6689_v4 = vld [vmem:[#allocation12 + $0x80] sm:$0xff]   ;;  %5686 = vmatpush3.bf16.msra.mxu0 %v6688_v3  ;;  %v6693_v8 = vld [vmem:[#allocation12 + $0x88] sm:$0xff]   ;;  %s8806_s20 = sld [smem:[#allocation32_spill]] }
  0xc7   : > { %578 = vst [vmem:[#allocation2 + $0x18] sm:$0x1] %v7153_v0  ;;  %579 = vst [vmem:[#allocation2 + $0x30] sm:$0x1] %v7153_v0  ;;  %5798 = vmatpush3.bf16.msra.mxu1 %v6689_v4  ;;  %5687 = vmatprep.subr.bf16.mxu0 %v6690_v5  ;;  %v6694_v9 = vld [vmem:[#allocation12 + $0x50] sm:$0xff]   ;;  %v6698_v13 = vld [vmem:[#allocation12 + $0x58] sm:$0xff]  }
  0xc8   : > { %580 = vst [vmem:[#allocation2 + $0x48] sm:$0x1] %v7153_v0  ;;  %581 = vst [vmem:[#allocation2 + $0x60] sm:$0x1] %v7153_v0  ;;  %5799 = vmatprep.subr.bf16.mxu1 %v6691_v6  ;;  %v6695_v10 = vld [vmem:[#allocation12 + $0xd0] sm:$0xff]   ;;  %v6699_v14 = vld [vmem:[#allocation12 + $0xd8] sm:$0xff]  }
  0xc9   : > { %582 = vst [vmem:[#allocation2 + $0x78] sm:$0x1] %v7153_v0  ;;  %583 = vst [vmem:[#allocation2 + $0x90] sm:$0x1] %v7153_v0  ;;  %v6696_v11 = vld [vmem:[#allocation12 + $0x10] sm:$0xff]   ;;  %v6700_v15 = vld [vmem:[#allocation12 + $0x18] sm:$0xff]  }
  0xca   : > { %584 = vst [vmem:[#allocation2 + $0xa8] sm:$0x1] %v7153_v0  ;;  %585 = vst [vmem:[#allocation2 + $0xc0] sm:$0x1] %v7153_v0  ;;  %5688 = vmatpush3.bf16.msra.mxu0 %v6692_v7  ;;  %v6697_v12 = vld [vmem:[#allocation12 + $0x90] sm:$0xff]   ;;  %v6701_v16 = vld [vmem:[#allocation12 + $0x98] sm:$0xff]  }
  0xcb   : > { %586 = vst [vmem:[#allocation2 + $0xd8] sm:$0x1] %v7153_v0  ;;  %587 = vst [vmem:[#allocation2 + $0xf0] sm:$0x1] %v7153_v0  ;;  %5800 = vmatpush3.bf16.msra.mxu1 %v6693_v8  ;;  %5689 = vmatprep.subr.bf16.mxu0 %v6694_v9  ;;  %v6702_v17 = vld [vmem:[#allocation12 + $0x60] sm:$0xff]   ;;  %v6706_v21 = vld [vmem:[#allocation12 + $0x68] sm:$0xff]  }
  0xcc   : > { %588 = vst [vmem:[#allocation2 + $0x108] sm:$0x1] %v7153_v0  ;;  %589 = vst [vmem:[#allocation2 + $0x120] sm:$0x1] %v7153_v0  ;;  %5801 = vmatprep.subr.bf16.mxu1 %v6695_v10  ;;  %v6703_v18 = vld [vmem:[#allocation12 + $0xe0] sm:$0xff]   ;;  %v6707_v22 = vld [vmem:[#allocation12 + $0xe8] sm:$0xff]  }
  0xcd   : > { %590 = vst [vmem:[#allocation2 + $0x138] sm:$0x1] %v7153_v0  ;;  %591 = vst [vmem:[#allocation2 + $0x150] sm:$0x1] %v7153_v0  ;;  %v6704_v19 = vld [vmem:[#allocation12 + $0x20] sm:$0xff]   ;;  %v6708_v23 = vld [vmem:[#allocation12 + $0x28] sm:$0xff]  }
  0xce   : > { %592 = vst [vmem:[#allocation2 + $0x168] sm:$0x1] %v7153_v0  ;;  %593 = vst [vmem:[#allocation2 + $0x180] sm:$0x1] %v7153_v0  ;;  %5690 = vmatpush3.bf16.msra.mxu0 %v6696_v11  ;;  %v6705_v20 = vld [vmem:[#allocation12 + $0xa0] sm:$0xff]   ;;  %v6709_v24 = vld [vmem:[#allocation12 + $0xa8] sm:$0xff]  }
  0xcf   : > { %596 = vst [vmem:[#allocation2 + $0x29] sm:$0x1] %v7153_v0  ;;  %597 = vst [vmem:[#allocation2 + $0x41] sm:$0x1] %v7153_v0  ;;  %5802 = vmatpush3.bf16.msra.mxu1 %v6697_v12  ;;  %5691 = vmatprep.subr.bf16.mxu0 %v6698_v13  ;;  %v6710_v25 = vld [vmem:[#allocation12 + $0x70] sm:$0xff]   ;;  %v6714_v29 = vld [vmem:[#allocation12 + $0x78] sm:$0xff]  }
  0xd0   : > { %598 = vst [vmem:[#allocation2 + $0x59] sm:$0x1] %v7153_v0  ;;  %599 = vst [vmem:[#allocation2 + $0x71] sm:$0x1] %v7153_v0  ;;  %5803 = vmatprep.subr.bf16.mxu1 %v6699_v14  ;;  %v6711_v26 = vld [vmem:[#allocation12 + $0xf0] sm:$0xff]   ;;  %v6715_v30 = vld [vmem:[#allocation12 + $0xf8] sm:$0xff]  }
  0xd1   : > { %600 = vst [vmem:[#allocation2 + $0x89] sm:$0x1] %v7153_v0  ;;  %601 = vst [vmem:[#allocation2 + $0xa1] sm:$0x1] %v7153_v0  ;;  %v6712_v27 = vld [vmem:[#allocation12 + $0x30] sm:$0xff]   ;;  %v6716_v31 = vld [vmem:[#allocation12 + $0x38] sm:$0xff]  }
  0xd2   : > { %602 = vst [vmem:[#allocation2 + $0xb9] sm:$0x1] %v7153_v0  ;;  %603 = vst [vmem:[#allocation2 + $0xd1] sm:$0x1] %v7153_v0  ;;  %5692 = vmatpush3.bf16.msra.mxu0 %v6700_v15  ;;  %v6713_v28 = vld [vmem:[#allocation12 + $0xb0] sm:$0xff]   ;;  %v6717_v32 = vld [vmem:[#allocation12 + $0xb8] sm:$0xff]  }
  0xd3   : > { %604 = vst [vmem:[#allocation2 + $0xe9] sm:$0x1] %v7153_v0  ;;  %605 = vst [vmem:[#allocation2 + $0x101] sm:$0x1] %v7153_v0  ;;  %5804 = vmatpush3.bf16.msra.mxu1 %v6701_v16  ;;  %5693 = vmatprep.subr.bf16.mxu0 %v6702_v17  ;;  %v877_v33 = vld [vmem:[#allocation2 + $0x1] sm:$0xff]  ;;  %v878_v34 = vld [vmem:[#allocation2 + $0x9] sm:$0xff] }
  0xd4   : > { %606 = vst [vmem:[#allocation2 + $0x119] sm:$0x1] %v7153_v0  ;;  %607 = vst [vmem:[#allocation2 + $0x131] sm:$0x1] %v7153_v0  ;;  %5805 = vmatprep.subr.bf16.mxu1 %v6703_v18  ;;  %v638_v35 = vld [vmem:[%s7483_s25] sm:$0xff]  ;;  %v909_v36 = vpack.c.bf16 %v878_v34, %v877_v33  ;;  %v639_v37 = vld [vmem:[%s7483_s25 + $0x8] sm:$0xff] }
  0xd5   : > { %608 = vst [vmem:[#allocation2 + $0x149] sm:$0x1] %v7153_v0  ;;  %609 = vst [vmem:[#allocation2 + $0x161] sm:$0x1] %v7153_v0  ;;  %v7578_v38 = vld [vmem:[%s8750_s2] ss:$0 sm:$0xff] }
  0xd6   : > { %610 = vst [vmem:[#allocation2 + $0x179] sm:$0x1] %v7153_v0  ;;  %611 = vst [vmem:[#allocation2 + $0x191] sm:$0x1] %v7153_v0  ;;  %5694 = vmatpush3.bf16.msra.mxu0 %v6704_v19  ;;  %v7583_v39 = vld [vmem:[%s8751_s3] ss:$0 sm:$0xff]  ;;  %v677_v40 = vmul.f32 %v7578_v38, %v638_v35  ;;  %v678_v41 = vmul.f32 %v7578_v38, %v639_v37  ;;  %2149 = vmatprep.mubr.bf16.mxu0 %v909_v36 }
  0xd7   : > { %613 = vst [vmem:[#allocation3] sm:$0xff] %v7153_v0  ;;  %614 = vst [vmem:[#allocation3 + $0x8] sm:$0x3] %v7153_v0  ;;  %5806 = vmatpush3.bf16.msra.mxu1 %v6705_v20  ;;  %5695 = vmatprep.subr.bf16.mxu0 %v6706_v21  ;;  %v6718_v44 = vld [vmem:[#allocation12 + $0x140] sm:$0xff]   ;;  %v640_v48 = vld [vmem:[%s7483_s25 + $0x10] sm:$0xff]  ;;  %s8681_s22 = scalar_lea.vmem [#allocation16], %s5447_s8 }
  0xd8   : > { %616 = vst [vmem:[#allocation3 + $0x90] sm:$0xff] %v7153_v0  ;;  %617 = vst [vmem:[#allocation3 + $0x98] sm:$0x3] %v7153_v0  ;;  %5807 = vmatprep.subr.bf16.mxu1 %v6707_v22  ;;  %v716_v45 = vadd.f32 %v7583_v39, %v677_v40  ;;  %v717_v46 = vadd.f32 %v7583_v39, %v678_v41  ;;  %v6719_v47 = vld [vmem:[#allocation12 + $0x100] sm:$0xff]   ;;  %v641_v49 = vld [vmem:[%s7483_s25 + $0x18] sm:$0xff]  ;;  %v679_v53 = vmul.f32 %v7578_v38, %v640_v48  ;;  %s5309_s8 = sshll.u32 %s8681_s22, 4  ;;  %s8692_s8 = int_to_ptr.vmem [resolvable:$true] %s5309_s8 }
  0xd9   : > { %619 = vst [vmem:[#allocation3 + $0x10] sm:$0x1] %v7153_v0  ;;  %620 = vst [vmem:[#allocation3 + $0x20] sm:$0x1] %v7153_v0  ;;  %v642_v50 = vld [vmem:[%s7483_s25 + $0x20] sm:$0xff]  ;;  %v680_v54 = vmul.f32 %v7578_v38, %v641_v49  ;;  %v643_v55 = vld [vmem:[%s7483_s25 + $0x28] sm:$0xff] }
  0xda   : > { %621 = vst [vmem:[#allocation3 + $0x30] sm:$0x1] %v7153_v0  ;;  %622 = vst [vmem:[#allocation3 + $0x40] sm:$0x1] %v7153_v0  ;;  %5696 = vmatpush3.bf16.msra.mxu0 %v6708_v23  ;;  %v748_v51 = vmax.f32 %v716_v45, 0.0  ;;  %v749_v52 = vmax.f32 %v717_v46, 0.0  ;;  %v681_v57 = vmul.f32 %v7578_v38, %v642_v50  ;;  %v682_v58 = vmul.f32 %v7578_v38, %v643_v55 }
  0xdb   : > { %623 = vst [vmem:[#allocation3 + $0x50] sm:$0x1] %v7153_v0  ;;  %624 = vst [vmem:[#allocation3 + $0x60] sm:$0x1] %v7153_v0  ;;  %5808 = vmatpush3.bf16.msra.mxu1 %v6709_v24  ;;  %5697 = vmatprep.subr.bf16.mxu0 %v6710_v25  ;;  %v6720_v56 = vld [vmem:[#allocation12 + $0x148] sm:$0xff]   ;;  %v718_v60 = vadd.f32 %v7583_v39, %v679_v53  ;;  %v719_v61 = vadd.f32 %v7583_v39, %v680_v54  ;;  %v644_v63 = vld [vmem:[%s7483_s25 + $0x30] sm:$0xff] }
  0xdc   : > { %625 = vst [vmem:[#allocation3 + $0x70] sm:$0x1] %v7153_v0  ;;  %626 = vst [vmem:[#allocation3 + $0x80] sm:$0x1] %v7153_v0  ;;  %5809 = vmatprep.subr.bf16.mxu1 %v6711_v26  ;;  %v910_v59 = vpack.c.bf16 %v749_v52, %v748_v51  ;;  %v6721_v62 = vld [vmem:[#allocation12 + $0x108] sm:$0xff]   ;;  %v7603_v1 = vadd.f32 %v7583_v39, %v681_v57  ;;  %v7606_v2 = vadd.f32 %v7583_v39, %v682_v58  ;;  %v6722_v5 = vld [vmem:[#allocation12 + $0x1c0] sm:$0xff]  }
  0xdd   : > { %629 = vst [vmem:[#allocation3 + $0x19] sm:$0x1] %v7153_v0  ;;  %630 = vst [vmem:[#allocation3 + $0x29] sm:$0x1] %v7153_v0  ;;  %v683_v3 = vmul.f32 %v7578_v38, %v644_v63  ;;  %v941_v6 = vld [vmem:[#allocation2 + $0x2] sm:$0xff]  ;;  %v750_v7 = vmax.f32 %v718_v60, 0.0 }
  0xde   : > { %631 = vst [vmem:[#allocation3 + $0x39] sm:$0x1] %v7153_v0  ;;  %632 = vst [vmem:[#allocation3 + $0x49] sm:$0x1] %v7153_v0  ;;  %5698 = vmatpush3.bf16.msra.mxu0 %v6712_v27  ;;  %v751_v8 = vmax.f32 %v719_v61, 0.0  ;;  %v752_v10 = vmax.f32 %v7603_v1, 0.0 }
  0xdf   : > { %633 = vst [vmem:[#allocation3 + $0x59] sm:$0x1] %v7153_v0  ;;  %634 = vst [vmem:[#allocation3 + $0x69] sm:$0x1] %v7153_v0  ;;  %5810 = vmatpush3.bf16.msra.mxu1 %v6713_v28  ;;  %5699 = vmatprep.subr.bf16.mxu0 %v6714_v29  ;;  %v753_v11 = vmax.f32 %v7606_v2, 0.0  ;;  %v7613_v12 = vadd.f32 %v7583_v39, %v683_v3  ;;  %v646_v14 = vld [vmem:[%s7483_s25 + $0x40] sm:$0xff] }
  0xe0   : > { %635 = vst [vmem:[#allocation3 + $0x79] sm:$0x1] %v7153_v0  ;;  %636 = vst [vmem:[#allocation3 + $0x89] sm:$0x1] %v7153_v0  ;;  %5811 = vmatprep.subr.bf16.mxu1 %v6715_v30  ;;  %v647_v15 = vld [vmem:[%s7483_s25 + $0x48] sm:$0xff]  ;;  %v685_v16 = vmul.f32 %v7578_v38, %v646_v14  ;;  %v6724_v18 = vld [vmem:[#allocation12 + $0x150] sm:$0xff]   ;;  %v7636_v29 = vpack.c.bf16 %v751_v8, %v750_v7 }
  0xe1   : > { %595 = vst [vmem:[#allocation2 + $0x11] sm:$0x1] %v7153_v0  ;;  %577 = vst [vmem:[#allocation2] sm:$0x1] %v7153_v0  ;;  %v686_v17 = vmul.f32 %v7578_v38, %v647_v15  ;;  %v754_v19 = vmax.f32 %v7613_v12, 0.0  ;;  %v6725_v23 = vld [vmem:[#allocation12 + $0x110] sm:$0xff]   ;;  %v7682_v58 = vpack.c.bf16 %v753_v11, %v752_v10 }
  0xe2   : > { %594 = vst [vmem:[#allocation2 + $0x198] sm:$0x1] %v7153_v0  ;;  %612 = vst [vmem:[#allocation2 + $0x1a9] sm:$0x1] %v7153_v0  ;;  %5700 = vmatpush3.bf16.msra.mxu0 %v6716_v31  ;;  %v7629_v21 = vadd.f32 %v7583_v39, %v685_v16  ;;  %v648_v24 = vld [vmem:[%s7483_s25 + $0x50] sm:$0xff]  ;;  %v649_v25 = vld [vmem:[%s7483_s25 + $0x58] sm:$0xff] }
  0xe3   : > { %618 = vst [vmem:[#allocation3] sm:$0x1] %v7153_v0  ;;  %627 = vst [vmem:[#allocation3 + $0x90] sm:$0x1] %v7153_v0  ;;  %5812 = vmatpush3.bf16.msra.mxu1 %v6717_v32  ;;  %5909 = vmatprep.subr.bf16.mxu0 %v6718_v44  ;;  %v7632_v22 = vadd.f32 %v7583_v39, %v686_v17  ;;  %v687_v30 = vmul.f32 %v7578_v38, %v648_v24  ;;  %v6723_v33 = vld [vmem:[#allocation12 + $0x180] sm:$0xff]   ;;  %v6726_v36 = vld [vmem:[#allocation12 + $0x1c8] sm:$0xff]  }
  0xe4   : > { %628 = vst [vmem:[#allocation3 + $0x9] sm:$0x1] %v7153_v0  ;;  %637 = vst [vmem:[#allocation3 + $0x99] sm:$0x1] %v7153_v0  ;;  %6021 = vmatprep.subr.bf16.mxu1 %v6722_v5  ;;  %v688_v31 = vmul.f32 %v7578_v38, %v649_v25  ;;  %v756_v34 = vmax.f32 %v7629_v21, 0.0  ;;  %v650_v41 = vld [vmem:[%s7483_s25 + $0x60] sm:$0xff] }
  0xe5   : > { %781 = vst [vmem:[#allocation2 + $0x19] sm:$0xff] %v748_v51  ;;  %782 = vst [vmem:[#allocation2 + $0x21] sm:$0xff] %v749_v52  ;;  %v757_v35 = vmax.f32 %v7632_v22, 0.0  ;;  %v7647_v37 = vadd.f32 %v7583_v39, %v687_v30  ;;  %v6727_v52 = vld [vmem:[#allocation12 + $0x188] sm:$0xff]   ;;  %v6728_v60 = vld [vmem:[#allocation12 + $0x158] sm:$0xff]   ;;  %s5684_s9 = sshll.u32 %s7253_s17, 10 }
  0xe6   : > { %783 = vst [vmem:[#allocation2 + $0x31] sm:$0xff] %v750_v7  ;;  %784 = vst [vmem:[#allocation2 + $0x39] sm:$0xff] %v751_v8  ;;  %v7650_v40 = vadd.f32 %v7583_v39, %v688_v31  ;;  %v6729_v63 = vld [vmem:[#allocation12 + $0x118] sm:$0xff]   ;;  %v652_v2 = vld [vmem:[%s7483_s25 + $0x70] sm:$0xff]  ;;  %s7064_s19 = scalar_lea.vmem %s8692_s8, 1024  ;;  %s7154_s5 = smov [#allocation16]  }
  0xe7   : > { %785 = vst [vmem:[#allocation2 + $0x49] sm:$0xff] %v752_v10  ;;  %786 = vst [vmem:[#allocation2 + $0x51] sm:$0xff] %v753_v11  ;;  %v758_v45 = vmax.f32 %v7647_v37, 0.0  ;;  %v653_v3 = vld [vmem:[%s7483_s25 + $0x78] sm:$0xff]  ;;  %v6731_v15 = vld [vmem:[#allocation12 + $0x190] sm:$0xff]   ;;  %p7065_p2 = scmp.ne.s32.totalorder %s8692_s8, %s7064_s19 }
  0xe8   : > { %v813_v42 = vld [vmem:[#allocation2] sm:$0xff]  ;;  %v942_v9 = vld [vmem:[#allocation2 + $0xa] sm:$0xff]  ;;  %787 = vst [vmem:[#allocation2 + $0x61] sm:$0xff] %v754_v19  ;;  %789 = vst [vmem:[#allocation2 + $0x79] sm:$0xff] %v756_v34  ;;  %v759_v46 = vmax.f32 %v7650_v40, 0.0  ;;  %v692_v5 = vmul.f32 %v7578_v38, %v653_v3 }
  0xe9   : > { %v845_v43 = vpack.c.bf16 %v7153_v0, %v813_v42  ;;  %v645_v0 = vld [vmem:[%s7483_s25 + $0x38] sm:$0xff]  ;;  %v973_v28 = vpack.c.bf16 %v942_v9, %v941_v6  ;;  %790 = vst [vmem:[#allocation2 + $0x81] sm:$0xff] %v757_v35  ;;  %v651_v42 = vld [vmem:[%s7483_s25 + $0x68] sm:$0xff]  ;;  %791 = vst [vmem:[#allocation2 + $0x91] sm:$0xff] %v758_v45  ;;  %p7066_p4 = pnand %p7065_p2, %p7386_p5 }
  0xea   : > { %v684_v4 = vmul.f32 %v7578_v38, %v645_v0  ;;  %v690_v48 = vmul.f32 %v7578_v38, %v651_v42  ;;  %792 = vst [vmem:[#allocation2 + $0x99] sm:$0xff] %v759_v46  ;;  %v6730_v6 = vld [vmem:[#allocation12 + $0x1d0] sm:$0xff]   ;;  %v7704_v10 = vadd.f32 %v7583_v39, %v692_v5  ;;  %v654_v16 = vld [vmem:[%s7483_s25 + $0x80] sm:$0xff]  ;;  %v655_v17 = vld [vmem:[%s7483_s25 + $0x88] sm:$0xff] }
  0xeb   : > { %2150 = vmatmul.mubr.bf16.vlgmr.msra.gmra.mrb[0].mxu0 %v845_v43  ;;  %v693_v24 = vmul.f32 %v7578_v38, %v654_v16  ;;  %v694_v25 = vmul.f32 %v7578_v38, %v655_v17  ;;  %v6732_v12 = vld [vmem:[#allocation12 + $0x160] sm:$0xff]   ;;  %v656_v30 = vld [vmem:[%s7483_s25 + $0x90] sm:$0xff]  ;;  %v661_v22 = vld [vmem:[%s7483_s25 + $0xb8] sm:$0xff]  ;;  %p7067_p0 = pneg %p7066_p4 }
  0xec   : > { %5910 = vmatpush3.bf16.msra.mxu0 %v6719_v47  ;;  %2157 = vmatprep.mubr.bf16.mxu0 %v910_v59  ;;  %v7616_v13 = vadd.f32 %v7583_v39, %v684_v4  ;;  %v1005_v26 = vld [vmem:[#allocation2 + $0x18] sm:$0xff]  ;;  %v1006_v27 = vld [vmem:[#allocation2 + $0x20] sm:$0xff]  ;;  %v689_v47 = vmul.f32 %v7578_v38, %v650_v41  ;;  %v691_v4 = vmul.f32 %v7578_v38, %v652_v2  ;;  %v657_v41 = vld [vmem:[%s7483_s25 + $0x98] sm:$0xff] }
  0xed   : > { %5911 = vmatprep.subr.bf16.mxu0 %v6720_v56  ;;  %v1037_v32 = vpack.c.bf16 %v1006_v27, %v1005_v26  ;;  %v1007_v43 = vld [vmem:[#allocation2 + $0x30] sm:$0xff]  ;;  %v1008_v44 = vld [vmem:[#allocation2 + $0x38] sm:$0xff]  ;;  %v944_v51 = vld [vmem:[#allocation2 + $0x22] sm:$0xff]  ;;  %v7674_v56 = vadd.f32 %v7583_v39, %v690_v48  ;;  %v695_v42 = vmul.f32 %v7578_v38, %v656_v30  ;;  %v7803_v30 = vpack.c.bf16 %v759_v46, %v758_v45 }
  0xee   : > { %v755_v20 = vmax.f32 %v7616_v13, 0.0  ;;  %v7663_v49 = vpack.c.bf16 %v1008_v44, %v1007_v43  ;;  %v943_v50 = vld [vmem:[#allocation2 + $0x1a] sm:$0xff]  ;;  %v1009_v53 = vld [vmem:[#allocation2 + $0x48] sm:$0xff]  ;;  %v1010_v54 = vld [vmem:[#allocation2 + $0x50] sm:$0xff]  ;;  %v7670_v55 = vadd.f32 %v7583_v39, %v689_v47  ;;  %v7701_v9 = vadd.f32 %v7583_v39, %v691_v4 }
  0xef   : > { %2310 = vmatprep.mubr.bf16.mxu1 %v1037_v32  ;;  %v7676_v57 = vpack.c.bf16 %v944_v51, %v943_v50  ;;  %v7685_v61 = vpack.c.bf16 %v1010_v54, %v1009_v53  ;;  %v945_v0 = vld [vmem:[#allocation2 + $0x32] sm:$0xff]  ;;  %v946_v1 = vld [vmem:[#allocation2 + $0x3a] sm:$0xff]  ;;  %v7727_v13 = vadd.f32 %v7583_v39, %v693_v24  ;;  %v6734_v43 = vld [vmem:[#allocation12 + $0x1d8] sm:$0xff]   ;;  %v696_v44 = vmul.f32 %v7578_v38, %v657_v41 }
  0xf0   : > { %5912 = vmatpush3.bf16.msra.mxu0 %v6721_v62  ;;  %788 = vst [vmem:[#allocation2 + $0x69] sm:$0xff] %v755_v20  ;;  %2311 = vmatmul.mubr.bf16.vlgmr.msra.gmra.mrb[0].mxu1 %v973_v28  ;;  %v760_v59 = vmax.f32 %v7670_v55, 0.0  ;;  %v761_v62 = vmax.f32 %v7674_v56, 0.0  ;;  %v1011_v7 = vld [vmem:[#allocation2 + $0x60] sm:$0xff]  ;;  %v7706_v11 = vpack.c.bf16 %v946_v1, %v945_v0  ;;  %v7712_v14 = vpack.c.bf16 %v755_v20, %v754_v19  ;;  %v947_v20 = vld [vmem:[#allocation2 + $0x4a] sm:$0xff]  ;;  %v948_v27 = vld [vmem:[#allocation2 + $0x52] sm:$0xff] }
  0xf1   : > { %5913 = vmatprep.subr.bf16.mxu0 %v6724_v18  ;;  %6022 = vmatpush3.bf16.msra.mxu1 %v6723_v33  ;;  %v762_v18 = vmax.f32 %v7701_v9, 0.0  ;;  %v7730_v19 = vadd.f32 %v7583_v39, %v694_v25  ;;  %v6733_v28 = vld [vmem:[#allocation12 + $0x120] sm:$0xff]   ;;  %v1013_v31 = vld [vmem:[#allocation2 + $0x78] sm:$0xff]  ;;  %v764_v33 = vmax.f32 %v7727_v13, 0.0  ;;  %v7747_v47 = vadd.f32 %v7583_v39, %v695_v42  ;;  %v6735_v48 = vld [vmem:[#allocation12 + $0x198] sm:$0xff]  }
  0xf2   : > { %6023 = vmatprep.subr.bf16.mxu1 %v6726_v36  ;;  %2318 = vmatprep.mubr.bf16.mxu1 %v7663_v49  ;;  %793 = vst [vmem:[#allocation2 + $0xa9] sm:$0xff] %v760_v59  ;;  %794 = vst [vmem:[#allocation2 + $0xb1] sm:$0xff] %v761_v62  ;;  %v658_v50 = vld [vmem:[%s7483_s25 + $0xa0] sm:$0xff]  ;;  %v659_v51 = vld [vmem:[%s7483_s25 + $0xa8] sm:$0xff]  ;;  %v7762_v0 = vpack.c.bf16 %v757_v35, %v756_v34 }
  0xf3   : > { %2158 = vmatmul.mubr.bf16.gmra.mrb[4].mxu0 %v1037_v32  ;;  %795 = vst [vmem:[#allocation2 + $0xc1] sm:$0xff] %v762_v18  ;;  %v1014_v32 = vld [vmem:[#allocation2 + $0x80] sm:$0xff]  ;;  %v765_v36 = vmax.f32 %v7730_v19, 0.0  ;;  %797 = vst [vmem:[#allocation2 + $0xd9] sm:$0xff] %v764_v33  ;;  %v697_v53 = vmul.f32 %v7578_v38, %v658_v50  ;;  %v698_v54 = vmul.f32 %v7578_v38, %v659_v51  ;;  %v766_v1 = vmax.f32 %v7747_v47, 0.0  ;;  %v6737_v2 = vld [vmem:[#allocation12 + $0x128] sm:$0xff]  }
  0xf4   : > { %5914 = vmatpush3.bf16.msra.mxu0 %v6725_v23  ;;  %2165 = vmatprep.mubr.bf16.mxu0 %v7636_v29  ;;  %v763_v23 = vmax.f32 %v7704_v10, 0.0  ;;  %v7765_v3 = vpack.c.bf16 %v1014_v32, %v1013_v31  ;;  %v660_v21 = vld [vmem:[%s7483_s25 + $0xb0] sm:$0xff]  ;;  %v1015_v24 = vld [vmem:[#allocation2 + $0x90] sm:$0xff]  ;;  %v1016_v25 = vld [vmem:[#allocation2 + $0x98] sm:$0xff] }
  0xf5   : > { %6024 = vmatpush3.bf16.msra.mxu1 %v6727_v52  ;;  %5915 = vmatprep.subr.bf16.mxu0 %v6728_v60  ;;  %798 = vst [vmem:[#allocation2 + $0xe1] sm:$0xff] %v765_v36  ;;  %v7752_v52 = vadd.f32 %v7583_v39, %v696_v44  ;;  %v6736_v60 = vld [vmem:[#allocation12 + $0x168] sm:$0xff]   ;;  %v7769_v5 = vadd.f32 %v7583_v39, %v697_v53  ;;  %799 = vst [vmem:[#allocation2 + $0xf1] sm:$0xff] %v766_v1  ;;  %v6741_v40 = vld [vmem:[#allocation12 + $0x130] sm:$0xff]  }
  0xf6   : > { %6025 = vmatprep.subr.bf16.mxu1 %v6730_v6  ;;  %796 = vst [vmem:[#allocation2 + $0xc9] sm:$0xff] %v763_v23  ;;  %v7772_v6 = vadd.f32 %v7583_v39, %v698_v54  ;;  %v663_v31 = vld [vmem:[%s7483_s25 + $0xc8] sm:$0xff]  ;;  %v7812_v50 = vpack.c.bf16 %v1016_v25, %v1015_v24  ;;  %v664_v45 = vld [vmem:[%s7483_s25 + $0xd0] sm:$0xff]  ;;  %v665_v54 = vld [vmem:[%s7483_s25 + $0xd8] sm:$0xff] }
  0xf7   : > { %v1012_v8 = vld [vmem:[#allocation2 + $0x68] sm:$0xff]  ;;  %v767_v4 = vmax.f32 %v7752_v52, 0.0  ;;  %v768_v34 = vmax.f32 %v7769_v5, 0.0  ;;  %v702_v44 = vmul.f32 %v7578_v38, %v663_v31  ;;  %v703_v51 = vmul.f32 %v7578_v38, %v664_v45  ;;  %v6743_v25 = vld [vmem:[#allocation12 + $0x1a8] sm:$0xff]   ;;  %v7907_v9 = vld [vmem:[#allocation12 + $0x200] sm:$0xff]  }
  0xf8   : > { %2319 = vmatmul.mubr.bf16.gmra.mrb[4].mxu1 %v7676_v57  ;;  %5916 = vmatpush3.bf16.msra.mxu0 %v6729_v63  ;;  %v7720_v26 = vpack.c.bf16 %v1012_v8, %v1011_v7  ;;  %v7756_v63 = vpack.c.bf16 %v948_v27, %v947_v20  ;;  %v769_v35 = vmax.f32 %v7772_v6, 0.0  ;;  %v699_v7 = vmul.f32 %v7578_v38, %v660_v21  ;;  %v949_v16 = vld [vmem:[#allocation2 + $0x62] sm:$0xff]  ;;  %v950_v17 = vld [vmem:[#allocation2 + $0x6a] sm:$0xff] }
  0xf9   : > { %2326 = vmatprep.mubr.bf16.mxu1 %v7685_v61  ;;  %6026 = vmatpush3.bf16.msra.mxu1 %v6731_v15  ;;  %800 = vst [vmem:[#allocation2 + $0xf9] sm:$0xff] %v767_v4  ;;  %v700_v8 = vmul.f32 %v7578_v38, %v661_v22  ;;  %v6738_v15 = vld [vmem:[#allocation12 + $0x1e0] sm:$0xff]   ;;  %801 = vst [vmem:[#allocation2 + $0x109] sm:$0xff] %v768_v34  ;;  %v7807_v41 = vpack.c.bf16 %v950_v17, %v949_v16  ;;  %v1017_v21 = vld [vmem:[#allocation2 + $0xa8] sm:$0xff] }
  0xfa   : > { %5917 = vmatprep.subr.bf16.mxu0 %v6732_v12  ;;  %6027 = vmatprep.subr.bf16.mxu1 %v6734_v43  ;;  %802 = vst [vmem:[#allocation2 + $0x111] sm:$0xff] %v769_v35  ;;  %v7793_v12 = vadd.f32 %v7583_v39, %v699_v7  ;;  %v6739_v27 = vld [vmem:[#allocation12 + $0x1a0] sm:$0xff]   ;;  %v7823_v46 = vadd.f32 %v7583_v39, %v702_v44  ;;  %v6742_v16 = vld [vmem:[#allocation12 + $0x1e8] sm:$0xff]   ;;  %v6744_v45 = vld [vmem:[#allocation12 + $0x178] sm:$0xff]  }
  0xfb   : > { %2166 = vmatmul.mubr.bf16.gmra.mrb[8].mxu0 %v7663_v49  ;;  %v7796_v20 = vadd.f32 %v7583_v39, %v700_v8  ;;  %v704_v7 = vmul.f32 %v7578_v38, %v665_v54  ;;  %v7834_v8 = vadd.f32 %v7583_v39, %v703_v51  ;;  %v7854_v44 = vpack.c.bf16 %v761_v62, %v760_v59  ;;  %v6745_v56 = vld [vmem:[#allocation12 + $0x138] sm:$0xff]   ;;  %v668_v59 = vld [vmem:[%s7483_s25 + $0xf0] sm:$0xff] }
  0xfc   : > { %2173 = vmatprep.mubr.bf16.mxu0 %v7682_v58  ;;  %5918 = vmatpush3.bf16.msra.mxu0 %v6733_v28  ;;  %v662_v28 = vld [vmem:[%s7483_s25 + $0xc0] sm:$0xff]  ;;  %v770_v42 = vmax.f32 %v7793_v12, 0.0  ;;  %v773_v22 = vmax.f32 %v7823_v46, 0.0  ;;  %v7933_v19 = vpack.c.bf16 %v767_v4, %v766_v1  ;;  %v7947_v47 = vpack.c.bf16 %v769_v35, %v768_v34 }
  0xfd   : > { %6028 = vmatpush3.bf16.msra.mxu1 %v6735_v48  ;;  %5919 = vmatprep.subr.bf16.mxu0 %v6736_v60  ;;  %v701_v32 = vmul.f32 %v7578_v38, %v662_v28  ;;  %v771_v43 = vmax.f32 %v7796_v20, 0.0  ;;  %v6740_v48 = vld [vmem:[#allocation12 + $0x170] sm:$0xff]   ;;  %v7842_v17 = vadd.f32 %v7583_v39, %v704_v7  ;;  %v774_v24 = vmax.f32 %v7834_v8, 0.0  ;;  %v667_v28 = vld [vmem:[%s7483_s25 + $0xe8] sm:$0xff]  ;;  %v955_v10 = vld [vmem:[#allocation2 + $0xaa] sm:$0xff] }
  0xfe   : > { %6029 = vmatprep.subr.bf16.mxu1 %v6738_v15  ;;  %803 = vst [vmem:[#allocation2 + $0x121] sm:$0xff] %v770_v42  ;;  %v951_v60 = vld [vmem:[#allocation2 + $0x7a] sm:$0xff]  ;;  %v1018_v15 = vld [vmem:[#allocation2 + $0xb0] sm:$0xff]  ;;  %806 = vst [vmem:[#allocation2 + $0x141] sm:$0xff] %v773_v22 }
  0xff   : > { %v7815_v37 = vadd.f32 %v7583_v39, %v701_v32  ;;  %804 = vst [vmem:[#allocation2 + $0x129] sm:$0xff] %v771_v43  ;;  %807 = vst [vmem:[#allocation2 + $0x151] sm:$0xff] %v774_v24  ;;  %v7860_v51 = vpack.c.bf16 %v1018_v15, %v1017_v21  ;;  %v953_v21 = vld [vmem:[#allocation2 + $0x92] sm:$0xff]  ;;  %v7961_v5 = vpack.c.bf16 %v771_v43, %v770_v42 }
 0x100   : > { %2327 = vmatmul.mubr.bf16.gmra.mrb[8].mxu1 %v7706_v11  ;;  %5920 = vmatpush3.bf16.msra.mxu0 %v6737_v2  ;;  %v952_v2 = vld [vmem:[#allocation2 + $0x82] sm:$0xff]  ;;  %v1024_v13 = vld [vmem:[#allocation2 + $0xf8] sm:$0xff] }
 0x101   : > { %2334 = vmatprep.mubr.bf16.mxu1 %v7720_v26  ;;  %6030 = vmatpush3.bf16.msra.mxu1 %v6739_v27  ;;  %v772_v53 = vmax.f32 %v7815_v37, 0.0  ;;  %v666_v27 = vld [vmem:[%s7483_s25 + $0xe0] sm:$0xff]  ;;  %v7848_v32 = vpack.c.bf16 %v952_v2, %v951_v60  ;;  %v669_v60 = vld [vmem:[%s7483_s25 + $0xf8] sm:$0xff]  ;;  %v707_v2 = vmul.f32 %v7578_v38, %v668_v59  ;;  %v962_v4 = vld [vmem:[#allocation2 + $0xfa] sm:$0xff]  ;;  %s8807_s25 = sld [smem:[#allocation33_spill]] }
 0x102   : > { %5921 = vmatprep.subr.bf16.mxu0 %v6740_v48  ;;  %6031 = vmatprep.subr.bf16.mxu1 %v6742_v16  ;;  %v705_v31 = vmul.f32 %v7578_v38, %v666_v27  ;;  %v775_v48 = vmax.f32 %v7842_v17, 0.0  ;;  %v708_v15 = vmul.f32 %v7578_v38, %v669_v60  ;;  %v6746_v16 = vld [vmem:[#allocation12 + $0x1f0] sm:$0xff]   ;;  %v6748_v59 = vld [vmem:[#allocation12 + $0x1f8] sm:$0xff]   ;;  %v961_v1 = vld [vmem:[#allocation2 + $0xf2] sm:$0xff] }
 0x103   : > { %2174 = vmatmul.mubr.bf16.gmra.mrb[12].mxu0 %v7685_v61  ;;  %805 = vst [vmem:[#allocation2 + $0x139] sm:$0xff] %v772_v53  ;;  %v1019_v27 = vld [vmem:[#allocation2 + $0xc0] sm:$0xff]  ;;  %v963_v34 = vld [vmem:[#allocation2 + $0x10a] sm:$0xff]  ;;  %v964_v35 = vld [vmem:[#allocation2 + $0x112] sm:$0xff]  ;;  %v7975_v12 = vpack.c.bf16 %v773_v22, %v772_v53 }
 0x104   : > { %2181 = vmatprep.mubr.bf16.mxu0 %v7712_v14  ;;  %5922 = vmatpush3.bf16.msra.mxu0 %v6741_v40  ;;  %v706_v40 = vmul.f32 %v7578_v38, %v667_v28  ;;  %v7863_v54 = vadd.f32 %v7583_v39, %v705_v31  ;;  %808 = vst [vmem:[#allocation2 + $0x159] sm:$0xff] %v775_v48  ;;  %v1020_v28 = vld [vmem:[#allocation2 + $0xc8] sm:$0xff]  ;;  %v6747_v38 = vld [vmem:[#allocation12 + $0x1b0] sm:$0xff]  }
 0x105   : > { %6032 = vmatpush3.bf16.msra.mxu1 %v6743_v25  ;;  %5923 = vmatprep.subr.bf16.mxu0 %v6744_v45  ;;  %v954_v25 = vld [vmem:[#allocation2 + $0x9a] sm:$0xff]  ;;  %v7883_v31 = vadd.f32 %v7583_v39, %v707_v2  ;;  %v7989_v37 = vpack.c.bf16 %v775_v48, %v774_v24  ;;  %v968_v22 = vld [vmem:[#allocation2 + $0x142] sm:$0xff] }
 0x106   : > { %v7868_v55 = vadd.f32 %v7583_v39, %v706_v40  ;;  %v776_v62 = vmax.f32 %v7863_v54, 0.0  ;;  %v7888_v40 = vadd.f32 %v7583_v39, %v708_v15  ;;  %6033 = vmatprep.subr.bf16.mxu1 %v6746_v16  ;;  %v7891_v60 = vpack.c.bf16 %v954_v25, %v953_v21  ;;  %v6749_v39 = vld [vmem:[#allocation12 + $0x1b8] sm:$0xff]   ;;  %v1022_v21 = vld [vmem:[#allocation2 + $0xe0] sm:$0xff]  ;;  %v6752_v25 = vld [vmem:[#allocation13 + $0x40] sm:$0xff]  }
 0x107   : > { %v778_v45 = vmax.f32 %v7883_v31, 0.0  ;;  %v7919_v16 = vpack.c.bf16 %v765_v36, %v764_v33  ;;  %v959_v36 = vld [vmem:[#allocation2 + $0xda] sm:$0xff]  ;;  %v965_v42 = vld [vmem:[#allocation2 + $0x122] sm:$0xff]  ;;  %v966_v43 = vld [vmem:[#allocation2 + $0x12a] sm:$0xff]  ;;  %s8700_s4 = scalar_lea.hbm %s8807_s25, %s5684_s9 }
 0x108   : > { %2335 = vmatmul.mubr.bf16.gmra.mrb[12].mxu1 %v7756_v63  ;;  %v8770_v7 = vmax.f32 %v7868_v55, 0.0  ;;  %809 = vst [vmem:[#allocation2 + $0x169] sm:$0xff] %v776_v62  ;;  %5924 = vmatpush3.bf16.msra.mxu0 %v6745_v56  ;;  %v7897_v56 = vpack.c.bf16 %v763_v23, %v762_v18  ;;  %v779_v2 = vmax.f32 %v7888_v40, 0.0  ;;  %v956_v18 = vld [vmem:[#allocation2 + $0xb2] sm:$0xff]  ;;  %v8801_v8 = vmax.f32 %v7868_v55, 0.0 }
 0x109   : > { %2342 = vmatprep.mubr.bf16.mxu1 %v7765_v3  ;;  %6034 = vmatpush3.bf16.msra.mxu1 %v6747_v38  ;;  %811 = vst [vmem:[#allocation2 + $0x181] sm:$0xff] %v778_v45  ;;  %v1021_v23 = vld [vmem:[#allocation2 + $0xd8] sm:$0xff]  ;;  %v7913_v15 = vpack.c.bf16 %v956_v18, %v955_v10  ;;  %v958_v38 = vld [vmem:[#allocation2 + $0xca] sm:$0xff]  ;;  %v960_v10 = vld [vmem:[#allocation2 + $0xe2] sm:$0xff] }
 0x10a   : > { %810 = vst [vmem:[#allocation2 + $0x171] sm:$0xff] %v8770_v7  ;;  %v7900_v7 = vpack.c.bf16 %v1020_v28, %v1019_v27  ;;  %6035 = vmatprep.subr.bf16.mxu1 %v6748_v59  ;;  %812 = vst [vmem:[#allocation2 + $0x189] sm:$0xff] %v779_v2  ;;  %6501 = vmatprep.subr.bf16.mxu0 %v7907_v9  ;;  %v7921_v27 = vpack.c.bf16 %v1022_v21, %v1021_v23  ;;  %v957_v28 = vld [vmem:[#allocation2 + $0xc2] sm:$0xff]  ;;  %v1023_v59 = vld [vmem:[#allocation2 + $0xf0] sm:$0xff] }
 0x10b   : > { %2182 = vmatmul.mubr.bf16.gmra.mrb[16].mxu0 %v7720_v26  ;;  %v7935_v33 = vpack.c.bf16 %v1024_v13, %v1023_v59  ;;  %v1025_v18 = vld [vmem:[#allocation2 + $0x108] sm:$0xff]  ;;  %v1026_v23 = vld [vmem:[#allocation2 + $0x110] sm:$0xff]  ;;  %v7941_v21 = vpack.c.bf16 %v960_v10, %v959_v36  ;;  %v1029_v59 = vld [vmem:[#allocation2 + $0x138] sm:$0xff]  ;;  %v7969_v36 = vpack.c.bf16 %v964_v35, %v963_v34  ;;  %v8003_v17 = vpack.c.bf16 %v8801_v8, %v776_v62 }
 0x10c   : > { %2189 = vmatprep.mubr.bf16.mxu0 %v7762_v0  ;;  %v7949_v52 = vpack.c.bf16 %v1026_v23, %v1025_v18  ;;  %v1030_v13 = vld [vmem:[#allocation2 + $0x140] sm:$0xff]  ;;  %v1031_v10 = vld [vmem:[#allocation2 + $0x150] sm:$0xff]  ;;  %v1032_v18 = vld [vmem:[#allocation2 + $0x158] sm:$0xff]  ;;  %v7983_v23 = vpack.c.bf16 %v966_v43, %v965_v42  ;;  %v8019_v62 = vpack.c.bf16 %v779_v2, %v778_v45 }
 0x10d   : > { %6036 = vmatpush3.bf16.msra.mxu1 %v6749_v39  ;;  %v7927_v39 = vpack.c.bf16 %v958_v38, %v957_v28  ;;  %v1028_v28 = vld [vmem:[#allocation2 + $0x128] sm:$0xff]  ;;  %v7955_v38 = vpack.c.bf16 %v962_v4, %v961_v1  ;;  %v7977_v20 = vpack.c.bf16 %v1030_v13, %v1029_v59  ;;  %v7991_v46 = vpack.c.bf16 %v1032_v18, %v1031_v10  ;;  %v967_v53 = vld [vmem:[#allocation2 + $0x13a] sm:$0xff]  ;;  %v969_v48 = vld [vmem:[#allocation2 + $0x152] sm:$0xff] }
 0x10e   : > { %6157 = vmatprep.subr.bf16.mxu1 %v6752_v25  ;;  %v1027_v25 = vld [vmem:[#allocation2 + $0x120] sm:$0xff]  ;;  %v2993_v43 = vld [vmem:[%s7493_s23] sm:$0xff]  ;;  %v2994_v8 = vld [vmem:[%s7493_s23 + $0x8] sm:$0xff] }
 0x10f   : > { %v7963_v6 = vpack.c.bf16 %v1028_v28, %v1027_v25  ;;  %v1033_v1 = vld [vmem:[#allocation2 + $0x168] sm:$0xff]  ;;  %v7997_v25 = vpack.c.bf16 %v968_v22, %v967_v53  ;;  %v970_v28 = vld [vmem:[#allocation2 + $0x15a] sm:$0xff] }
 0x110   : > { %2343 = vmatmul.mubr.bf16.gmra.mrb[16].mxu1 %v7807_v41  ;;  %v1035_v34 = vld [vmem:[#allocation2 + $0x180] sm:$0xff]  ;;  %v8011_v54 = vpack.c.bf16 %v970_v28, %v969_v48 }
 0x111   : > { %2350 = vmatprep.mubr.bf16.mxu1 %v7812_v50  ;;  %v1034_v4 = vld [vmem:[#allocation2 + $0x170] sm:$0xff]  ;;  %v1036_v35 = vld [vmem:[#allocation2 + $0x188] sm:$0xff]  ;;  %v1069_v59 = vld [vmem:[#allocation2 + $0x19] sm:$0xff] }
 0x112   : > { %v8005_v24 = vpack.c.bf16 %v1034_v4, %v1033_v1  ;;  %v8013_v55 = vpack.c.bf16 %v1036_v35, %v1035_v34  ;;  %v1070_v13 = vld [vmem:[#allocation2 + $0x21] sm:$0xff]  ;;  %v971_v42 = vld [vmem:[#allocation2 + $0x16a] sm:$0xff]  ;;  %v8026_v10 = vld [vmem:[%s8754_s6] ss:$0 sm:$0xff] }
 0x113   : > { %2190 = vmatmul.mubr.bf16.gmra.mrb[20].mxu0 %v7765_v3  ;;  %v3008_v31 = vmul.f32 %v8026_v10, %v2993_v43  ;;  %v972_v40 = vld [vmem:[#allocation2 + $0x172] sm:$0xff]  ;;  %v8035_v45 = vld [vmem:[%s8755_s7] ss:$0 sm:$0xff]  ;;  %v1101_v18 = vpack.c.bf16 %v1070_v13, %v1069_v59  ;;  %v3009_v28 = vmul.f32 %v8026_v10, %v2994_v8  ;;  %v2996_v8 = vld [vmem:[%s7493_s23 + $0x18] sm:$0xff] }
 0x114   : > { %2197 = vmatprep.mubr.bf16.mxu0 %v7803_v30  ;;  %v8040_v53 = vpack.c.bf16 %v972_v40, %v971_v42  ;;  %v1071_v1 = vld [vmem:[#allocation2 + $0x31] sm:$0xff]  ;;  %v1072_v4 = vld [vmem:[#allocation2 + $0x39] sm:$0xff] }
 0x115   : > { %v8038_v2 = vadd.f32 %v8035_v45, %v3008_v31  ;;  %v2995_v48 = vld [vmem:[%s7493_s23 + $0x10] sm:$0xff]  ;;  %v8054_v59 = vadd.f32 %v8035_v45, %v3009_v28  ;;  %v1102_v42 = vpack.c.bf16 %v1072_v4, %v1071_v1  ;;  %v6753_v31 = vld [vmem:[#allocation13] sm:$0xff]   ;;  %v6755_v40 = vld [vmem:[#allocation13 + $0x48] sm:$0xff]  }
 0x116   : > { %v3010_v34 = vmul.f32 %v8026_v10, %v2995_v48  ;;  %v6754_v35 = vld [vmem:[#allocation12 + $0x210] sm:$0xff]   ;;  %v2997_v1 = vld [vmem:[%s7493_s23 + $0x20] sm:$0xff]  ;;  %v6756_v48 = vld [vmem:[#allocation13 + $0x8] sm:$0xff]  }
 0x117   : > { %v3031_v22 = vmax.f32 %v8038_v2, 0.0  ;;  %v3012_v4 = vmul.f32 %v8026_v10, %v2997_v1  ;;  %v6758_v28 = vld [vmem:[#allocation13 + $0x50] sm:$0xff]   ;;  %v1334_v2 = vld [vmem:[#allocation2 + $0x92] sm:$0xff] }
 0x118   : > { %2351 = vmatmul.mubr.bf16.gmra.mrb[20].mxu1 %v7848_v32  ;;  %v8057_v13 = vadd.f32 %v8035_v45, %v3010_v34 }
 0x119   : > { %2358 = vmatprep.mubr.bf16.mxu1 %v7860_v51  ;;  %3040 = vst [vmem:[#allocation3 + $0x11] sm:$0xff] %v3031_v22 }
 0x11a   : > { %v3033_v43 = vmax.f32 %v8057_v13, 0.0 }
 0x11b   : > { %2198 = vmatmul.mubr.bf16.gmra.mrb[24].mxu0 %v7812_v50 }
 0x11c   : > { %2205 = vmatprep.mubr.bf16.mxu0 %v7854_v44  ;;  %3042 = vst [vmem:[#allocation3 + $0x31] sm:$0xff] %v3033_v43 }
 0x120   : > { %2359 = vmatmul.mubr.bf16.gmra.mrb[24].mxu1 %v7891_v60 }
 0x121   : > { %2366 = vmatprep.mubr.bf16.mxu1 %v7900_v7 }
 0x123   : > { %2206 = vmatmul.mubr.bf16.gmra.mrb[28].mxu0 %v7860_v51 }
 0x124   : > { %2213 = vmatprep.mubr.bf16.mxu0 %v7897_v56 }
 0x128   : > { %2367 = vmatmul.mubr.bf16.gmra.mrb[28].mxu1 %v7913_v15 }
 0x129   : > { %2374 = vmatprep.mubr.bf16.mxu1 %v7921_v27 }
 0x12b   : > { %2214 = vmatmul.mubr.bf16.gmra.mrb[32].mxu0 %v7900_v7 }
 0x12c   : > { %2221 = vmatprep.mubr.bf16.mxu0 %v7919_v16 }
 0x130   : > { %2375 = vmatmul.mubr.bf16.gmra.mrb[32].mxu1 %v7927_v39 }
 0x131   : > { %2382 = vmatprep.mubr.bf16.mxu1 %v7935_v33 }
 0x133   : > { %2222 = vmatmul.mubr.bf16.gmra.mrb[36].mxu0 %v7921_v27 }
 0x134   : > { %2229 = vmatprep.mubr.bf16.mxu0 %v7933_v19 }
 0x138   : > { %2383 = vmatmul.mubr.bf16.gmra.mrb[36].mxu1 %v7941_v21 }
 0x139   : > { %2390 = vmatprep.mubr.bf16.mxu1 %v7949_v52 }
 0x13b   : > { %2230 = vmatmul.mubr.bf16.gmra.mrb[40].mxu0 %v7935_v33 }
 0x13c   : > { %2237 = vmatprep.mubr.bf16.mxu0 %v7947_v47 }
 0x140   : > { %2391 = vmatmul.mubr.bf16.gmra.mrb[40].mxu1 %v7955_v38 }
 0x141   : > { %2398 = vmatprep.mubr.bf16.mxu1 %v7963_v6 }
 0x143   : > { %2238 = vmatmul.mubr.bf16.gmra.mrb[44].mxu0 %v7949_v52 }
 0x144   : > { %2245 = vmatprep.mubr.bf16.mxu0 %v7961_v5 }
 0x148   : > { %2399 = vmatmul.mubr.bf16.gmra.mrb[44].mxu1 %v7969_v36 }
 0x149   : > { %2406 = vmatprep.mubr.bf16.mxu1 %v7977_v20 }
 0x14b   : > { %2246 = vmatmul.mubr.bf16.gmra.mrb[48].mxu0 %v7963_v6 }
 0x14c   : > { %2253 = vmatprep.mubr.bf16.mxu0 %v7975_v12 }
 0x150   : > { %2407 = vmatmul.mubr.bf16.gmra.mrb[48].mxu1 %v7983_v23 }
 0x151   : > { %2414 = vmatprep.mubr.bf16.mxu1 %v7991_v46 }
 0x153   : > { %2254 = vmatmul.mubr.bf16.gmra.mrb[52].mxu0 %v7977_v20 }
 0x154   : > { %2261 = vmatprep.mubr.bf16.mxu0 %v7989_v37 }
 0x158   : > { %2415 = vmatmul.mubr.bf16.gmra.mrb[52].mxu1 %v7997_v25 }
 0x159   : > { %2422 = vmatprep.mubr.bf16.mxu1 %v8005_v24 }
 0x15b   : > { %2262 = vmatmul.mubr.bf16.gmra.mrb[56].mxu0 %v7991_v46 }
 0x15c   : > { %2269 = vmatprep.mubr.bf16.mxu0 %v8003_v17 }
 0x160   : > { %2423 = vmatmul.mubr.bf16.gmra.mrb[56].mxu1 %v8011_v54 }
 0x161   : > { %2430 = vmatprep.mubr.bf16.mxu1 %v8013_v55 }
 0x163   : > { %2270 = vmatmul.mubr.bf16.gmra.mrb[60].mxu0 %v8005_v24 }
 0x164   : > { %2471 = vmatprep.mubr.bf16.mxu0 %v7676_v57  ;;  %v6751_v57 = vld [vmem:[#allocation12 + $0x208] sm:$0xff]  }
 0x168   : > { %2431 = vmatmul.mubr.bf16.gmra.mrb[60].mxu1 %v8040_v53 }
 0x169   : > { %2632 = vmatprep.mubr.bf16.mxu1 %v7636_v29  ;;  %v1073_v29 = vld [vmem:[#allocation2 + $0x49] sm:$0xff] }
 0x16b   : > { %2472 = vmatmul.mubr.bf16.vlgmr.msra.gmra.mrb[64].mxu0 %v1101_v18  ;;  %v6757_v18 = vld [vmem:[#allocation12 + $0x218] sm:$0xff]  }
 0x16c   : > { %6502 = vmatpush3.bf16.msra.mxu0 %v7907_v9  ;;  %2479 = vmatprep.mubr.bf16.mxu0 %v7706_v11  ;;  %v3032_v9 = vmax.f32 %v8054_v59, 0.0  ;;  %v1074_v11 = vld [vmem:[#allocation2 + $0x51] sm:$0xff] }
 0x16d   : > { %6503 = vmatprep.subr.bf16.mxu0 %v6751_v57  ;;  %v1336_v59 = vld [vmem:[#allocation2 + $0xaa] sm:$0xff] }
 0x16e   : > { %3041 = vst [vmem:[#allocation3 + $0x21] sm:$0xff] %v3032_v9 }
 0x170   : > { %6504 = vmatpush3.bf16.msra.mxu0 %v6751_v57  ;;  %2633 = vmatmul.mubr.bf16.vlgmr.msra.gmra.mrb[64].mxu1 %v7663_v49  ;;  %v3011_v57 = vmul.f32 %v8026_v10, %v2996_v8  ;;  %v1103_v49 = vpack.c.bf16 %v1074_v11, %v1073_v29  ;;  %v6763_v29 = vld [vmem:[#allocation12 + $0x228] sm:$0xff]  }
 0x171   : > { %6505 = vmatprep.subr.bf16.mxu0 %v6754_v35  ;;  %2640 = vmatprep.mubr.bf16.mxu1 %v7682_v58  ;;  %v2998_v11 = vld [vmem:[%s7493_s23 + $0x28] sm:$0xff] }
 0x172   : > { %6158 = vmatpush3.bf16.msra.mxu1 %v6753_v31  ;;  %v8073_v34 = vadd.f32 %v8035_v45, %v3011_v57  ;;  %v6759_v31 = vld [vmem:[#allocation13 + $0x10] sm:$0xff]   ;;  %v3013_v1 = vmul.f32 %v8026_v10, %v2998_v11  ;;  %v6762_v57 = vld [vmem:[#allocation13 + $0x18] sm:$0xff]   ;;  %v6765_v11 = vld [vmem:[#allocation13 + $0x20] sm:$0xff]  }
 0x173   : > { %2480 = vmatmul.mubr.bf16.gmra.mrb[68].mxu0 %v1102_v42  ;;  %6159 = vmatprep.subr.bf16.mxu1 %v6755_v40  ;;  %v8076_v42 = vadd.f32 %v8035_v45, %v3012_v4  ;;  %v2999_v40 = vld [vmem:[%s7493_s23 + $0x30] sm:$0xff]  ;;  %v6764_v4 = vld [vmem:[#allocation13 + $0x60] sm:$0xff]  }
 0x174   : > { %2487 = vmatprep.mubr.bf16.mxu0 %v7756_v63  ;;  %6506 = vmatpush3.bf16.msra.mxu0 %v6754_v35  ;;  %v6760_v63 = vld [vmem:[#allocation12 + $0x220] sm:$0xff]   ;;  %v3034_v8 = vmax.f32 %v8073_v34, 0.0  ;;  %v6761_v35 = vld [vmem:[#allocation13 + $0x58] sm:$0xff]  }
 0x175   : > { %6507 = vmatprep.subr.bf16.mxu0 %v6757_v18  ;;  %v3035_v58 = vmax.f32 %v8076_v42, 0.0  ;;  %v1340_v42 = vld [vmem:[#allocation2 + $0xda] sm:$0xff] }
 0x176   : > { %6160 = vmatpush3.bf16.msra.mxu1 %v6756_v48  ;;  %3043 = vst [vmem:[#allocation3 + $0x41] sm:$0xff] %v3034_v8  ;;  %v8092_v48 = vadd.f32 %v8035_v45, %v3013_v1  ;;  %v6771_v1 = vld [vmem:[#allocation13 + $0x30] sm:$0xff]  }
 0x177   : > { %6161 = vmatprep.subr.bf16.mxu1 %v6758_v28  ;;  %3044 = vst [vmem:[#allocation3 + $0x51] sm:$0xff] %v3035_v58 }
 0x178   : > { %6508 = vmatpush3.bf16.msra.mxu0 %v6757_v18  ;;  %2641 = vmatmul.mubr.bf16.gmra.mrb[68].mxu1 %v7685_v61  ;;  %v3014_v18 = vmul.f32 %v8026_v10, %v2999_v40  ;;  %v6766_v61 = vld [vmem:[#allocation12 + $0x230] sm:$0xff]   ;;  %v6775_v40 = vld [vmem:[#allocation13 + $0x140] sm:$0xff]  }
 0x179   : > { %6509 = vmatprep.subr.bf16.mxu0 %v6760_v63  ;;  %2648 = vmatprep.mubr.bf16.mxu1 %v7712_v14 }
 0x17a   : > { %6162 = vmatpush3.bf16.msra.mxu1 %v6759_v31  ;;  %v8095_v28 = vadd.f32 %v8035_v45, %v3014_v18  ;;  %v6767_v31 = vld [vmem:[#allocation13 + $0x68] sm:$0xff]  }
 0x17b   : > { %2488 = vmatmul.mubr.bf16.gmra.mrb[72].mxu0 %v1103_v49  ;;  %6163 = vmatprep.subr.bf16.mxu1 %v6761_v35  ;;  %v6768_v35 = vld [vmem:[#allocation13 + $0x28] sm:$0xff]  }
 0x17c   : > { %2495 = vmatprep.mubr.bf16.mxu0 %v7807_v41  ;;  %6510 = vmatpush3.bf16.msra.mxu0 %v6760_v63  ;;  %v3036_v41 = vmax.f32 %v8092_v48, 0.0  ;;  %v3037_v49 = vmax.f32 %v8095_v28, 0.0  ;;  %v6769_v63 = vld [vmem:[#allocation12 + $0x238] sm:$0xff]  }
 0x17d   : > { %6511 = vmatprep.subr.bf16.mxu0 %v6763_v29  ;;  %v8230_v34 = vld [vmem:[#allocation3 + $0x40] sm:$0xff] }
 0x17e   : > { %6164 = vmatpush3.bf16.msra.mxu1 %v6762_v57  ;;  %3045 = vst [vmem:[#allocation3 + $0x61] sm:$0xff] %v3036_v41  ;;  %3046 = vst [vmem:[#allocation3 + $0x71] sm:$0xff] %v3037_v49  ;;  %v1344_v28 = vld [vmem:[#allocation2 + $0x10a] sm:$0xff] }
 0x17f   : > { %6165 = vmatprep.subr.bf16.mxu1 %v6764_v4 }
 0x180   : > { %6512 = vmatpush3.bf16.msra.mxu0 %v6763_v29  ;;  %2649 = vmatmul.mubr.bf16.gmra.mrb[72].mxu1 %v7720_v26  ;;  %v6770_v29 = vld [vmem:[#allocation13 + $0x70] sm:$0xff]   ;;  %v6773_v26 = vld [vmem:[#allocation13 + $0x38] sm:$0xff]  }
 0x181   : > { %6513 = vmatprep.subr.bf16.mxu0 %v6766_v61  ;;  %2656 = vmatprep.mubr.bf16.mxu1 %v7762_v0 }
 0x182   : > { %6166 = vmatpush3.bf16.msra.mxu1 %v6765_v11 }
 0x183   : > { %2496 = vmatmul.mubr.bf16.gmra.mrb[76].mxu0 %v7712_v14  ;;  %6167 = vmatprep.subr.bf16.mxu1 %v6767_v31  ;;  %v6772_v14 = vld [vmem:[#allocation13 + $0x78] sm:$0xff]  }
 0x184   : > { %2503 = vmatprep.mubr.bf16.mxu0 %v7848_v32  ;;  %6514 = vmatpush3.bf16.msra.mxu0 %v6766_v61  ;;  %v6774_v32 = vld [vmem:[#allocation13 + $0xc0] sm:$0xff]  }
 0x185   : > { %6515 = vmatprep.subr.bf16.mxu0 %v6769_v63  ;;  %v8252_v48 = vld [vmem:[#allocation3 + $0x60] sm:$0xff] }
 0x186   : > { %6168 = vmatpush3.bf16.msra.mxu1 %v6768_v35 }
 0x187   : > { %6169 = vmatprep.subr.bf16.mxu1 %v6770_v29 }
 0x188   : > { %6516 = vmatpush3.bf16.msra.mxu0 %v6769_v63  ;;  %2657 = vmatmul.mubr.bf16.gmra.mrb[76].mxu1 %v7765_v3 }
 0x189   : > { %6237 = vmatprep.subr.bf16.mxu0 %v6775_v40  ;;  %2664 = vmatprep.mubr.bf16.mxu1 %v7803_v30 }
 0x18a   : > { %6170 = vmatpush3.bf16.msra.mxu1 %v6771_v1 }
 0x18b   : > { %2504 = vmatmul.mubr.bf16.gmra.mrb[80].mxu0 %v7762_v0  ;;  %6171 = vmatprep.subr.bf16.mxu1 %v6772_v14  ;;  %v3000_v0 = vld [vmem:[%s7493_s23 + $0x38] sm:$0xff] }
 0x18c   : > { %2511 = vmatprep.mubr.bf16.mxu0 %v7891_v60  ;;  %v3015_v3 = vmul.f32 %v8026_v10, %v3000_v0  ;;  %v1163_v0 = vld [vmem:[#allocation2 + $0x182] sm:$0xff] }
 0x18e   : > { %6172 = vmatpush3.bf16.msra.mxu1 %v6773_v26  ;;  %v3030_v60 = vadd.f32 %v8035_v45, %v3015_v3  ;;  %v1164_v3 = vld [vmem:[#allocation2 + $0x18a] sm:$0xff] }
 0x18f   : > { %6197 = vmatprep.subr.bf16.mxu1 %v6774_v32 }
 0x190   : > { %2665 = vmatmul.mubr.bf16.gmra.mrb[80].mxu1 %v7812_v50 }
 0x191   : > { %2672 = vmatprep.mubr.bf16.mxu1 %v7854_v44 }
 0x193   : > { %2512 = vmatmul.mubr.bf16.gmra.mrb[84].mxu0 %v7803_v30  ;;  %v3038_v30 = vmax.f32 %v3030_v60, 0.0 }
 0x194   : > { %2519 = vmatprep.mubr.bf16.mxu0 %v7913_v15 }
 0x195   : > { %3047 = vst [vmem:[#allocation3 + $0x81] sm:$0xff] %v3038_v30 }
 0x198   : > { %2673 = vmatmul.mubr.bf16.gmra.mrb[84].mxu1 %v7860_v51 }
 0x199   : > { %2680 = vmatprep.mubr.bf16.mxu1 %v7897_v56 }
 0x19b   : > { %2520 = vmatmul.mubr.bf16.gmra.mrb[88].mxu0 %v7854_v44 }
 0x19c   : > { %2527 = vmatprep.mubr.bf16.mxu0 %v7927_v39 }
 0x1a0   : > { %2681 = vmatmul.mubr.bf16.gmra.mrb[88].mxu1 %v7900_v7 }
 0x1a1   : > { %2688 = vmatprep.mubr.bf16.mxu1 %v7919_v16 }
 0x1a3   : > { %2528 = vmatmul.mubr.bf16.gmra.mrb[92].mxu0 %v7897_v56 }
 0x1a4   : > { %2535 = vmatprep.mubr.bf16.mxu0 %v7941_v21 }
 0x1a8   : > { %2689 = vmatmul.mubr.bf16.gmra.mrb[92].mxu1 %v7921_v27 }
 0x1a9   : > { %2696 = vmatprep.mubr.bf16.mxu1 %v7933_v19 }
 0x1ab   : > { %2536 = vmatmul.mubr.bf16.gmra.mrb[96].mxu0 %v7919_v16  ;;  %v8143_v16 = vld [vmem:[%s8802_s27] ss:$0 sm:$0xff] }
 0x1ac   : > { %2543 = vmatprep.mubr.bf16.mxu0 %v7955_v38 }
 0x1b0   : > { %2697 = vmatmul.mubr.bf16.gmra.mrb[96].mxu1 %v7935_v33 }
 0x1b1   : > { %2704 = vmatprep.mubr.bf16.mxu1 %v7947_v47 }
 0x1b3   : > { %2544 = vmatmul.mubr.bf16.gmra.mrb[100].mxu0 %v7933_v19 }
 0x1b4   : > { %2551 = vmatprep.mubr.bf16.mxu0 %v7969_v36 }
 0x1b8   : > { %2705 = vmatmul.mubr.bf16.gmra.mrb[100].mxu1 %v7949_v52 }
 0x1b9   : > { %2712 = vmatprep.mubr.bf16.mxu1 %v7961_v5 }
 0x1bb   : > { %2552 = vmatmul.mubr.bf16.gmra.mrb[104].mxu0 %v7947_v47 }
 0x1bc   : > { %2559 = vmatprep.mubr.bf16.mxu0 %v7983_v23 }
 0x1be   : > { %v5701_v50 = vpop.f32.mrb[0].mxu0 }
 0x1bf   : > { %v5702_v44 = vpop.f32.mrb[1].mxu0 }
 0x1c0   : > { %v5703_v51 = vadd.f32 %v5702_v44, %v5701_v50  ;;  %v5704_v7 = vpop.f32.mrb[2].mxu0  ;;  %2713 = vmatmul.mubr.bf16.gmra.mrb[104].mxu1 %v7963_v6 }
 0x1c1   : > { %v5705_v56 = vpop.f32.mrb[3].mxu0  ;;  %2720 = vmatprep.mubr.bf16.mxu1 %v7975_v12 }
 0x1c2   : > { %v5706_v15 = vadd.f32 %v5705_v56, %v5704_v7  ;;  %v2152_v39 = vadd.f32 %v5703_v51, %v8143_v16 }
 0x1c3   : > { %2560 = vmatmul.mubr.bf16.gmra.mrb[108].mxu0 %v7961_v5  ;;  %v5813_v19 = vpop.f32.mrb[0].mxu1 }
 0x1c4   : > { %2567 = vmatprep.mubr.bf16.mxu0 %v7997_v25  ;;  %v5814_v21 = vpop.f32.mrb[1].mxu1  ;;  %v2155_v38 = vadd.f32 %v5706_v15, %v8143_v16  ;;  %v8168_v15 = vpack.c.bf16 %v1164_v3, %v1163_v0  ;;  %v1228_v0 = vld [vmem:[#allocation2 + $0x198] sm:$0xff] }
 0x1c5   : > { %v5815_v5 = vadd.f32 %v5814_v21, %v5813_v19  ;;  %v5816_v6 = vpop.f32.mrb[2].mxu1 }
 0x1c6   : > { %v5707_v27 = vpop.f32.mrb[4].mxu0  ;;  %v5817_v23 = vpop.f32.mrb[3].mxu1 }
 0x1c7   : > { %v5708_v33 = vpop.f32.mrb[5].mxu0  ;;  %v8149_v45 = vadd.f32 %v5815_v5, %v2152_v39  ;;  %v5818_v25 = vadd.f32 %v5817_v23, %v5816_v6  ;;  %v1292_v6 = vld [vmem:[#allocation2 + $0x199] sm:$0xff] }
 0x1c8   : > { %v5709_v47 = vadd.f32 %v5708_v33, %v5707_v27  ;;  %v5710_v52 = vpop.f32.mrb[6].mxu0  ;;  %2721 = vmatmul.mubr.bf16.gmra.mrb[108].mxu1 %v7977_v20 }
 0x1c9   : > { %v5711_v36 = vpop.f32.mrb[7].mxu0  ;;  %v8154_v18 = vadd.f32 %v5818_v25, %v2155_v38  ;;  %2728 = vmatprep.mubr.bf16.mxu1 %v7989_v37  ;;  %v1327_v38 = vld [vmem:[#allocation2 + $0x3a] sm:$0xff] }
 0x1ca   : > { %v5712_v10 = vadd.f32 %v5711_v36, %v5710_v52  ;;  %v2160_v4 = vadd.f32 %v5709_v47, %v8143_v16  ;;  %v1326_v52 = vld [vmem:[#allocation2 + $0x32] sm:$0xff]  ;;  %v1293_v36 = vld [vmem:[#allocation2 + $0x1a1] sm:$0xff] }
 0x1cb   : > { %2568 = vmatmul.mubr.bf16.gmra.mrb[112].mxu0 %v7975_v12  ;;  %v5819_v61 = vpop.f32.mrb[4].mxu1 }
 0x1cc   : > { %2575 = vmatprep.mubr.bf16.mxu0 %v8011_v54  ;;  %v5820_v31 = vpop.f32.mrb[5].mxu1  ;;  %v2163_v29 = vadd.f32 %v5712_v10, %v8143_v16 }
 0x1cd   : > { %v5821_v40 = vadd.f32 %v5820_v31, %v5819_v61  ;;  %v5822_v12 = vpop.f32.mrb[6].mxu1  ;;  %v1358_v61 = vpack.c.bf16 %v1327_v38, %v1326_v52 }
 0x1ce   : > { %v5713_v57 = vpop.f32.mrb[8].mxu0  ;;  %v5823_v20 = vpop.f32.mrb[7].mxu1 }
 0x1cf   : > { %v5714_v11 = vpop.f32.mrb[9].mxu0  ;;  %v8159_v54 = vadd.f32 %v5821_v40, %v2160_v4  ;;  %v5824_v26 = vadd.f32 %v5823_v20, %v5822_v12  ;;  %v1328_v20 = vld [vmem:[#allocation2 + $0x4a] sm:$0xff] }
 0x1d0   : > { %v5715_v63 = vadd.f32 %v5714_v11, %v5713_v57  ;;  %v5716_v35 = vpop.f32.mrb[10].mxu0  ;;  %2729 = vmatmul.mubr.bf16.gmra.mrb[112].mxu1 %v7991_v46 }
 0x1d1   : > { %v5717_v1 = vpop.f32.mrb[11].mxu0  ;;  %v8164_v32 = vadd.f32 %v5824_v26, %v2163_v29  ;;  %2736 = vmatprep.mubr.bf16.mxu1 %v8003_v17 }
 0x1d2   : > { %v5718_v14 = vadd.f32 %v5717_v1, %v5716_v35  ;;  %v2168_v30 = vadd.f32 %v5715_v63, %v8143_v16  ;;  %v1309_v35 = vpack.c.bf16 %v1293_v36, %v1292_v6 }
 0x1d3   : > { %2576 = vmatmul.mubr.bf16.gmra.mrb[116].mxu0 %v7989_v37  ;;  %v5825_v50 = vpop.f32.mrb[8].mxu1 }
 0x1d4   : > { %2583 = vmatprep.mubr.bf16.mxu0 %v8040_v53  ;;  %v5826_v51 = vpop.f32.mrb[9].mxu1  ;;  %v2171_v37 = vadd.f32 %v5718_v14, %v8143_v16  ;;  %v1329_v14 = vld [vmem:[#allocation2 + $0x52] sm:$0xff] }
 0x1d5   : > { %v5827_v46 = vadd.f32 %v5826_v51, %v5825_v50  ;;  %v5828_v53 = vpop.f32.mrb[10].mxu1  ;;  %v1331_v50 = vld [vmem:[#allocation2 + $0x6a] sm:$0xff] }
 0x1d6   : > { %v5719_v60 = vpop.f32.mrb[12].mxu0  ;;  %v5829_v39 = vpop.f32.mrb[11].mxu1 }
 0x1d7   : > { %v5720_v44 = vpop.f32.mrb[13].mxu0  ;;  %v8171_v33 = vadd.f32 %v5827_v46, %v2168_v30  ;;  %v5830_v21 = vadd.f32 %v5829_v39, %v5828_v53  ;;  %v1330_v30 = vld [vmem:[#allocation2 + $0x62] sm:$0xff] }
 0x1d8   : > { %v5721_v7 = vadd.f32 %v5720_v44, %v5719_v60  ;;  %v5722_v56 = vpop.f32.mrb[14].mxu0  ;;  %2737 = vmatmul.mubr.bf16.gmra.mrb[116].mxu1 %v8005_v24  ;;  %v3064_v60 = vld [vmem:[#allocation3 + $0x1] sm:$0xff] }
 0x1d9   : > { %v5723_v27 = vpop.f32.mrb[15].mxu0  ;;  %v8176_v47 = vadd.f32 %v5830_v21, %v2171_v37  ;;  %2744 = vmatprep.mubr.bf16.mxu1 %v8019_v62  ;;  %v3072_v38 = vpack.c.bf16 %v3031_v22, %v3064_v60  ;;  %v1335_v22 = vld [vmem:[#allocation2 + $0x9a] sm:$0xff] }
 0x1da   : > { %v5724_v19 = vadd.f32 %v5723_v27, %v5722_v56  ;;  %v2176_v23 = vadd.f32 %v5721_v7, %v8143_v16  ;;  %v1359_v56 = vpack.c.bf16 %v1329_v14, %v1328_v20  ;;  %v6777_v27 = vld [vmem:[#allocation13 + $0x100] sm:$0xff]   ;;  %v1362_v60 = vpack.c.bf16 %v1335_v22, %v1334_v2 }
 0x1db   : > { %2584 = vmatmul.mubr.bf16.gmra.mrb[120].mxu0 %v8003_v17  ;;  %v5831_v10 = vpop.f32.mrb[12].mxu1 }
 0x1dc   : > { %2591 = vmatprep.mubr.bf16.mxu0 %v8168_v15  ;;  %v5832_v57 = vpop.f32.mrb[13].mxu1  ;;  %v2179_v24 = vadd.f32 %v5724_v19, %v8143_v16 }
 0x1dd   : > { %v5833_v11 = vadd.f32 %v5832_v57, %v5831_v10  ;;  %v5834_v31 = vpop.f32.mrb[14].mxu1  ;;  %v3048_v57 = vld [vmem:[#allocation3] sm:$0xff] }
 0x1de   : > { %v5725_v5 = vpop.f32.mrb[16].mxu0  ;;  %v5835_v29 = vpop.f32.mrb[15].mxu1 }
 0x1df   : > { %v5726_v25 = vpop.f32.mrb[17].mxu0  ;;  %v8181_v12 = vadd.f32 %v5833_v11, %v2176_v23  ;;  %v5836_v1 = vadd.f32 %v5835_v29, %v5834_v31  ;;  %v6781_v23 = vld [vmem:[#allocation13 + $0x148] sm:$0xff]   ;;  %v6787_v31 = vld [vmem:[#allocation13 + $0x150] sm:$0xff]  }
 0x1e0   : > { %v5727_v4 = vadd.f32 %v5726_v25, %v5725_v5  ;;  %v5728_v17 = vpop.f32.mrb[18].mxu0  ;;  %2745 = vmatmul.mubr.bf16.gmra.mrb[120].mxu1 %v8013_v55  ;;  %v1360_v5 = vpack.c.bf16 %v1331_v50, %v1330_v30 }
 0x1e1   : > { %v5729_v63 = vpop.f32.mrb[19].mxu0  ;;  %v8185_v26 = vadd.f32 %v5836_v1, %v2179_v24  ;;  %2752 = vmatprep.mubr.bf16.mxu1 %v1309_v35  ;;  %v6783_v24 = vld [vmem:[#allocation13 + $0x108] sm:$0xff]  }
 0x1e2   : > { %v5730_v40 = vadd.f32 %v5729_v63, %v5728_v17  ;;  %v2184_v44 = vadd.f32 %v5727_v4, %v8143_v16  ;;  %v8193_v4 = vld [vmem:[#allocation3 + $0x10] sm:$0xff] }
 0x1e3   : > { %2592 = vmatmul.mubr.bf16.gmra.mrb[124].mxu0 %v8019_v62  ;;  %v5837_v51 = vpop.f32.mrb[16].mxu1  ;;  %v6902_v62 = vld [vmem:[#allocation2 + $0x8] sm:$0xff]  ;;  %v1332_v17 = vld [vmem:[#allocation2 + $0x7a] sm:$0xff]  ;;  %v3056_v14 = vpack.c.bf16 %v8193_v4, %v3048_v57 }
 0x1e4   : > { %6517 = vmatprep.mubr.bf16.mxu0 %v1358_v61  ;;  %v5838_v37 = vpop.f32.mrb[17].mxu1  ;;  %v1245_v46 = vpack.c.bf16 %v6902_v62, %v1228_v0  ;;  %v2187_v39 = vadd.f32 %v5730_v40, %v8143_v16  ;;  %v1333_v61 = vld [vmem:[#allocation2 + $0x82] sm:$0xff]  ;;  %v6778_v62 = vld [vmem:[#allocation13 + $0xc8] sm:$0xff]  }
 0x1e5   : > { %v5839_v19 = vadd.f32 %v5838_v37, %v5837_v51  ;;  %v5840_v21 = vpop.f32.mrb[18].mxu1  ;;  %v1361_v1 = vpack.c.bf16 %v1333_v61, %v1332_v17  ;;  %v6776_v51 = vld [vmem:[#allocation13 + $0x80] sm:$0xff]  }
 0x1e6   : > { %v5731_v3 = vpop.f32.mrb[20].mxu0  ;;  %v5841_v6 = vpop.f32.mrb[19].mxu1  ;;  %v6798_v61 = vld [vmem:[#allocation13 + $0x160] sm:$0xff]  }
 0x1e7   : > { %v5732_v7 = vpop.f32.mrb[21].mxu0  ;;  %v8191_v10 = vadd.f32 %v5839_v19, %v2184_v44  ;;  %v5842_v25 = vadd.f32 %v5841_v6, %v5840_v21  ;;  %v6793_v19 = vld [vmem:[#allocation13 + $0x158] sm:$0xff]   ;;  %v8208_v21 = vld [vmem:[#allocation3 + $0x20] sm:$0xff] }
 0x1e8   : > { %v5733_v55 = vadd.f32 %v5732_v7, %v5731_v3  ;;  %v5734_v53 = vpop.f32.mrb[22].mxu0  ;;  %2753 = vmatmul.mubr.bf16.gmra.mrb[124].mxu1 %v1245_v46 }
 0x1e9   : > { %v5735_v52 = vpop.f32.mrb[23].mxu0  ;;  %v8195_v11 = vadd.f32 %v5842_v25, %v2187_v39  ;;  %3844 = vmatprep.mubr.bf16.mxu1 %v3072_v38  ;;  %v6779_v39 = vld [vmem:[#allocation13 + $0x88] sm:$0xff]   ;;  %v1339_v38 = vld [vmem:[#allocation2 + $0xca] sm:$0xff] }
 0x1ea   : > { %v5736_v36 = vadd.f32 %v5735_v52, %v5734_v53  ;;  %v2192_v35 = vadd.f32 %v5733_v55, %v8143_v16  ;;  %v6789_v55 = vld [vmem:[#allocation13 + $0x110] sm:$0xff]   ;;  %v1337_v52 = vld [vmem:[#allocation2 + $0xb2] sm:$0xff] }
 0x1eb   : > { %6518 = vmatmul.mubr.bf16.vlgmr.msra.gmra.mrb[128].mxu0 %v1359_v56  ;;  %v5843_v29 = vpop.f32.mrb[20].mxu1  ;;  %v8204_v56 = vpack.c.bf16 %v3033_v43, %v3032_v9  ;;  %v8213_v9 = vld [vmem:[#allocation3 + $0x30] sm:$0xff]  ;;  %v1363_v17 = vpack.c.bf16 %v1337_v52, %v1336_v59 }
 0x1ec   : > { %6238 = vmatpush3.bf16.msra.mxu0 %v6777_v27  ;;  %6521 = vmatprep.mubr.bf16.mxu0 %v1360_v5  ;;  %v5844_v20 = vpop.f32.mrb[21].mxu1  ;;  %v2195_v30 = vadd.f32 %v5736_v36, %v8143_v16  ;;  %v1338_v43 = vld [vmem:[#allocation2 + $0xc2] sm:$0xff]  ;;  %v8218_v2 = vpack.c.bf16 %v8213_v9, %v8208_v21 }
 0x1ed   : > { %6239 = vmatprep.subr.bf16.mxu0 %v6781_v23  ;;  %v5845_v50 = vadd.f32 %v5844_v20, %v5843_v29  ;;  %v5846_v44 = vpop.f32.mrb[22].mxu1  ;;  %v6780_v5 = vld [vmem:[#allocation13 + $0xd0] sm:$0xff]   ;;  %v6795_v36 = vld [vmem:[#allocation13 + $0x118] sm:$0xff]  }
 0x1ee   : > { %v5737_v63 = vpop.f32.mrb[24].mxu0  ;;  %v5847_v37 = vpop.f32.mrb[23].mxu1 }
 0x1ef   : > { %v5738_v40 = vpop.f32.mrb[25].mxu0  ;;  %v8206_v53 = vadd.f32 %v5845_v50, %v2192_v35  ;;  %v5848_v27 = vadd.f32 %v5847_v37, %v5846_v44  ;;  %v8235_v37 = vld [vmem:[#allocation3 + $0x50] sm:$0xff] }
 0x1f0   : > { %v5739_v0 = vadd.f32 %v5738_v40, %v5737_v63  ;;  %v5740_v3 = vpop.f32.mrb[26].mxu0  ;;  %6240 = vmatpush3.bf16.msra.mxu0 %v6783_v24  ;;  %3845 = vmatmul.mubr.bf16.vlgmr.msra.gmra.mrb[128].mxu1 %v3056_v14  ;;  %v1364_v63 = vpack.c.bf16 %v1339_v38, %v1338_v43  ;;  %v8225_v14 = vpack.c.bf16 %v3035_v58, %v3034_v8  ;;  %v1341_v8 = vld [vmem:[#allocation2 + $0xe2] sm:$0xff] }
 0x1f1   : > { %v5741_v7 = vpop.f32.mrb[27].mxu0  ;;  %6241 = vmatprep.subr.bf16.mxu0 %v6787_v31  ;;  %v8210_v13 = vadd.f32 %v5848_v27, %v2195_v30  ;;  %6198 = vmatpush3.bf16.msra.mxu1 %v6776_v51  ;;  %v6799_v30 = vld [vmem:[#allocation13 + $0x120] sm:$0xff]   ;;  %v6785_v51 = vld [vmem:[#allocation13 + $0x98] sm:$0xff]   ;;  %v1365_v43 = vpack.c.bf16 %v1341_v8, %v1340_v42  ;;  %v6810_v38 = vld [vmem:[#allocation13 + $0x170] sm:$0xff]  }
 0x1f2   : > { %v5742_v46 = vadd.f32 %v5741_v7, %v5740_v3  ;;  %3852 = vmatprep.mubr.bf16.mxu1 %v8204_v56  ;;  %6199 = vmatprep.subr.bf16.mxu1 %v6778_v62  ;;  %v2200_v23 = vadd.f32 %v5739_v0, %v8143_v16  ;;  %v6784_v3 = vld [vmem:[#allocation13 + $0xd8] sm:$0xff]   ;;  %v6804_v7 = vld [vmem:[#allocation13 + $0x168] sm:$0xff]  }
 0x1f3   : > { %6522 = vmatmul.mubr.bf16.gmra.mrb[132].mxu0 %v1361_v1  ;;  %v5849_v25 = vpop.f32.mrb[24].mxu1  ;;  %v6782_v1 = vld [vmem:[#allocation13 + $0x90] sm:$0xff]   ;;  %v1342_v62 = vld [vmem:[#allocation2 + $0xf2] sm:$0xff]  ;;  %v6817_v42 = vld [vmem:[#allocation13 + $0x138] sm:$0xff]  }
 0x1f4   : > { %6525 = vmatprep.mubr.bf16.mxu0 %v1362_v60  ;;  %6242 = vmatpush3.bf16.msra.mxu0 %v6789_v55  ;;  %v5850_v24 = vpop.f32.mrb[25].mxu1  ;;  %v2203_v35 = vadd.f32 %v5742_v46, %v8143_v16  ;;  %v1343_v46 = vld [vmem:[#allocation2 + $0xfa] sm:$0xff]  ;;  %v6786_v55 = vld [vmem:[#allocation13 + $0xe0] sm:$0xff]  }
 0x1f5   : > { %6243 = vmatprep.subr.bf16.mxu0 %v6793_v19  ;;  %6200 = vmatpush3.bf16.msra.mxu1 %v6779_v39  ;;  %v5851_v29 = vadd.f32 %v5850_v24, %v5849_v25  ;;  %v5852_v40 = vpop.f32.mrb[26].mxu1  ;;  %v6805_v39 = vld [vmem:[#allocation13 + $0x128] sm:$0xff]   ;;  %v1366_v25 = vpack.c.bf16 %v1343_v46, %v1342_v62  ;;  %v6788_v24 = vld [vmem:[#allocation13 + $0xa0] sm:$0xff]  }
 0x1f6   : > { %v5743_v6 = vpop.f32.mrb[28].mxu0  ;;  %v5853_v0 = vpop.f32.mrb[27].mxu1  ;;  %6201 = vmatprep.subr.bf16.mxu1 %v6780_v5 }
 0x1f7   : > { %v5744_v57 = vpop.f32.mrb[29].mxu0  ;;  %v8227_v50 = vadd.f32 %v5851_v29, %v2200_v23  ;;  %v5854_v44 = vadd.f32 %v5853_v0, %v5852_v40  ;;  %v6811_v40 = vld [vmem:[#allocation13 + $0x130] sm:$0xff]   ;;  %v6791_v0 = vld [vmem:[#allocation13 + $0xa8] sm:$0xff]  }
 0x1f8   : > { %v5745_v22 = vadd.f32 %v5744_v57, %v5743_v6  ;;  %v5746_v31 = vpop.f32.mrb[30].mxu0  ;;  %6244 = vmatpush3.bf16.msra.mxu0 %v6795_v36  ;;  %3853 = vmatmul.mubr.bf16.gmra.mrb[132].mxu1 %v8218_v2  ;;  %v8240_v6 = vpack.c.bf16 %v8235_v37, %v8230_v34 }
 0x1f9   : > { %v5747_v20 = vpop.f32.mrb[31].mxu0  ;;  %6245 = vmatprep.subr.bf16.mxu0 %v6798_v61  ;;  %v8232_v58 = vadd.f32 %v5854_v44, %v2203_v35  ;;  %6202 = vmatpush3.bf16.msra.mxu1 %v6782_v1  ;;  %v6790_v35 = vld [vmem:[#allocation13 + $0xe8] sm:$0xff]   ;;  %v1347_v44 = vld [vmem:[#allocation2 + $0x12a] sm:$0xff] }
 0x1fa   : > { %v5748_v60 = vadd.f32 %v5747_v20, %v5746_v31  ;;  %3860 = vmatprep.mubr.bf16.mxu1 %v8225_v14  ;;  %6203 = vmatprep.subr.bf16.mxu1 %v6784_v3  ;;  %v2208_v19 = vadd.f32 %v5745_v22, %v8143_v16  ;;  %v8247_v31 = vpack.c.bf16 %v3037_v49, %v3036_v41  ;;  %v6816_v3 = vld [vmem:[#allocation13 + $0x178] sm:$0xff]   ;;  %v1345_v41 = vld [vmem:[#allocation2 + $0x112] sm:$0xff] }
 0x1fb   : > { %6526 = vmatmul.mubr.bf16.gmra.mrb[136].mxu0 %v1363_v17  ;;  %v5855_v59 = vpop.f32.mrb[28].mxu1 }
 0x1fc   : > { %6529 = vmatprep.mubr.bf16.mxu0 %v1364_v63  ;;  %6246 = vmatpush3.bf16.msra.mxu0 %v6799_v30  ;;  %v5856_v5 = vpop.f32.mrb[29].mxu1  ;;  %v2211_v57 = vadd.f32 %v5748_v60, %v8143_v16  ;;  %v8257_v60 = vld [vmem:[#allocation3 + $0x70] sm:$0xff] }
 0x1fd   : > { %6247 = vmatprep.subr.bf16.mxu0 %v6804_v7  ;;  %6204 = vmatpush3.bf16.msra.mxu1 %v6785_v51  ;;  %v5857_v17 = vadd.f32 %v5856_v5, %v5855_v59  ;;  %v5858_v61 = vpop.f32.mrb[30].mxu1  ;;  %v1346_v30 = vld [vmem:[#allocation2 + $0x122] sm:$0xff] }
 0x1fe   : > { %v5749_v27 = vpop.f32.mrb[32].mxu0  ;;  %v5859_v63 = vpop.f32.mrb[31].mxu1  ;;  %6205 = vmatprep.subr.bf16.mxu1 %v6786_v55  ;;  %v6792_v51 = vld [vmem:[#allocation13 + $0xf0] sm:$0xff]   ;;  %v1367_v55 = vpack.c.bf16 %v1345_v41, %v1344_v28  ;;  %v6800_v28 = vld [vmem:[#allocation13 + $0x1c0] sm:$0xff]  }
 0x1ff   : > { %v5750_v52 = vpop.f32.mrb[33].mxu0  ;;  %v8249_v1 = vadd.f32 %v5857_v17, %v2208_v19  ;;  %v5860_v20 = vadd.f32 %v5859_v63, %v5858_v61  ;;  %v8264_v19 = vpack.c.bf16 %v8257_v60, %v8252_v48  ;;  %v6796_v61 = vld [vmem:[#allocation13 + $0xf8] sm:$0xff]  }
 0x200   : > { %v5751_v36 = vadd.f32 %v5750_v52, %v5749_v27  ;;  %v5752_v23 = vpop.f32.mrb[34].mxu0  ;;  %6248 = vmatpush3.bf16.msra.mxu0 %v6805_v39  ;;  %3861 = vmatmul.mubr.bf16.gmra.mrb[136].mxu1 %v8240_v6  ;;  %v8260_v27 = vld [vmem:[#allocation13 + $0x200] sm:$0xff]  }
 0x201   : > { %v5753_v22 = vpop.f32.mrb[35].mxu0  ;;  %6249 = vmatprep.subr.bf16.mxu0 %v6810_v38  ;;  %v8254_v49 = vadd.f32 %v5860_v20, %v2211_v57  ;;  %6206 = vmatpush3.bf16.msra.mxu1 %v6788_v24  ;;  %v3104_v57 = vpack.c.bf16 %v8208_v21, %v8193_v4  ;;  %v1349_v20 = vld [vmem:[#allocation2 + $0x142] sm:$0xff]  ;;  %v1350_v21 = vld [vmem:[#allocation2 + $0x152] sm:$0xff] }
 0x202   : > { %v5754_v29 = vadd.f32 %v5753_v22, %v5752_v23  ;;  %3868 = vmatprep.mubr.bf16.mxu1 %v8247_v31  ;;  %6207 = vmatprep.subr.bf16.mxu1 %v6790_v35  ;;  %v2216_v8 = vadd.f32 %v5751_v36, %v8143_v16  ;;  %v6794_v36 = vld [vmem:[#allocation13 + $0xb0] sm:$0xff]   ;;  %v6797_v35 = vld [vmem:[#allocation13 + $0xb8] sm:$0xff]  }
 0x203   : > { %6530 = vmatmul.mubr.bf16.gmra.mrb[140].mxu0 %v1365_v43  ;;  %v5861_v62 = vpop.f32.mrb[32].mxu1  ;;  %v1368_v43 = vpack.c.bf16 %v1347_v44, %v1346_v30  ;;  %v8275_v4 = vld [vmem:[#allocation3 + $0x12] sm:$0xff] }
 0x204   : > { %6533 = vmatprep.mubr.bf16.mxu0 %v1366_v25  ;;  %6250 = vmatpush3.bf16.msra.mxu0 %v6811_v40  ;;  %v5862_v39 = vpop.f32.mrb[33].mxu1  ;;  %v2219_v38 = vadd.f32 %v5754_v29, %v8143_v16  ;;  %v3080_v29 = vld [vmem:[#allocation3 + $0x2] sm:$0xff]  ;;  %v1348_v40 = vld [vmem:[#allocation2 + $0x13a] sm:$0xff] }
 0x205   : > { %6251 = vmatprep.subr.bf16.mxu0 %v6816_v3  ;;  %6208 = vmatpush3.bf16.msra.mxu1 %v6791_v0  ;;  %v5863_v5 = vadd.f32 %v5862_v39, %v5861_v62  ;;  %v5864_v23 = vpop.f32.mrb[34].mxu1  ;;  %v1351_v3 = vld [vmem:[#allocation2 + $0x15a] sm:$0xff] }
 0x206   : > { %v5755_v7 = vpop.f32.mrb[36].mxu0  ;;  %v5865_v17 = vpop.f32.mrb[35].mxu1  ;;  %6209 = vmatprep.subr.bf16.mxu1 %v6792_v51 }
 0x207   : > { %v5756_v46 = vpop.f32.mrb[37].mxu0  ;;  %v8269_v22 = vadd.f32 %v5863_v5, %v2216_v8  ;;  %v5866_v63 = vadd.f32 %v5865_v17, %v5864_v23  ;;  %v3088_v8 = vpack.c.bf16 %v8275_v4, %v3080_v29  ;;  %v3105_v23 = vpack.c.bf16 %v8230_v34, %v8213_v9  ;;  %v8286_v29 = vld [vmem:[#allocation3 + $0x22] sm:$0xff]  ;;  %v8288_v9 = vld [vmem:[#allocation3 + $0x32] sm:$0xff] }
 0x208   : > { %v5757_v59 = vadd.f32 %v5756_v46, %v5755_v7  ;;  %v5758_v52 = vpop.f32.mrb[38].mxu0  ;;  %6252 = vmatpush3.bf16.msra.mxu0 %v6817_v42  ;;  %3869 = vmatmul.mubr.bf16.gmra.mrb[140].mxu1 %v8264_v19  ;;  %v1369_v7 = vpack.c.bf16 %v1349_v20, %v1348_v40  ;;  %v6806_v34 = vld [vmem:[#allocation13 + $0x1d0] sm:$0xff]  }
 0x209   : > { %v5759_v25 = vpop.f32.mrb[39].mxu0  ;;  %6549 = vmatprep.subr.bf16.mxu0 %v8260_v27  ;;  %v8273_v0 = vadd.f32 %v5866_v63, %v2219_v38  ;;  %6210 = vmatpush3.bf16.msra.mxu1 %v6794_v36  ;;  %v6801_v38 = vld [vmem:[#allocation13 + $0x180] sm:$0xff]  }
 0x20a   : > { %v5760_v24 = vadd.f32 %v5759_v25, %v5758_v52  ;;  %3909 = vmatprep.mubr.bf16.mxu1 %v3104_v57  ;;  %6211 = vmatprep.subr.bf16.mxu1 %v6796_v61  ;;  %v2224_v30 = vadd.f32 %v5757_v59, %v8143_v16  ;;  %v6802_v25 = vld [vmem:[#allocation13 + $0x1c8] sm:$0xff]   ;;  %v1352_v61 = vld [vmem:[#allocation2 + $0x16a] sm:$0xff] }
 0x20b   : > { %6534 = vmatmul.mubr.bf16.gmra.mrb[144].mxu0 %v1367_v55  ;;  %v5867_v44 = vpop.f32.mrb[36].mxu1  ;;  %v1370_v55 = vpack.c.bf16 %v1351_v3, %v1350_v21  ;;  %v1353_v63 = vld [vmem:[#allocation2 + $0x172] sm:$0xff] }
 0x20c   : > { %6537 = vmatprep.mubr.bf16.mxu0 %v1368_v43  ;;  %v5868_v42 = vpop.f32.mrb[37].mxu1  ;;  %v2227_v39 = vadd.f32 %v5760_v24, %v8143_v16 }
 0x20d   : > { %6212 = vmatpush3.bf16.msra.mxu1 %v6797_v35  ;;  %v5869_v52 = vadd.f32 %v5868_v42, %v5867_v44  ;;  %v5870_v43 = vpop.f32.mrb[38].mxu1  ;;  %v6803_v35 = vld [vmem:[#allocation13 + $0x188] sm:$0xff]  }
 0x20e   : > { %v5761_v41 = vpop.f32.mrb[40].mxu0  ;;  %v5871_v59 = vpop.f32.mrb[39].mxu1  ;;  %6277 = vmatprep.subr.bf16.mxu1 %v6800_v28  ;;  %v1371_v28 = vpack.c.bf16 %v1353_v63, %v1352_v61  ;;  %v8308_v63 = vld [vmem:[#allocation3 + $0x80] sm:$0xff] }
 0x20f   : > { %v5762_v51 = vpop.f32.mrb[41].mxu0  ;;  %v8282_v57 = vadd.f32 %v5869_v52, %v2224_v30  ;;  %v5872_v17 = vadd.f32 %v5871_v59, %v5870_v43  ;;  %v8293_v30 = vpack.c.bf16 %v8288_v9, %v8286_v29  ;;  %v6808_v43 = vld [vmem:[#allocation13 + $0x1d8] sm:$0xff]  }
 0x210   : > { %v5763_v62 = vadd.f32 %v5762_v51, %v5761_v41  ;;  %v5764_v46 = vpop.f32.mrb[42].mxu0  ;;  %3910 = vmatmul.mubr.bf16.vlgmr.msra.gmra.mrb[144].mxu1 %v3088_v8  ;;  %v1357_v59 = vld [vmem:[#allocation2 + $0x1a2] sm:$0xff] }
 0x211   : > { %v5765_v5 = vpop.f32.mrb[43].mxu0  ;;  %v8284_v24 = vadd.f32 %v5872_v17, %v2227_v39  ;;  %6278 = vmatpush3.bf16.msra.mxu1 %v6801_v38  ;;  %3917 = vmatprep.mubr.bf16.mxu1 %v3105_v23  ;;  %v1356_v23 = vld [vmem:[#allocation2 + $0x19a] sm:$0xff]  ;;  %v6812_v17 = vld [vmem:[#allocation13 + $0x1e0] sm:$0xff]  }
 0x212   : > { %v5766_v36 = vadd.f32 %v5765_v5, %v5764_v46  ;;  %6279 = vmatprep.subr.bf16.mxu1 %v6802_v25  ;;  %v2232_v20 = vadd.f32 %v5763_v62, %v8143_v16  ;;  %v6807_v46 = vld [vmem:[#allocation13 + $0x190] sm:$0xff]   ;;  %v3106_v62 = vpack.c.bf16 %v8252_v48, %v8235_v37  ;;  %v6809_v25 = vld [vmem:[#allocation13 + $0x198] sm:$0xff]   ;;  %v8304_v37 = vld [vmem:[#allocation3 + $0x42] sm:$0xff] }
 0x213   : > { %6538 = vmatmul.mubr.bf16.gmra.mrb[148].mxu0 %v1369_v7  ;;  %v5873_v21 = vpop.f32.mrb[40].mxu1  ;;  %v8306_v48 = vld [vmem:[#allocation3 + $0x52] sm:$0xff] }
 0x214   : > { %6541 = vmatprep.mubr.bf16.mxu0 %v1370_v55  ;;  %v5874_v41 = vpop.f32.mrb[41].mxu1  ;;  %v2235_v7 = vadd.f32 %v5766_v36, %v8143_v16 }
 0x215   : > { %v5875_v42 = vadd.f32 %v5874_v41, %v5873_v21  ;;  %v5876_v8 = vpop.f32.mrb[42].mxu1  ;;  %6280 = vmatpush3.bf16.msra.mxu1 %v6803_v35  ;;  %v8313_v21 = vpack.c.bf16 %v8306_v48, %v8304_v37  ;;  %v3136_v41 = vpack.c.bf16 %v8286_v29, %v8275_v4  ;;  %v6815_v29 = vld [vmem:[#allocation13 + $0x1a8] sm:$0xff]  }
 0x216   : > { %v5767_v40 = vpop.f32.mrb[44].mxu0  ;;  %v5877_v39 = vpop.f32.mrb[43].mxu1  ;;  %6281 = vmatprep.subr.bf16.mxu1 %v6806_v34 }
 0x217   : > { %v5768_v3 = vpop.f32.mrb[45].mxu0  ;;  %v8298_v38 = vadd.f32 %v5875_v42, %v2232_v20  ;;  %v5878_v5 = vadd.f32 %v5877_v39, %v5876_v8  ;;  %v6813_v8 = vld [vmem:[#allocation13 + $0x1a0] sm:$0xff]   ;;  %v6814_v39 = vld [vmem:[#allocation13 + $0x1e8] sm:$0xff]  }
 0x218   : > { %v5769_v44 = vadd.f32 %v5768_v3, %v5767_v40  ;;  %v5770_v51 = vpop.f32.mrb[46].mxu0  ;;  %3918 = vmatmul.mubr.bf16.gmra.mrb[148].mxu1 %v8293_v30  ;;  %v1373_v40 = vpack.c.bf16 %v1357_v59, %v1356_v23  ;;  %v8327_v23 = vld [vmem:[#allocation3 + $0x72] sm:$0xff] }
 0x219   : > { %v5771_v55 = vpop.f32.mrb[47].mxu0  ;;  %v8302_v36 = vadd.f32 %v5878_v5, %v2235_v7  ;;  %6282 = vmatpush3.bf16.msra.mxu1 %v6807_v46  ;;  %3925 = vmatprep.mubr.bf16.mxu1 %v3106_v62  ;;  %v3107_v46 = vpack.c.bf16 %v8308_v63, %v8257_v60  ;;  %v6818_v60 = vld [vmem:[#allocation13 + $0x1f0] sm:$0xff]  }
 0x21a   : > { %v5772_v52 = vadd.f32 %v5771_v55, %v5770_v51  ;;  %6283 = vmatprep.subr.bf16.mxu1 %v6808_v43  ;;  %v2240_v35 = vadd.f32 %v5769_v44, %v8143_v16 }
 0x21b   : > { %6542 = vmatmul.mubr.bf16.gmra.mrb[152].mxu0 %v1371_v28  ;;  %v5879_v34 = vpop.f32.mrb[44].mxu1 }
 0x21c   : > { %6545 = vmatprep.mubr.bf16.mxu0 %v8168_v15  ;;  %v5880_v20 = vpop.f32.mrb[45].mxu1  ;;  %v2243_v51 = vadd.f32 %v5772_v52, %v8143_v16  ;;  %v8325_v52 = vld [vmem:[#allocation3 + $0x62] sm:$0xff] }
 0x21d   : > { %v5881_v7 = vadd.f32 %v5880_v20, %v5879_v34  ;;  %v5882_v42 = vpop.f32.mrb[46].mxu1  ;;  %6284 = vmatpush3.bf16.msra.mxu1 %v6809_v25  ;;  %v6904_v34 = vld [vmem:[#allocation3 + $0x21] sm:$0xff]  ;;  %v8332_v20 = vpack.c.bf16 %v8327_v23, %v8325_v52 }
 0x21e   : > { %v5773_v61 = vpop.f32.mrb[48].mxu0  ;;  %v5883_v55 = vpop.f32.mrb[47].mxu1  ;;  %6285 = vmatprep.subr.bf16.mxu1 %v6812_v17 }
 0x21f   : > { %v5774_v15 = vpop.f32.mrb[49].mxu0  ;;  %v8320_v43 = vadd.f32 %v5881_v7, %v2240_v35  ;;  %v5884_v5 = vadd.f32 %v5883_v55, %v5882_v42  ;;  %v6903_v35 = vld [vmem:[#allocation3 + $0x11] sm:$0xff] }
 0x220   : > { %v5775_v3 = vadd.f32 %v5774_v15, %v5773_v61  ;;  %v5776_v28 = vpop.f32.mrb[50].mxu0  ;;  %3926 = vmatmul.mubr.bf16.gmra.mrb[152].mxu1 %v8313_v21  ;;  %v3120_v15 = vpack.c.bf16 %v6904_v34, %v6903_v35  ;;  %v6820_v55 = vld [vmem:[#allocation13 + $0x1f8] sm:$0xff]  }
 0x221   : > { %v5777_v44 = vpop.f32.mrb[51].mxu0  ;;  %v8323_v4 = vadd.f32 %v5884_v5, %v2243_v51  ;;  %6286 = vmatpush3.bf16.msra.mxu1 %v6813_v8  ;;  %3933 = vmatprep.mubr.bf16.mxu1 %v3107_v46  ;;  %v6819_v8 = vld [vmem:[#allocation13 + $0x1b0] sm:$0xff]  }
 0x222   : > { %v5778_v62 = vadd.f32 %v5777_v44, %v5776_v28  ;;  %6287 = vmatprep.subr.bf16.mxu1 %v6814_v39  ;;  %v2248_v25 = vadd.f32 %v5775_v3, %v8143_v16  ;;  %v6823_v39 = vld [vmem:[#allocation13 + $0x208] sm:$0xff]  }
 0x223   : > { %6546 = vmatmul.mubr.bf16.gmra.mrb[156].mxu0 %v1373_v40  ;;  %v5885_v17 = vpop.f32.mrb[48].mxu1 }
 0x224   : > { %3974 = vmatprep.mubr.bf16.mxu0 %v3136_v41  ;;  %v5886_v40 = vpop.f32.mrb[49].mxu1  ;;  %v2251_v51 = vadd.f32 %v5778_v62, %v8143_v16 }
 0x225   : > { %v5887_v7 = vadd.f32 %v5886_v40, %v5885_v17  ;;  %v5888_v42 = vpop.f32.mrb[50].mxu1  ;;  %6288 = vmatpush3.bf16.msra.mxu1 %v6815_v29  ;;  %v6821_v29 = vld [vmem:[#allocation13 + $0x1b8] sm:$0xff]  }
 0x226   : > { %v5779_v59 = vpop.f32.mrb[52].mxu0  ;;  %v5889_v3 = vpop.f32.mrb[51].mxu1  ;;  %6289 = vmatprep.subr.bf16.mxu1 %v6818_v60  ;;  %v6824_v60 = vld [vmem:[#allocation13 + $0x210] sm:$0xff]  }
 0x227   : > { %v5780_v61 = vpop.f32.mrb[53].mxu0  ;;  %v8335_v5 = vadd.f32 %v5887_v7, %v2248_v25  ;;  %v5890_v35 = vadd.f32 %v5889_v3, %v5888_v42  ;;  %v3138_v3 = vpack.c.bf16 %v8325_v52, %v8306_v48  ;;  %v6907_v48 = vld [vmem:[#allocation3 + $0x51] sm:$0xff]  ;;  %v6908_v52 = vld [vmem:[#allocation3 + $0x61] sm:$0xff] }
 0x228   : > { %v5781_v28 = vadd.f32 %v5780_v61, %v5779_v59  ;;  %v5782_v41 = vpop.f32.mrb[54].mxu0  ;;  %v3137_v59 = vpack.c.bf16 %v8304_v37, %v8288_v9  ;;  %3934 = vmatmul.mubr.bf16.gmra.mrb[156].mxu1 %v8332_v20  ;;  %v6905_v9 = vld [vmem:[#allocation3 + $0x31] sm:$0xff]  ;;  %v6906_v37 = vld [vmem:[#allocation3 + $0x41] sm:$0xff] }
 0x229   : > { %v5783_v44 = vpop.f32.mrb[55].mxu0  ;;  %v8341_v62 = vadd.f32 %v5890_v35, %v2251_v51  ;;  %6290 = vmatpush3.bf16.msra.mxu1 %v6819_v8  ;;  %4039 = vmatprep.mubr.bf16.mxu1 %v8204_v56  ;;  %v6825_v8 = vld [vmem:[#allocation13 + $0x218] sm:$0xff]  }
 0x22a   : > { %v5784_v46 = vadd.f32 %v5783_v44, %v5782_v41  ;;  %6291 = vmatprep.subr.bf16.mxu1 %v6820_v55  ;;  %v2256_v25 = vadd.f32 %v5781_v28, %v8143_v16 }
 0x22b   : > { %3975 = vmatmul.mubr.bf16.vlgmr.msra.gmra.mrb[160].mxu0 %v3120_v15  ;;  %v5891_v61 = vpop.f32.mrb[52].mxu1  ;;  %v3121_v15 = vpack.c.bf16 %v6906_v37, %v6905_v9 }
 0x22c   : > { %6550 = vmatpush3.bf16.msra.mxu0 %v8260_v27  ;;  %3982 = vmatprep.mubr.bf16.mxu0 %v3137_v59  ;;  %v5892_v40 = vpop.f32.mrb[53].mxu1  ;;  %v2259_v51 = vadd.f32 %v5784_v46, %v8143_v16  ;;  %v6826_v46 = vld [vmem:[#allocation13 + $0x220] sm:$0xff]  }
 0x22d   : > { %6551 = vmatprep.subr.bf16.mxu0 %v6823_v39  ;;  %v5893_v7 = vadd.f32 %v5892_v40, %v5891_v61  ;;  %v5894_v56 = vpop.f32.mrb[54].mxu1  ;;  %6292 = vmatpush3.bf16.msra.mxu1 %v6821_v29 }
 0x22e   : > { %v5785_v17 = vpop.f32.mrb[56].mxu0  ;;  %v5895_v44 = vpop.f32.mrb[55].mxu1 }
 0x22f   : > { %v5786_v34 = vpop.f32.mrb[57].mxu0  ;;  %v8348_v55 = vadd.f32 %v5893_v7, %v2256_v25  ;;  %v5896_v35 = vadd.f32 %v5895_v44, %v5894_v56  ;;  %v3122_v25 = vpack.c.bf16 %v6908_v52, %v6907_v48  ;;  %v6828_v44 = vld [vmem:[#allocation13 + $0x230] sm:$0xff]  }
 0x230   : > { %v5787_v27 = vadd.f32 %v5786_v34, %v5785_v17  ;;  %v5788_v41 = vpop.f32.mrb[58].mxu0  ;;  %6552 = vmatpush3.bf16.msra.mxu0 %v6823_v39  ;;  %4040 = vmatmul.mubr.bf16.vlgmr.msra.gmra.mrb[160].mxu1 %v8218_v2  ;;  %v8355_v34 = vld [vmem:[#allocation3 + $0x82] sm:$0xff] }
 0x231   : > { %v5789_v42 = vpop.f32.mrb[59].mxu0  ;;  %6553 = vmatprep.subr.bf16.mxu0 %v6824_v60  ;;  %v8351_v39 = vadd.f32 %v5896_v35, %v2259_v51  ;;  %4047 = vmatprep.mubr.bf16.mxu1 %v8225_v14  ;;  %v3139_v7 = vpack.c.bf16 %v8355_v34, %v8327_v23 }
 0x232   : > { %v5790_v28 = vadd.f32 %v5789_v42, %v5788_v41  ;;  %v2264_v29 = vadd.f32 %v5787_v27, %v8143_v16  ;;  %v6827_v41 = vld [vmem:[#allocation13 + $0x228] sm:$0xff]  }
 0x233   : > { %3983 = vmatmul.mubr.bf16.gmra.mrb[164].mxu0 %v3121_v15  ;;  %v5897_v17 = vpop.f32.mrb[56].mxu1 }
 0x234   : > { %6554 = vmatpush3.bf16.msra.mxu0 %v6824_v60  ;;  %3990 = vmatprep.mubr.bf16.mxu0 %v3138_v3  ;;  %v5898_v9 = vpop.f32.mrb[57].mxu1  ;;  %v2267_v37 = vadd.f32 %v5790_v28, %v8143_v16  ;;  %v3168_v3 = vld [vmem:[#allocation3 + $0x91] sm:$0xff] }
 0x235   : > { %6555 = vmatprep.subr.bf16.mxu0 %v6825_v8  ;;  %v5899_v14 = vadd.f32 %v5898_v9, %v5897_v17  ;;  %v5900_v15 = vpop.f32.mrb[58].mxu1  ;;  %v6910_v17 = vld [vmem:[#allocation3 + $0x81] sm:$0xff] }
 0x236   : > { %v5791_v59 = vpop.f32.mrb[60].mxu0  ;;  %v5901_v51 = vpop.f32.mrb[59].mxu1 }
 0x237   : > { %v5792_v61 = vpop.f32.mrb[61].mxu0  ;;  %v8360_v56 = vadd.f32 %v5899_v14, %v2264_v29  ;;  %v5902_v42 = vadd.f32 %v5901_v51, %v5900_v15  ;;  %v6909_v29 = vld [vmem:[#allocation3 + $0x71] sm:$0xff] }
 0x238   : > { %v5793_v2 = vadd.f32 %v5792_v61, %v5791_v59  ;;  %v5794_v60 = vpop.f32.mrb[62].mxu0  ;;  %6556 = vmatpush3.bf16.msra.mxu0 %v6825_v8  ;;  %4048 = vmatmul.mubr.bf16.gmra.mrb[164].mxu1 %v8240_v6  ;;  %v3123_v61 = vpack.c.bf16 %v6910_v17, %v6909_v29 }
 0x239   : > { %v5795_v40 = vpop.f32.mrb[63].mxu0  ;;  %6557 = vmatprep.subr.bf16.mxu0 %v6826_v46  ;;  %v8363_v8 = vadd.f32 %v5902_v42, %v2267_v37  ;;  %4055 = vmatprep.mubr.bf16.mxu1 %v8247_v31  ;;  %v6911_v31 = vld [vmem:[%s8802_s27] ss:$0 sm:$0xff]  ;;  %v3172_v37 = vpack.c.bf16 %v3168_v3, %v6910_v17 }
 0x23a   : > { %v5796_v27 = vadd.f32 %v5795_v40, %v5794_v60  ;;  %v2272_v35 = vadd.f32 %v5793_v2, %v8143_v16  ;;  %v6829_v16 = vld [vmem:[#allocation13 + $0x238] sm:$0xff]  }
 0x23b   : > { %3991 = vmatmul.mubr.bf16.gmra.mrb[168].mxu0 %v3122_v25  ;;  %v5903_v59 = vpop.f32.mrb[60].mxu1 }
 0x23c   : > { %6558 = vmatpush3.bf16.msra.mxu0 %v6826_v46  ;;  %3998 = vmatprep.mubr.bf16.mxu0 %v3139_v7  ;;  %v5904_v48 = vpop.f32.mrb[61].mxu1  ;;  %v2275_v46 = vadd.f32 %v6911_v31, %v5796_v27  ;;  %v3152_v7 = vld [vmem:[#allocation3 + $0x90] sm:$0xff] }
 0x23d   : > { %6559 = vmatprep.subr.bf16.mxu0 %v6827_v41  ;;  %v5905_v25 = vadd.f32 %v5904_v48, %v5903_v59  ;;  %v5906_v9 = vpop.f32.mrb[62].mxu1 }
 0x23e   : > { %v5925_v28 = vpop.f32.mrb[64].mxu0  ;;  %v5907_v2 = vpop.f32.mrb[63].mxu1 }
 0x23f   : > { %v5926_v23 = vpop.f32.mrb[65].mxu0  ;;  %v8371_v40 = vadd.f32 %v5905_v25, %v2272_v35  ;;  %v5908_v51 = vadd.f32 %v5907_v2, %v5906_v9  ;;  %v3156_v35 = vpack.c.bf16 %v3152_v7, %v8308_v63  ;;  %v3184_v63 = vld [vmem:[#allocation3 + $0x92] sm:$0xff] }
 0x240   : > { %v5927_v52 = vadd.f32 %v5926_v23, %v5925_v28  ;;  %v5928_v6 = vpop.f32.mrb[66].mxu0  ;;  %6560 = vmatpush3.bf16.msra.mxu0 %v6827_v41  ;;  %4056 = vmatmul.mubr.bf16.gmra.mrb[168].mxu1 %v8264_v19  ;;  %v3188_v9 = vpack.c.bf16 %v3184_v63, %v8355_v34 }
 0x241   : > { %v5929_v60 = vpop.f32.mrb[67].mxu0  ;;  %6561 = vmatprep.subr.bf16.mxu0 %v6828_v44  ;;  %v8375_v27 = vadd.f32 %v5908_v51, %v2275_v46  ;;  %4063 = vmatprep.mubr.bf16.mxu1 %v3172_v37 }
 0x242   : > { %v2474_v14 = vadd.f32 %v5927_v52, %v8149_v45  ;;  %v5930_v15 = vadd.f32 %v5929_v60, %v5928_v6 }
 0x243   : > { %3999 = vmatmul.mubr.bf16.gmra.mrb[172].mxu0 %v3123_v61  ;;  %v6037_v28 = vpop.f32.mrb[64].mxu1 }
 0x244   : > { %v2477_v41 = vadd.f32 %v5930_v15, %v8154_v18  ;;  %6562 = vmatpush3.bf16.msra.mxu0 %v6828_v44  ;;  %6565 = vmatprep.mubr.bf16.mxu0 %v8293_v30  ;;  %v6038_v3 = vpop.f32.mrb[65].mxu1 }
 0x245   : > { %6563 = vmatprep.subr.bf16.mxu0 %v6829_v16  ;;  %v6039_v19 = vadd.f32 %v6038_v3, %v6037_v28  ;;  %v6040_v29 = vpop.f32.mrb[66].mxu1 }
 0x246   : > { %v5931_v42 = vpop.f32.mrb[68].mxu0  ;;  %v6041_v44 = vpop.f32.mrb[67].mxu1 }
 0x247   : > { %v5932_v45 = vpop.f32.mrb[69].mxu0  ;;  %v6042_v48 = vadd.f32 %v6041_v44, %v6040_v29  ;;  %v8381_v52 = vadd.f32 %v6039_v19, %v2474_v14 }
 0x248   : > { %v5933_v59 = vadd.f32 %v5932_v45, %v5931_v42  ;;  %v5934_v23 = vpop.f32.mrb[70].mxu0  ;;  %6564 = vmatpush3.bf16.msra.mxu0 %v6829_v16  ;;  %4064 = vmatmul.mubr.bf16.gmra.mrb[172].mxu1 %v3156_v35 }
 0x249   : > { %v5935_v18 = vpop.f32.mrb[71].mxu0  ;;  %v8385_v6 = vadd.f32 %v6042_v48, %v2477_v41 }
 0x24a   : > { %v2482_v17 = vadd.f32 %v5933_v59, %v8159_v54  ;;  %v5936_v61 = vadd.f32 %v5935_v18, %v5934_v23 }
 0x24b   : > { %6566 = vmatmul.mubr.bf16.vlgmr.msra.gmra.mrb[176].mxu0 %v8313_v21  ;;  %v6043_v46 = vpop.f32.mrb[68].mxu1 }
 0x24c   : > { %v2485_v30 = vadd.f32 %v5936_v61, %v8164_v32  ;;  %6569 = vmatprep.mubr.bf16.mxu0 %v8332_v20  ;;  %v6044_v54 = vpop.f32.mrb[69].mxu1 }
 0x24d   : > { %v6045_v16 = vadd.f32 %v6044_v54, %v6043_v46  ;;  %v6046_v21 = vpop.f32.mrb[70].mxu1 }
 0x24e   : > { %v5937_v31 = vpop.f32.mrb[72].mxu0  ;;  %v6047_v14 = vpop.f32.mrb[71].mxu1 }
 0x24f   : > { %v5938_v25 = vpop.f32.mrb[73].mxu0  ;;  %v6048_v51 = vadd.f32 %v6047_v14, %v6046_v21  ;;  %v8389_v20 = vadd.f32 %v6045_v16, %v2482_v17 }
 0x250   : > { %v5939_v60 = vadd.f32 %v5938_v25, %v5937_v31  ;;  %v5940_v37 = vpop.f32.mrb[74].mxu0 }
 0x251   : > { %v5941_v2 = vpop.f32.mrb[75].mxu0  ;;  %v8392_v7 = vadd.f32 %v6048_v51, %v2485_v30 }
 0x252   : > { %v2490_v15 = vadd.f32 %v5939_v60, %v8171_v33  ;;  %v5942_v32 = vadd.f32 %v5941_v2, %v5940_v37 }
 0x253   : > { %6570 = vmatmul.mubr.bf16.gmra.mrb[180].mxu0 %v3188_v9  ;;  %v6049_v34 = vpop.f32.mrb[72].mxu1 }
 0x254   : > { %v2493_v41 = vadd.f32 %v5942_v32, %v8176_v47  ;;  %v6050_v45 = vpop.f32.mrb[73].mxu1 }
 0x255   : > { %v6051_v59 = vadd.f32 %v6050_v45, %v6049_v34  ;;  %v6052_v23 = vpop.f32.mrb[74].mxu1 }
 0x256   : > { %v5943_v42 = vpop.f32.mrb[76].mxu0  ;;  %v6053_v29 = vpop.f32.mrb[75].mxu1 }
 0x257   : > { %v5944_v28 = vpop.f32.mrb[77].mxu0  ;;  %v6054_v44 = vadd.f32 %v6053_v29, %v6052_v23  ;;  %v8395_v17 = vadd.f32 %v6051_v59, %v2490_v15 }
 0x258   : > { %v5945_v3 = vadd.f32 %v5944_v28, %v5943_v42  ;;  %v5946_v35 = vpop.f32.mrb[78].mxu0 }
 0x259   : > { %v5947_v19 = vpop.f32.mrb[79].mxu0  ;;  %v8398_v61 = vadd.f32 %v6054_v44, %v2493_v41 }
 0x25a   : > { %v2498_v33 = vadd.f32 %v5945_v3, %v8181_v12  ;;  %v5948_v18 = vadd.f32 %v5947_v19, %v5946_v35 }
 0x25b   : > { %v6055_v30 = vpop.f32.mrb[76].mxu1 }
 0x25c   : > { %v2501_v47 = vadd.f32 %v5948_v18, %v8185_v26  ;;  %v6056_v31 = vpop.f32.mrb[77].mxu1 }
 0x25d   : > { %v6057_v9 = vadd.f32 %v6056_v31, %v6055_v30  ;;  %v6058_v54 = vpop.f32.mrb[78].mxu1 }
 0x25e   : > { %v5949_v48 = vpop.f32.mrb[80].mxu0  ;;  %v6059_v37 = vpop.f32.mrb[79].mxu1 }
 0x25f   : > { %v5950_v63 = vpop.f32.mrb[81].mxu0  ;;  %v6060_v21 = vadd.f32 %v6059_v37, %v6058_v54  ;;  %v8401_v2 = vadd.f32 %v6057_v9, %v2498_v33 }
 0x260   : > { %v5951_v46 = vadd.f32 %v5950_v63, %v5949_v48  ;;  %v5952_v25 = vpop.f32.mrb[82].mxu0 }
 0x261   : > { %v5953_v60 = vpop.f32.mrb[83].mxu0  ;;  %v8404_v14 = vadd.f32 %v6060_v21, %v2501_v47 }
 0x262   : > { %v2506_v12 = vadd.f32 %v5951_v46, %v8191_v10  ;;  %v5954_v16 = vadd.f32 %v5953_v60, %v5952_v25 }
 0x263   : > { %v6061_v32 = vpop.f32.mrb[80].mxu1 }
 0x264   : > { %v2509_v26 = vadd.f32 %v5954_v16, %v8195_v11  ;;  %v6062_v41 = vpop.f32.mrb[81].mxu1 }
 0x265   : > { %v6063_v28 = vadd.f32 %v6062_v41, %v6061_v32  ;;  %v6064_v45 = vpop.f32.mrb[82].mxu1 }
 0x266   : > { %v5955_v15 = vpop.f32.mrb[84].mxu0  ;;  %v6065_v35 = vpop.f32.mrb[83].mxu1 }
 0x267   : > { %v5956_v51 = vpop.f32.mrb[85].mxu0  ;;  %v6066_v23 = vadd.f32 %v6065_v35, %v6064_v45  ;;  %v8407_v19 = vadd.f32 %v6063_v28, %v2506_v12 }
 0x268   : > { %v5957_v42 = vadd.f32 %v5956_v51, %v5955_v15  ;;  %v5958_v34 = vpop.f32.mrb[86].mxu0 }
 0x269   : > { %v5959_v3 = vpop.f32.mrb[87].mxu0  ;;  %v8410_v29 = vadd.f32 %v6066_v23, %v2509_v26 }
 0x26a   : > { %v2514_v10 = vadd.f32 %v5957_v42, %v8206_v53  ;;  %v5960_v59 = vadd.f32 %v5959_v3, %v5958_v34 }
 0x26b   : > { %v6067_v18 = vpop.f32.mrb[84].mxu1 }
 0x26c   : > { %v2517_v11 = vadd.f32 %v5960_v59, %v8210_v13  ;;  %v6068_v47 = vpop.f32.mrb[85].mxu1 }
 0x26d   : > { %v6069_v63 = vadd.f32 %v6068_v47, %v6067_v18  ;;  %v6070_v31 = vpop.f32.mrb[86].mxu1 }
 0x26e   : > { %v5961_v33 = vpop.f32.mrb[88].mxu0  ;;  %v6071_v25 = vpop.f32.mrb[87].mxu1 }
 0x26f   : > { %v5962_v44 = vpop.f32.mrb[89].mxu0  ;;  %v6072_v54 = vadd.f32 %v6071_v25, %v6070_v31  ;;  %v8413_v60 = vadd.f32 %v6069_v63, %v2514_v10 }
 0x270   : > { %v5963_v48 = vadd.f32 %v5962_v44, %v5961_v33  ;;  %v5964_v30 = vpop.f32.mrb[90].mxu0 }
 0x271   : > { %v5965_v46 = vpop.f32.mrb[91].mxu0  ;;  %v8416_v37 = vadd.f32 %v6072_v54, %v2517_v11 }
 0x272   : > { %v2522_v53 = vadd.f32 %v5963_v48, %v8227_v50  ;;  %v5966_v9 = vadd.f32 %v5965_v46, %v5964_v30 }
 0x273   : > { %v6073_v16 = vpop.f32.mrb[88].mxu1 }
 0x274   : > { %v2525_v13 = vadd.f32 %v5966_v9, %v8232_v58  ;;  %v6074_v26 = vpop.f32.mrb[89].mxu1 }
 0x275   : > { %v6075_v51 = vadd.f32 %v6074_v26, %v6073_v16  ;;  %v6076_v41 = vpop.f32.mrb[90].mxu1 }
 0x276   : > { %v5967_v12 = vpop.f32.mrb[92].mxu0  ;;  %v6077_v34 = vpop.f32.mrb[91].mxu1 }
 0x277   : > { %v5968_v21 = vpop.f32.mrb[93].mxu0  ;;  %v6078_v45 = vadd.f32 %v6077_v34, %v6076_v41  ;;  %v8419_v3 = vadd.f32 %v6075_v51, %v2522_v53 }
 0x278   : > { %v5969_v15 = vadd.f32 %v5968_v21, %v5967_v12  ;;  %v5970_v32 = vpop.f32.mrb[94].mxu0 }
 0x279   : > { %v5971_v42 = vpop.f32.mrb[95].mxu0  ;;  %v8422_v35 = vadd.f32 %v6078_v45, %v2525_v13 }
 0x27a   : > { %v2530_v50 = vadd.f32 %v5969_v15, %v8249_v1  ;;  %v5972_v28 = vadd.f32 %v5971_v42, %v5970_v32 }
 0x27b   : > { %v6079_v59 = vpop.f32.mrb[92].mxu1 }
 0x27c   : > { %v2533_v58 = vadd.f32 %v5972_v28, %v8254_v49  ;;  %v6080_v11 = vpop.f32.mrb[93].mxu1 }
 0x27d   : > { %v6081_v44 = vadd.f32 %v6080_v11, %v6079_v59  ;;  %v6082_v47 = vpop.f32.mrb[94].mxu1 }
 0x27e   : > { %v5973_v10 = vpop.f32.mrb[96].mxu0  ;;  %v6083_v30 = vpop.f32.mrb[95].mxu1 }
 0x27f   : > { %v5974_v23 = vpop.f32.mrb[97].mxu0  ;;  %v6084_v31 = vadd.f32 %v6083_v30, %v6082_v47  ;;  %v8425_v46 = vadd.f32 %v6081_v44, %v2530_v50 }
 0x280   : > { %v5975_v33 = vadd.f32 %v5974_v23, %v5973_v10  ;;  %v5976_v18 = vpop.f32.mrb[98].mxu0 }
 0x281   : > { %v5977_v48 = vpop.f32.mrb[99].mxu0  ;;  %v8428_v25 = vadd.f32 %v6084_v31, %v2533_v58 }
 0x282   : > { %v2538_v1 = vadd.f32 %v5975_v33, %v8269_v22  ;;  %v5978_v63 = vadd.f32 %v5977_v48, %v5976_v18 }
 0x283   : > { %v6085_v9 = vpop.f32.mrb[96].mxu1 }
 0x284   : > { %v2541_v49 = vadd.f32 %v5978_v63, %v8273_v0  ;;  %v6086_v13 = vpop.f32.mrb[97].mxu1 }
 0x285   : > { %v6087_v21 = vadd.f32 %v6086_v13, %v6085_v9  ;;  %v6088_v26 = vpop.f32.mrb[98].mxu1 }
 0x286   : > { %v5979_v53 = vpop.f32.mrb[100].mxu0  ;;  %v6089_v32 = vpop.f32.mrb[99].mxu1 }
 0x287   : > { %v5980_v54 = vpop.f32.mrb[101].mxu0  ;;  %v6090_v41 = vadd.f32 %v6089_v32, %v6088_v26  ;;  %v8431_v42 = vadd.f32 %v6087_v21, %v2538_v1  ;;  %v6830_v32 = vld [vmem:[#allocation15 + $0x40] sm:$0xff]  }
 0x288   : > { %v5981_v12 = vadd.f32 %v5980_v54, %v5979_v53  ;;  %v5982_v16 = vpop.f32.mrb[102].mxu0  ;;  %6329 = vmatprep.subr.bf16.mxu1 %v6830_v32 }
 0x289   : > { %v5983_v15 = vpop.f32.mrb[103].mxu0  ;;  %v8434_v34 = vadd.f32 %v6090_v41, %v2541_v49 }
 0x28a   : > { %v2546_v22 = vadd.f32 %v5981_v12, %v8282_v57  ;;  %v5984_v51 = vadd.f32 %v5983_v15, %v5982_v16 }
 0x28b   : > { %v6091_v28 = vpop.f32.mrb[100].mxu1 }
 0x28c   : > { %v2549_v0 = vadd.f32 %v5984_v51, %v8284_v24  ;;  %v6092_v58 = vpop.f32.mrb[101].mxu1 }
 0x28d   : > { %v6093_v23 = vadd.f32 %v6092_v58, %v6091_v28  ;;  %v6094_v11 = vpop.f32.mrb[102].mxu1  ;;  %v6834_v58 = vld [vmem:[#allocation15 + $0x48] sm:$0xff]  }
 0x28e   : > { %v5985_v50 = vpop.f32.mrb[104].mxu0  ;;  %v6095_v18 = vpop.f32.mrb[103].mxu1 }
 0x28f   : > { %v5986_v45 = vpop.f32.mrb[105].mxu0  ;;  %v6096_v47 = vadd.f32 %v6095_v18, %v6094_v11  ;;  %v8437_v48 = vadd.f32 %v6093_v23, %v2546_v22  ;;  %v6832_v22 = vld [vmem:[#allocation15 + $0xc0] sm:$0xff]   ;;  %v6835_v23 = vld [vmem:[#allocation15 + $0x8] sm:$0xff]  }
 0x290   : > { %v5987_v10 = vadd.f32 %v5986_v45, %v5985_v50  ;;  %v5988_v59 = vpop.f32.mrb[106].mxu0  ;;  %6369 = vmatprep.subr.bf16.mxu0 %v6832_v22  ;;  %v6833_v45 = vld [vmem:[#allocation15 + $0x80] sm:$0xff]  }
 0x291   : > { %v5989_v33 = vpop.f32.mrb[107].mxu0  ;;  %v8440_v30 = vadd.f32 %v6096_v47, %v2549_v0  ;;  %6370 = vmatpush3.bf16.msra.mxu0 %v6833_v45  ;;  %v6836_v47 = vld [vmem:[#allocation15 + $0xc8] sm:$0xff]   ;;  %v6844_v45 = vld [vmem:[#allocation15 + $0xd8] sm:$0xff]  }
 0x292   : > { %v2554_v57 = vadd.f32 %v5987_v10, %v8298_v38  ;;  %v5990_v44 = vadd.f32 %v5989_v33, %v5988_v59  ;;  %6371 = vmatprep.subr.bf16.mxu0 %v6836_v47  ;;  %v6849_v47 = vld [vmem:[#allocation15 + $0xa0] sm:$0xff]  }
 0x293   : > { %v6097_v63 = vpop.f32.mrb[104].mxu1 }
 0x294   : > { %v2557_v24 = vadd.f32 %v5990_v44, %v8302_v36  ;;  %v6098_v49 = vpop.f32.mrb[105].mxu1  ;;  %v6831_v36 = vld [vmem:[#allocation15] sm:$0xff]  }
 0x295   : > { %v6099_v54 = vadd.f32 %v6098_v49, %v6097_v63  ;;  %v6100_v13 = vpop.f32.mrb[106].mxu1  ;;  %6330 = vmatpush3.bf16.msra.mxu1 %v6831_v36  ;;  %v6837_v63 = vld [vmem:[#allocation15 + $0x88] sm:$0xff]   ;;  %v6843_v36 = vld [vmem:[#allocation15 + $0x18] sm:$0xff]  }
 0x296   : > { %v5991_v1 = vpop.f32.mrb[108].mxu0  ;;  %v6101_v16 = vpop.f32.mrb[107].mxu1  ;;  %6331 = vmatprep.subr.bf16.mxu1 %v6834_v58  ;;  %6372 = vmatpush3.bf16.msra.mxu0 %v6837_v63 }
 0x297   : > { %v5992_v31 = vpop.f32.mrb[109].mxu0  ;;  %v6102_v26 = vadd.f32 %v6101_v16, %v6100_v13  ;;  %v8443_v15 = vadd.f32 %v6099_v54, %v2554_v57  ;;  %v6840_v13 = vld [vmem:[#allocation15 + $0xd0] sm:$0xff]  }
 0x298   : > { %v5993_v53 = vadd.f32 %v5992_v31, %v5991_v1  ;;  %v5994_v9 = vpop.f32.mrb[110].mxu0  ;;  %v6838_v31 = vld [vmem:[#allocation15 + $0x50] sm:$0xff]   ;;  %6373 = vmatprep.subr.bf16.mxu0 %v6840_v13 }
 0x299   : > { %v5995_v12 = vpop.f32.mrb[111].mxu0  ;;  %v8446_v41 = vadd.f32 %v6102_v26, %v2557_v24  ;;  %6332 = vmatpush3.bf16.msra.mxu1 %v6835_v23  ;;  %v6841_v16 = vld [vmem:[#allocation15 + $0x90] sm:$0xff]  }
 0x29a   : > { %v2562_v38 = vadd.f32 %v5993_v53, %v8320_v43  ;;  %v5996_v21 = vadd.f32 %v5995_v12, %v5994_v9  ;;  %v6839_v53 = vld [vmem:[#allocation15 + $0x10] sm:$0xff]   ;;  %6333 = vmatprep.subr.bf16.mxu1 %v6838_v31  ;;  %6374 = vmatpush3.bf16.msra.mxu0 %v6841_v16  ;;  %v6852_v16 = vld [vmem:[#allocation15 + $0xe8] sm:$0xff]  }
 0x29b   : > { %v6103_v50 = vpop.f32.mrb[108].mxu1  ;;  %6375 = vmatprep.subr.bf16.mxu0 %v6844_v45  ;;  %v6859_v45 = vld [vmem:[#allocation15 + $0x38] sm:$0xff]  }
 0x29c   : > { %v2565_v51 = vadd.f32 %v5996_v21, %v8323_v4  ;;  %v6104_v43 = vpop.f32.mrb[109].mxu1  ;;  %v6842_v21 = vld [vmem:[#allocation15 + $0x58] sm:$0xff]  }
 0x29d   : > { %v6105_v11 = vadd.f32 %v6104_v43, %v6103_v50  ;;  %v6106_v33 = vpop.f32.mrb[110].mxu1  ;;  %6334 = vmatpush3.bf16.msra.mxu1 %v6839_v53  ;;  %v6851_v53 = vld [vmem:[#allocation15 + $0x28] sm:$0xff]  }
 0x29e   : > { %v5997_v0 = vpop.f32.mrb[112].mxu0  ;;  %v6107_v4 = vpop.f32.mrb[111].mxu1  ;;  %6335 = vmatprep.subr.bf16.mxu1 %v6842_v21 }
 0x29f   : > { %v5998_v28 = vpop.f32.mrb[113].mxu0  ;;  %v6108_v24 = vadd.f32 %v6107_v4, %v6106_v33  ;;  %v8449_v1 = vadd.f32 %v6105_v11, %v2562_v38  ;;  %v6847_v11 = vld [vmem:[#allocation15 + $0x20] sm:$0xff]  }
 0x2a0   : > { %v5999_v10 = vadd.f32 %v5998_v28, %v5997_v0  ;;  %v6000_v59 = vpop.f32.mrb[114].mxu0  ;;  %v6848_v4 = vld [vmem:[#allocation15 + $0xe0] sm:$0xff]  }
 0x2a1   : > { %v6001_v18 = vpop.f32.mrb[115].mxu0  ;;  %v8452_v9 = vadd.f32 %v6108_v24, %v2565_v51  ;;  %6336 = vmatpush3.bf16.msra.mxu1 %v6843_v36  ;;  %v6850_v24 = vld [vmem:[#allocation15 + $0x68] sm:$0xff]  }
 0x2a2   : > { %v2570_v57 = vadd.f32 %v5999_v10, %v8335_v5  ;;  %v6002_v44 = vadd.f32 %v6001_v18, %v6000_v59  ;;  %v6845_v10 = vld [vmem:[#allocation15 + $0x98] sm:$0xff]   ;;  %v6846_v59 = vld [vmem:[#allocation15 + $0x60] sm:$0xff]  }
 0x2a3   : > { %v6109_v5 = vpop.f32.mrb[112].mxu1  ;;  %6376 = vmatpush3.bf16.msra.mxu0 %v6845_v10  ;;  %6337 = vmatprep.subr.bf16.mxu1 %v6846_v59  ;;  %v6862_v59 = vld [vmem:[#allocation15 + $0x140] sm:$0xff]  }
 0x2a4   : > { %v2573_v49 = vadd.f32 %v6002_v44, %v8341_v62  ;;  %v6110_v26 = vpop.f32.mrb[113].mxu1  ;;  %6377 = vmatprep.subr.bf16.mxu0 %v6848_v4 }
 0x2a5   : > { %v6111_v22 = vadd.f32 %v6110_v26, %v6109_v5  ;;  %v6112_v62 = vpop.f32.mrb[114].mxu1  ;;  %6338 = vmatpush3.bf16.msra.mxu1 %v6847_v11 }
 0x2a6   : > { %v6003_v54 = vpop.f32.mrb[116].mxu0  ;;  %v6113_v51 = vpop.f32.mrb[115].mxu1  ;;  %6339 = vmatprep.subr.bf16.mxu1 %v6850_v24 }
 0x2a7   : > { %v6004_v12 = vpop.f32.mrb[117].mxu0  ;;  %v6114_v58 = vadd.f32 %v6113_v51, %v6112_v62  ;;  %v8455_v43 = vadd.f32 %v6111_v22, %v2570_v57  ;;  %6378 = vmatpush3.bf16.msra.mxu0 %v6849_v47  ;;  %v6855_v22 = vld [vmem:[#allocation15 + $0x30] sm:$0xff]  }
 0x2a8   : > { %v6005_v38 = vadd.f32 %v6004_v12, %v6003_v54  ;;  %v6006_v32 = vpop.f32.mrb[118].mxu0  ;;  %6379 = vmatprep.subr.bf16.mxu0 %v6852_v16  ;;  %v6856_v62 = vld [vmem:[#allocation15 + $0xf0] sm:$0xff]  }
 0x2a9   : > { %v6007_v0 = vpop.f32.mrb[119].mxu0  ;;  %v8458_v33 = vadd.f32 %v6114_v58, %v2573_v49  ;;  %6340 = vmatpush3.bf16.msra.mxu1 %v6851_v53  ;;  %v6857_v51 = vld [vmem:[#allocation15 + $0xb0] sm:$0xff]   ;;  %v6860_v58 = vld [vmem:[#allocation15 + $0xf8] sm:$0xff]  }
 0x2aa   : > { %v2578_v50 = vadd.f32 %v6005_v38, %v8348_v55  ;;  %v6008_v28 = vadd.f32 %v6007_v0, %v6006_v32  ;;  %v6853_v38 = vld [vmem:[#allocation15 + $0xa8] sm:$0xff]   ;;  %v6854_v32 = vld [vmem:[#allocation15 + $0x70] sm:$0xff]  }
 0x2ab   : > { %v6115_v55 = vpop.f32.mrb[116].mxu1  ;;  %6380 = vmatpush3.bf16.msra.mxu0 %v6853_v38  ;;  %6341 = vmatprep.subr.bf16.mxu1 %v6854_v32 }
 0x2ac   : > { %v2581_v23 = vadd.f32 %v6008_v28, %v8351_v39  ;;  %v6116_v63 = vpop.f32.mrb[117].mxu1  ;;  %v6858_v28 = vld [vmem:[#allocation15 + $0x78] sm:$0xff]   ;;  %6381 = vmatprep.subr.bf16.mxu0 %v6856_v62 }
 0x2ad   : > { %v6117_v54 = vadd.f32 %v6116_v63, %v6115_v55  ;;  %v6118_v39 = vpop.f32.mrb[118].mxu1  ;;  %6342 = vmatpush3.bf16.msra.mxu1 %v6855_v22 }
 0x2ae   : > { %v6009_v18 = vpop.f32.mrb[120].mxu0  ;;  %v6119_v49 = vpop.f32.mrb[119].mxu1  ;;  %6343 = vmatprep.subr.bf16.mxu1 %v6858_v28 }
 0x2af   : > { %v6010_v44 = vpop.f32.mrb[121].mxu0  ;;  %v6120_v21 = vadd.f32 %v6119_v49, %v6118_v39  ;;  %v8461_v26 = vadd.f32 %v6117_v54, %v2578_v50  ;;  %6382 = vmatpush3.bf16.msra.mxu0 %v6857_v51 }
 0x2b0   : > { %v6011_v57 = vadd.f32 %v6010_v44, %v6009_v18  ;;  %v6012_v31 = vpop.f32.mrb[122].mxu0  ;;  %v6861_v44 = vld [vmem:[#allocation15 + $0xb8] sm:$0xff]   ;;  %6383 = vmatprep.subr.bf16.mxu0 %v6860_v58 }
 0x2b1   : > { %v6013_v13 = vpop.f32.mrb[123].mxu0  ;;  %v8464_v0 = vadd.f32 %v6120_v21, %v2581_v23  ;;  %6344 = vmatpush3.bf16.msra.mxu1 %v6859_v45 }
 0x2b2   : > { %v2586_v5 = vadd.f32 %v6011_v57, %v8360_v56  ;;  %v6014_v12 = vadd.f32 %v6013_v13, %v6012_v31  ;;  %v6864_v57 = vld [vmem:[#allocation15 + $0x1c0] sm:$0xff]   ;;  %6409 = vmatprep.subr.bf16.mxu1 %v6862_v59 }
 0x2b3   : > { %v6121_v50 = vpop.f32.mrb[120].mxu1  ;;  %6384 = vmatpush3.bf16.msra.mxu0 %v6861_v44 }
 0x2b4   : > { %v2589_v36 = vadd.f32 %v6014_v12, %v8363_v8  ;;  %v6122_v11 = vpop.f32.mrb[121].mxu1  ;;  %6449 = vmatprep.subr.bf16.mxu0 %v6864_v57 }
 0x2b5   : > { %v6123_v4 = vadd.f32 %v6122_v11, %v6121_v50  ;;  %v6124_v55 = vpop.f32.mrb[122].mxu1 }
 0x2b6   : > { %v6015_v56 = vpop.f32.mrb[124].mxu0  ;;  %v6125_v47 = vpop.f32.mrb[123].mxu1 }
 0x2b7   : > { %v6016_v10 = vpop.f32.mrb[125].mxu0  ;;  %v6126_v31 = vadd.f32 %v6125_v47, %v6124_v55  ;;  %v8467_v53 = vadd.f32 %v6123_v4, %v2586_v5 }
 0x2b8   : > { %v6017_v8 = vadd.f32 %v6016_v10, %v6015_v56  ;;  %v6018_v18 = vpop.f32.mrb[126].mxu0 }
 0x2b9   : > { %v6019_v23 = vpop.f32.mrb[127].mxu0  ;;  %v8470_v39 = vadd.f32 %v6126_v31, %v2589_v36 }
 0x2ba   : > { %v2594_v24 = vadd.f32 %v6017_v8, %v8371_v40  ;;  %v6020_v63 = vadd.f32 %v6019_v23, %v6018_v18 }
 0x2bb   : > { %v6127_v49 = vpop.f32.mrb[124].mxu1 }
 0x2bc   : > { %v2597_v54 = vadd.f32 %v6020_v63, %v8375_v27  ;;  %v6128_v40 = vpop.f32.mrb[125].mxu1 }
 0x2bd   : > { %v6129_v32 = vadd.f32 %v6128_v40, %v6127_v49  ;;  %v6130_v22 = vpop.f32.mrb[126].mxu1 }
 0x2be   : > { %v6519_v13 = vpop.f32.mrb[128].mxu0  ;;  %v6131_v51 = vpop.f32.mrb[127].mxu1 }
 0x2bf   : > { %v2804_v12 = vadd.f32 %v6519_v13, %v8389_v20  ;;  %v2795_v16 = vpop.f32.mrb[129].mxu0  ;;  %v6132_v28 = vadd.f32 %v6131_v51, %v6130_v22  ;;  %v8476_v56 = vadd.f32 %v6129_v32, %v2594_v24 }
 0x2c0   : > { %v2796_v21 = vadd.f32 %v2795_v16, %v8381_v52  ;;  %v6520_v38 = vpop.f32.mrb[130].mxu0 }
 0x2c1   : > { %v2807_v5 = vadd.f32 %v6520_v38, %v8392_v7  ;;  %v2798_v62 = vpop.f32.mrb[131].mxu0  ;;  %v8478_v20 = vadd.f32 %v6132_v28, %v2597_v54 }
 0x2c2   : > { %v2922_v27 = vmax.f32 %v2796_v21, %v2804_v12  ;;  %v2799_v36 = vadd.f32 %v2798_v62, %v8385_v6 }
 0x2c3   : > { %v6173_v10 = vpop.f32.mrb[128].mxu1 }
 0x2c4   : > { %2938 = vst [vmem:[#allocation6] sm:$0xff] %v2922_v27  ;;  %v2923_v45 = vmax.f32 %v2799_v36, %v2807_v5  ;;  %v6174_v11 = vpop.f32.mrb[129].mxu1 }
 0x2c5   : > { %v8483_v18 = vadd.f32 %v6174_v11, %v6173_v10  ;;  %v6176_v4 = vpop.f32.mrb[130].mxu1 }
 0x2c6   : > { %2939 = vst [vmem:[#allocation6 + $0x8] sm:$0xff] %v2923_v45  ;;  %v6523_v58 = vpop.f32.mrb[132].mxu0  ;;  %v6177_v44 = vpop.f32.mrb[131].mxu1 }
 0x2c7   : > { %v2820_v52 = vadd.f32 %v6523_v58, %v8401_v2  ;;  %v2811_v50 = vpop.f32.mrb[133].mxu0  ;;  %v8486_v47 = vadd.f32 %v6177_v44, %v6176_v4 }
 0x2c8   : > { %v2812_v7 = vadd.f32 %v2811_v50, %v8395_v17  ;;  %v6524_v59 = vpop.f32.mrb[134].mxu0 }
 0x2c9   : > { %v2823_v8 = vadd.f32 %v6524_v59, %v8404_v14  ;;  %v2814_v6 = vpop.f32.mrb[135].mxu0 }
 0x2ca   : > { %v2924_v55 = vmax.f32 %v2812_v7, %v2820_v52  ;;  %v2815_v23 = vadd.f32 %v2814_v6, %v8398_v61 }
 0x2cb   : > { %v6179_v57 = vpop.f32.mrb[132].mxu1 }
 0x2cc   : > { %2940 = vst [vmem:[#allocation6 + $0x10] sm:$0xff] %v2924_v55  ;;  %v2925_v2 = vmax.f32 %v2815_v23, %v2823_v8  ;;  %v6180_v54 = vpop.f32.mrb[133].mxu1 }
 0x2cd   : > { %v8491_v12 = vadd.f32 %v6180_v54, %v6179_v57  ;;  %v6182_v61 = vpop.f32.mrb[134].mxu1 }
 0x2ce   : > { %2941 = vst [vmem:[#allocation6 + $0x18] sm:$0xff] %v2925_v2  ;;  %v6527_v24 = vpop.f32.mrb[136].mxu0  ;;  %v6183_v21 = vpop.f32.mrb[135].mxu1 }
 0x2cf   : > { %v2836_v17 = vadd.f32 %v6527_v24, %v8413_v60  ;;  %v2827_v63 = vpop.f32.mrb[137].mxu0  ;;  %v8494_v38 = vadd.f32 %v6183_v21, %v6182_v61 }
 0x2d0   : > { %v2828_v14 = vadd.f32 %v2827_v63, %v8407_v19  ;;  %v6528_v31 = vpop.f32.mrb[138].mxu0 }
 0x2d1   : > { %v2839_v13 = vadd.f32 %v6528_v31, %v8416_v37  ;;  %v2830_v49 = vpop.f32.mrb[139].mxu0 }
 0x2d2   : > { %v2926_v16 = vmax.f32 %v2828_v14, %v2836_v17  ;;  %v2831_v40 = vadd.f32 %v2830_v49, %v8410_v29 }
 0x2d3   : > { %v6185_v22 = vpop.f32.mrb[136].mxu1 }
 0x2d4   : > { %2942 = vst [vmem:[#allocation6 + $0x20] sm:$0xff] %v2926_v16  ;;  %v2927_v60 = vmax.f32 %v2831_v40, %v2839_v13  ;;  %v6186_v62 = vpop.f32.mrb[137].mxu1 }
 0x2d5   : > { %v8498_v27 = vadd.f32 %v6186_v62, %v6185_v22  ;;  %v6188_v29 = vpop.f32.mrb[138].mxu1 }
 0x2d6   : > { %2943 = vst [vmem:[#allocation6 + $0x28] sm:$0xff] %v2927_v60  ;;  %v6531_v32 = vpop.f32.mrb[140].mxu0  ;;  %v6189_v52 = vpop.f32.mrb[139].mxu1 }
 0x2d7   : > { %v2852_v19 = vadd.f32 %v6531_v32, %v8425_v46  ;;  %v2843_v5 = vpop.f32.mrb[141].mxu0  ;;  %v8502_v50 = vadd.f32 %v6189_v52, %v6188_v29 }
 0x2d8   : > { %v2844_v37 = vadd.f32 %v2843_v5, %v8419_v3  ;;  %v6532_v51 = vpop.f32.mrb[142].mxu0 }
 0x2d9   : > { %v2855_v36 = vadd.f32 %v6532_v51, %v8428_v25  ;;  %v2846_v28 = vpop.f32.mrb[143].mxu0 }
 0x2da   : > { %v2928_v45 = vmax.f32 %v2844_v37, %v2852_v19  ;;  %v2847_v58 = vadd.f32 %v2846_v28, %v8422_v35 }
 0x2db   : > { %v6191_v7 = vpop.f32.mrb[140].mxu1 }
 0x2dc   : > { %2944 = vst [vmem:[#allocation6 + $0x30] sm:$0xff] %v2928_v45  ;;  %v2929_v46 = vmax.f32 %v2847_v58, %v2855_v36  ;;  %v6192_v11 = vpop.f32.mrb[141].mxu1 }
 0x2dd   : > { %v8506_v6 = vadd.f32 %v6192_v11, %v6191_v7  ;;  %v6194_v4 = vpop.f32.mrb[142].mxu1 }
 0x2de   : > { %2945 = vst [vmem:[#allocation6 + $0x38] sm:$0xff] %v2929_v46  ;;  %v6535_v10 = vpop.f32.mrb[144].mxu0  ;;  %v6195_v23 = vpop.f32.mrb[143].mxu1 }
 0x2df   : > { %v2868_v3 = vadd.f32 %v6535_v10, %v8437_v48  ;;  %v2859_v59 = vpop.f32.mrb[145].mxu0  ;;  %v8510_v24 = vadd.f32 %v6195_v23, %v6194_v4  ;;  %v8515_v48 = vld [vmem:[%s8803_s21] ss:$0 sm:$0xff]  ;;  %s5296_s21 = scalar_lea.sflag [#allocation9], %s7479_s12 }
 0x2e0   : > { %v2860_v8 = vadd.f32 %v2859_v59, %v8431_v42  ;;  %v6536_v25 = vpop.f32.mrb[146].mxu0 }
 0x2e1   : > { %v2871_v35 = vadd.f32 %v6536_v25, %v8440_v30  ;;  %v2862_v55 = vpop.f32.mrb[147].mxu0 }
 0x2e2   : > { %v2930_v44 = vmax.f32 %v2860_v8, %v2868_v3  ;;  %v2863_v2 = vadd.f32 %v2862_v55, %v8434_v34  ;;  %v3847_v34 = vadd.f32 %v8483_v18, %v8515_v48 }
 0x2e3   : > { %v6213_v63 = vpop.f32.mrb[144].mxu1 }
 0x2e4   : > { %2946 = vst [vmem:[#allocation6 + $0x40] sm:$0xff] %v2930_v44  ;;  %v2931_v17 = vmax.f32 %v2863_v2, %v2871_v35  ;;  %v6214_v14 = vpop.f32.mrb[145].mxu1 }
 0x2e5   : > { %v6215_v13 = vadd.f32 %v6214_v14, %v6213_v63  ;;  %v6216_v49 = vpop.f32.mrb[146].mxu1 }
 0x2e6   : > { %2947 = vst [vmem:[#allocation6 + $0x48] sm:$0xff] %v2931_v17  ;;  %v6539_v42 = vpop.f32.mrb[148].mxu0  ;;  %v6217_v40 = vpop.f32.mrb[147].mxu1 }
 0x2e7   : > { %v2884_v57 = vadd.f32 %v6539_v42, %v8449_v1  ;;  %v2875_v30 = vpop.f32.mrb[149].mxu0  ;;  %v3850_v1 = vadd.f32 %v8486_v47, %v8515_v48  ;;  %v3912_v32 = vadd.f32 %v6215_v13, %v3847_v34  ;;  %v6218_v19 = vadd.f32 %v6217_v40, %v6216_v49 }
 0x2e8   : > { %v2876_v31 = vadd.f32 %v2875_v30, %v8443_v15  ;;  %v6540_v54 = vpop.f32.mrb[150].mxu0  ;;  %v3871_v34 = vadd.f32 %v8506_v6, %v8515_v48  ;;  %v3874_v40 = vadd.f32 %v8510_v24, %v8515_v48 }
 0x2e9   : > { %v2887_v61 = vadd.f32 %v6540_v54, %v8452_v9  ;;  %v2878_v16 = vpop.f32.mrb[151].mxu0  ;;  %v3915_v22 = vadd.f32 %v6218_v19, %v3850_v1 }
 0x2ea   : > { %v2932_v21 = vmax.f32 %v2876_v31, %v2884_v57  ;;  %v2879_v60 = vadd.f32 %v2878_v16, %v8446_v41  ;;  %v3855_v41 = vadd.f32 %v8491_v12, %v8515_v48 }
 0x2eb   : > { %v6219_v18 = vpop.f32.mrb[148].mxu1 }
 0x2ec   : > { %2948 = vst [vmem:[#allocation6 + $0x50] sm:$0xff] %v2932_v21  ;;  %v2933_v15 = vmax.f32 %v2879_v60, %v2887_v61  ;;  %v6220_v9 = vpop.f32.mrb[149].mxu1 }
 0x2ed   : > { %v6221_v29 = vadd.f32 %v6220_v9, %v6219_v18  ;;  %v6222_v47 = vpop.f32.mrb[150].mxu1 }
 0x2ee   : > { %2949 = vst [vmem:[#allocation6 + $0x58] sm:$0xff] %v2933_v15  ;;  %v6543_v5 = vpop.f32.mrb[152].mxu0  ;;  %v6223_v58 = vpop.f32.mrb[151].mxu1 }
 0x2ef   : > { %v2900_v37 = vadd.f32 %v6543_v5, %v8461_v26  ;;  %v2891_v62 = vpop.f32.mrb[153].mxu0  ;;  %v3858_v26 = vadd.f32 %v8494_v38, %v8515_v48  ;;  %v3920_v10 = vadd.f32 %v6221_v29, %v3855_v41  ;;  %v6224_v7 = vadd.f32 %v6223_v58, %v6222_v47 }
 0x2f0   : > { %v2892_v51 = vadd.f32 %v2891_v62, %v8455_v43  ;;  %v6544_v36 = vpop.f32.mrb[154].mxu0 }
 0x2f1   : > { %v2903_v28 = vadd.f32 %v6544_v36, %v8464_v0  ;;  %v2894_v45 = vpop.f32.mrb[155].mxu0  ;;  %v3923_v3 = vadd.f32 %v6224_v7, %v3858_v26 }
 0x2f2   : > { %v2934_v52 = vmax.f32 %v2892_v51, %v2900_v37  ;;  %v2895_v46 = vadd.f32 %v2894_v45, %v8458_v33  ;;  %v3863_v33 = vadd.f32 %v8498_v27, %v8515_v48 }
 0x2f3   : > { %v6225_v12 = vpop.f32.mrb[152].mxu1 }
 0x2f4   : > { %2950 = vst [vmem:[#allocation6 + $0x60] sm:$0xff] %v2934_v52  ;;  %v2935_v43 = vmax.f32 %v2895_v46, %v2903_v28  ;;  %v6226_v0 = vpop.f32.mrb[153].mxu1 }
 0x2f5   : > { %v6227_v35 = vadd.f32 %v6226_v0, %v6225_v12  ;;  %v6228_v38 = vpop.f32.mrb[154].mxu1 }
 0x2f6   : > { %2951 = vst [vmem:[#allocation6 + $0x68] sm:$0xff] %v2935_v43  ;;  %v6547_v59 = vpop.f32.mrb[156].mxu0  ;;  %v6229_v44 = vpop.f32.mrb[155].mxu1 }
 0x2f7   : > { %v2916_v11 = vadd.f32 %v6547_v59, %v8476_v56  ;;  %v2907_v8 = vpop.f32.mrb[157].mxu0  ;;  %v3866_v56 = vadd.f32 %v8502_v50, %v8515_v48  ;;  %v3928_v42 = vadd.f32 %v6227_v35, %v3863_v33  ;;  %v6230_v63 = vadd.f32 %v6229_v44, %v6228_v38 }
 0x2f8   : > { %v2908_v25 = vadd.f32 %v2907_v8, %v8467_v53  ;;  %v6548_v4 = vpop.f32.mrb[158].mxu0 }
 0x2f9   : > { %v2919_v55 = vadd.f32 %v6548_v4, %v8478_v20  ;;  %v2910_v23 = vpop.f32.mrb[159].mxu0  ;;  %v3931_v57 = vadd.f32 %v6230_v63, %v3866_v56 }
 0x2fa   : > { %v2936_v2 = vmax.f32 %v2908_v25, %v2916_v11  ;;  %v2911_v17 = vadd.f32 %v2910_v23, %v8470_v39 }
 0x2fb   : > { %v6231_v27 = vpop.f32.mrb[156].mxu1 }
 0x2fc   : > { %2952 = vst [vmem:[#allocation6 + $0x70] sm:$0xff] %v2936_v2  ;;  %v2937_v53 = vmax.f32 %v2911_v17, %v2919_v55  ;;  %v6232_v31 = vpop.f32.mrb[157].mxu1 }
 0x2fd   : > { %v6233_v13 = vadd.f32 %v6232_v31, %v6231_v27  ;;  %v6234_v39 = vpop.f32.mrb[158].mxu1  ;;  %v2974_v31 = vld [vmem:[#allocation6 + $0x21] ss:$2 sm:$0xff] }
 0x2fe   : > { %2953 = vst [vmem:[#allocation6 + $0x78] sm:$0xff] %v2937_v53  ;;  %v6253_v30 = vpop.f32.mrb[160].mxu0  ;;  %v6235_v61 = vpop.f32.mrb[159].mxu1 }
 0x2ff   : > { %v6254_v14 = vpop.f32.mrb[161].mxu0  ;;  %v3936_v21 = vadd.f32 %v6233_v13, %v3871_v34  ;;  %v6236_v60 = vadd.f32 %v6235_v61, %v6234_v39  ;;  %v2960_v13 = vld [vmem:[#allocation6 + $0x30] ss:$2 sm:$0xff]  ;;  %v2976_v39 = vld [vmem:[#allocation6 + $0x31] ss:$2 sm:$0xff] }
 0x300   : > { %v6255_v54 = vadd.f32 %v6254_v14, %v6253_v30  ;;  %v6256_v20 = vpop.f32.mrb[162].mxu0  ;;  %v2958_v14 = vld [vmem:[#allocation6 + $0x20] ss:$2 sm:$0xff] }
 0x301   : > { %v6257_v49 = vpop.f32.mrb[163].mxu0  ;;  %v3939_v19 = vadd.f32 %v6236_v60, %v3874_v40  ;;  %v2987_v61 = vmax.f32 %v2958_v14, %v2974_v31  ;;  %v2956_v40 = vld [vmem:[#allocation6 + $0x10] ss:$2 sm:$0xff]  ;;  %v2972_v60 = vld [vmem:[#allocation6 + $0x11] ss:$2 sm:$0xff] }
 0x302   : > { %v3977_v50 = vadd.f32 %v6255_v54, %v3912_v32  ;;  %v6258_v16 = vadd.f32 %v6257_v49, %v6256_v20  ;;  %v2954_v54 = vld [vmem:[#allocation6] ss:$2 sm:$0xff] }
 0x303   : > { %v6293_v5 = vpop.f32.mrb[160].mxu1 }
 0x304   : > { %v3980_v1 = vadd.f32 %v6258_v16, %v3915_v22  ;;  %v6294_v37 = vpop.f32.mrb[161].mxu1 }
 0x305   : > { %v6295_v6 = vadd.f32 %v6294_v37, %v6293_v5  ;;  %v6296_v51 = vpop.f32.mrb[162].mxu1 }
 0x306   : > { %v6259_v15 = vpop.f32.mrb[164].mxu0  ;;  %v6297_v41 = vpop.f32.mrb[163].mxu1 }
 0x307   : > { %v6260_v18 = vpop.f32.mrb[165].mxu0  ;;  %v6298_v47 = vadd.f32 %v6297_v41, %v6296_v51  ;;  %v4042_v28 = vadd.f32 %v6295_v6, %v3977_v50  ;;  %v8555_v41 = vld [vmem:[%s8805_s14] ss:$0 sm:$0xff] }
 0x308   : > { %v6261_v62 = vadd.f32 %v6260_v18, %v6259_v15  ;;  %v6262_v9 = vpop.f32.mrb[166].mxu0 }
 0x309   : > { %v6263_v36 = vpop.f32.mrb[167].mxu0  ;;  %v4045_v24 = vadd.f32 %v6298_v47, %v3980_v1  ;;  %v8550_v1 = vld [vmem:[%s8804_s28] ss:$0 sm:$0xff]  ;;  %s7068_s28 = sshll.u32 %s7154_s5, 4  ;;  %s7069_s28 = int_to_ptr.vmem [resolvable:$false] %s7068_s28 }
 0x30a   : > { %v3985_v29 = vadd.f32 %v6261_v62, %v3920_v10  ;;  %v6264_v32 = vadd.f32 %v6263_v36, %v6262_v9  ;;  %v2988_v9 = vmax.f32 %v2960_v13, %v2976_v39  ;;  %s7070_s24 = scalar_lea.vmem %s7069_s28, 2048  ;;  %p7071_p8 = scmp.lt.s32.totalorder %s8692_s8, %s7069_s28 }
 0x30b   : > { %v6299_v58 = vpop.f32.mrb[164].mxu1  ;;  %p7072_p6 = scmp.lt.s32.totalorder %s7070_s24, %s7064_s19 }
 0x30c   : > { %v3988_v45 = vadd.f32 %v6264_v32, %v3923_v3  ;;  %v6300_v52 = vpop.f32.mrb[165].mxu1  ;;  %v2986_v32 = vmax.f32 %v2956_v40, %v2972_v60 }
 0x30d   : > { %v6301_v7 = vadd.f32 %v6300_v52, %v6299_v58  ;;  %v6302_v43 = vpop.f32.mrb[166].mxu1  ;;  %v2978_v52 = vld [vmem:[#allocation6 + $0x41] ss:$2 sm:$0xff]  ;;  %p7073_p10 = por %p7072_p6, %p7071_p8 }
 0x30e   : > { %v6265_v48 = vpop.f32.mrb[168].mxu0  ;;  %v6303_v12 = vpop.f32.mrb[167].mxu1 }
 0x30f   : > { %v6266_v22 = vpop.f32.mrb[169].mxu0  ;;  %v6304_v0 = vadd.f32 %v6303_v12, %v6302_v43  ;;  %v4050_v25 = vadd.f32 %v6301_v7, %v3985_v29  ;;  %v2966_v7 = vld [vmem:[#allocation6 + $0x60] ss:$2 sm:$0xff]  ;;  %v2982_v43 = vld [vmem:[#allocation6 + $0x61] ss:$2 sm:$0xff]  ;;  %p7074_p3 = pnand %p7073_p10, %p7067_p0 }
 0x310   : > { %v6267_v46 = vadd.f32 %v6266_v22, %v6265_v48  ;;  %v6268_v26 = vpop.f32.mrb[170].mxu0  ;;  %v2962_v22 = vld [vmem:[#allocation6 + $0x40] ss:$2 sm:$0xff] }
 0x311   : > { %v6269_v59 = vpop.f32.mrb[171].mxu0  ;;  %v4053_v4 = vadd.f32 %v6304_v0, %v3988_v45  ;;  %v2980_v0 = vld [vmem:[#allocation6 + $0x51] ss:$2 sm:$0xff] }
 0x312   : > { %v3993_v11 = vadd.f32 %v6267_v46, %v3928_v42  ;;  %v6270_v8 = vadd.f32 %v6269_v59, %v6268_v26 }
 0x313   : > { %v6305_v35 = vpop.f32.mrb[168].mxu1 }
 0x314   : > { %v3996_v10 = vadd.f32 %v6270_v8, %v3931_v57  ;;  %v6306_v38 = vpop.f32.mrb[169].mxu1  ;;  %v2970_v57 = vld [vmem:[#allocation6 + $0x1] ss:$2 sm:$0xff]  ;;  %v2964_v8 = vld [vmem:[#allocation6 + $0x50] ss:$2 sm:$0xff] }
 0x315   : > { %v6307_v44 = vadd.f32 %v6306_v38, %v6305_v35  ;;  %v6308_v2 = vpop.f32.mrb[170].mxu1  ;;  %v2984_v35 = vld [vmem:[#allocation6 + $0x71] ss:$2 sm:$0xff] }
 0x316   : > { %v6271_v33 = vpop.f32.mrb[172].mxu0  ;;  %v6309_v56 = vpop.f32.mrb[171].mxu1 }
 0x317   : > { %v6272_v3 = vpop.f32.mrb[173].mxu0  ;;  %v6310_v30 = vadd.f32 %v6309_v56, %v6308_v2  ;;  %v4058_v27 = vadd.f32 %v6307_v44, %v3993_v11  ;;  %v4207_v2 = vld [vmem:[#allocation3 + $0x1] sm:$0xff] }
 0x318   : > { %v6273_v55 = vadd.f32 %v6272_v3, %v6271_v33  ;;  %v6274_v23 = vpop.f32.mrb[174].mxu0  ;;  %v2968_v33 = vld [vmem:[#allocation6 + $0x70] ss:$2 sm:$0xff] }
 0x319   : > { %v6275_v17 = vpop.f32.mrb[175].mxu0  ;;  %v8545_v20 = vadd.f32 %v6310_v30, %v3996_v10  ;;  %v2990_v30 = vmax.f32 %v2964_v8, %v2980_v0  ;;  %v2992_v31 = vmax.f32 %v2968_v33, %v2984_v35  ;;  %v6870_v0 = vld [vmem:[#allocation15 + $0x150] sm:$0xff]   ;;  %v6874_v35 = vld [vmem:[#allocation15 + $0x158] sm:$0xff]  }
 0x31a   : > { %v4001_v63 = vadd.f32 %v6273_v55, %v3936_v21  ;;  %v6276_v53 = vadd.f32 %v6275_v17, %v6274_v23  ;;  %v2991_v55 = vmax.f32 %v2966_v7, %v2982_v43  ;;  %v6872_v33 = vld [vmem:[#allocation15 + $0x1d0] sm:$0xff]  }
 0x31b   : > { %v6311_v49 = vpop.f32.mrb[172].mxu1 }
 0x31c   : > { %v4004_v42 = vadd.f32 %v6276_v53, %v3939_v19  ;;  %v6312_v21 = vpop.f32.mrb[173].mxu1  ;;  %v2985_v19 = vmax.f32 %v2954_v54, %v2970_v57 }
 0x31d   : > { %v6313_v18 = vadd.f32 %v6312_v21, %v6311_v49  ;;  %v6314_v37 = vpop.f32.mrb[174].mxu1 }
 0x31e   : > { %v6567_v34 = vpop.f32.mrb[176].mxu0  ;;  %v6315_v36 = vpop.f32.mrb[175].mxu1 }
 0x31f   : > { %v4115_v50 = vadd.f32 %v6567_v34, %v4050_v25  ;;  %v4106_v16 = vpop.f32.mrb[177].mxu0  ;;  %v6316_v45 = vadd.f32 %v6315_v36, %v6314_v37  ;;  %v4066_v58 = vadd.f32 %v6313_v18, %v4001_v63 }
 0x320   : > { %v4107_v15 = vadd.f32 %v4106_v16, %v4042_v28  ;;  %v6568_v5 = vpop.f32.mrb[178].mxu0 }
 0x321   : > { %v4139_v62 = vadd.f32 %v4115_v50, %v2987_v61  ;;  %v4118_v6 = vadd.f32 %v6568_v5, %v4053_v4  ;;  %v4109_v51 = vpop.f32.mrb[179].mxu0  ;;  %v4069_v11 = vadd.f32 %v6316_v45, %v4004_v42  ;;  %v2989_v4 = vmax.f32 %v2962_v22, %v2978_v52 }
 0x322   : > { %v4137_v29 = vadd.f32 %v4107_v15, %v2985_v19  ;;  %v4110_v47 = vadd.f32 %v4109_v51, %v4045_v24 }
 0x323   : > { %v4154_v48 = vmul.f32 %v8550_v1, %v4139_v62  ;;  %v4140_v28 = vadd.f32 %v4118_v6, %v2988_v9  ;;  %v4191_v62 = vld [vmem:[#allocation3] sm:$0xff] }
 0x324   : > { %v4152_v46 = vmul.f32 %v8550_v1, %v4137_v29  ;;  %v4138_v26 = vadd.f32 %v4110_v47, %v2986_v32  ;;  %v6863_v29 = vld [vmem:[#allocation15 + $0x100] sm:$0xff]  }
 0x325   : > { %v4169_v59 = vadd.f32 %v8555_v41, %v4154_v48  ;;  %v4155_v12 = vmul.f32 %v8550_v1, %v4140_v28  ;;  %v4223_v47 = vld [vmem:[#allocation3 + $0x2] sm:$0xff] }
 0x326   : > { %v4167_v24 = vadd.f32 %v8555_v41, %v4152_v46  ;;  %v4153_v25 = vmul.f32 %v8550_v1, %v4138_v26  ;;  %v6571_v10 = vpop.f32.mrb[180].mxu0  ;;  %v6866_v48 = vld [vmem:[#allocation15 + $0x148] sm:$0xff]   ;;  %v6865_v46 = vld [vmem:[#allocation15 + $0x180] sm:$0xff]  }
 0x327   : > { %v8563_v3 = vmax.f32 %v4169_v59, 0.0  ;;  %v4170_v38 = vadd.f32 %v8555_v41, %v4155_v12  ;;  %v4131_v23 = vadd.f32 %v6571_v10, %v4066_v58  ;;  %v4122_v44 = vpop.f32.mrb[181].mxu0  ;;  %v6867_v59 = vld [vmem:[#allocation15 + $0x108] sm:$0xff]  }
 0x328   : > { %v8566_v17 = vmax.f32 %v4167_v24, 0.0  ;;  %v4168_v56 = vadd.f32 %v8555_v41, %v4153_v25  ;;  %v4123_v63 = vadd.f32 %v4122_v44, %v4058_v27  ;;  %v6572_v53 = vpop.f32.mrb[182].mxu0  ;;  %v6868_v12 = vld [vmem:[#allocation15 + $0x1c8] sm:$0xff]   ;;  %v6871_v25 = vld [vmem:[#allocation15 + $0x110] sm:$0xff]  }
 0x329   : > { %4185 = vst [vmem:[#allocation3 + $0x31] sm:$0xff] %v8563_v3  ;;  %v8570_v42 = vmax.f32 %v4170_v38, 0.0  ;;  %v4143_v14 = vadd.f32 %v4131_v23, %v2991_v55  ;;  %v4134_v54 = vadd.f32 %v6572_v53, %v4069_v11  ;;  %v4125_v57 = vpop.f32.mrb[183].mxu0  ;;  %v6869_v24 = vld [vmem:[#allocation15 + $0x188] sm:$0xff]   ;;  %v6873_v23 = vld [vmem:[#allocation15 + $0x190] sm:$0xff]  }
 0x32a   : > { %4183 = vst [vmem:[#allocation3 + $0x11] sm:$0xff] %v8566_v17  ;;  %v8573_v34 = vmax.f32 %v4168_v56, 0.0  ;;  %v4141_v13 = vadd.f32 %v4123_v63, %v2989_v4  ;;  %v4126_v39 = vadd.f32 %v4125_v57, %v8545_v20  ;;  %v4215_v49 = vpack.c.bf16 %v8566_v17, %v4207_v2  ;;  %v6875_v56 = vld [vmem:[#allocation15 + $0x118] sm:$0xff]  }
 0x32b   : > { %4186 = vst [vmem:[#allocation3 + $0x41] sm:$0xff] %v8570_v42  ;;  %v4158_v27 = vmul.f32 %v8550_v1, %v4143_v14  ;;  %v4144_v61 = vadd.f32 %v4134_v54, %v2992_v31  ;;  %v4264_v50 = vpack.c.bf16 %v8570_v42, %v8563_v3  ;;  %v6876_v63 = vld [vmem:[#allocation15 + $0x1d8] sm:$0xff]   ;;  %v6879_v31 = vld [vmem:[#allocation15 + $0x120] sm:$0xff]  }
 0x32c   : > { %4184 = vst [vmem:[#allocation3 + $0x21] sm:$0xff] %v8573_v34  ;;  %v4156_v16 = vmul.f32 %v8550_v1, %v4141_v13  ;;  %v4142_v40 = vadd.f32 %v4126_v39, %v2990_v30  ;;  %4986 = vmatprep.mubr.bf16.mxu1 %v4215_v49  ;;  %v8585_v60 = vpack.c.bf16 %v8563_v3, %v8573_v34  ;;  %v6878_v30 = vld [vmem:[#allocation15 + $0x160] sm:$0xff]   ;;  %v6877_v14 = vld [vmem:[#allocation15 + $0x198] sm:$0xff]   ;;  %v6882_v39 = vld [vmem:[#allocation15 + $0x168] sm:$0xff]  }
 0x32d   : > { %v4263_v20 = vpack.c.bf16 %v8573_v34, %v8566_v17  ;;  %v4173_v21 = vadd.f32 %v8555_v41, %v4158_v27  ;;  %v4159_v19 = vmul.f32 %v8550_v1, %v4144_v61  ;;  %v6880_v13 = vld [vmem:[#allocation15 + $0x1e0] sm:$0xff]  }
 0x32e   : > { %v4171_v15 = vadd.f32 %v8555_v41, %v4156_v16  ;;  %v4157_v5 = vmul.f32 %v8550_v1, %v4142_v40  ;;  %v6881_v61 = vld [vmem:[#allocation15 + $0x1a0] sm:$0xff]  }
 0x32f   : > { %v8593_v18 = vmax.f32 %v4173_v21, 0.0  ;;  %v4174_v37 = vadd.f32 %v8555_v41, %v4159_v19  ;;  %v6883_v21 = vld [vmem:[#allocation15 + $0x128] sm:$0xff]   ;;  %v6898_v17 = vld [vmem:[#allocation15 + $0x220] sm:$0xff]  }
 0x330   : > { %v8596_v9 = vmax.f32 %v4171_v15, 0.0  ;;  %v4172_v6 = vadd.f32 %v8555_v41, %v4157_v5  ;;  %v4241_v43 = vld [vmem:[#allocation3 + $0x30] sm:$0xff]  ;;  %v6884_v19 = vld [vmem:[#allocation15 + $0x1e8] sm:$0xff]  }
 0x331   : > { %4189 = vst [vmem:[#allocation3 + $0x71] sm:$0xff] %v8593_v18  ;;  %v8600_v51 = vmax.f32 %v4174_v37, 0.0  ;;  %v4192_v36 = vld [vmem:[#allocation3 + $0x10] sm:$0xff]  ;;  %v6885_v37 = vld [vmem:[#allocation15 + $0x1a8] sm:$0xff]  }
 0x332   : > { %4187 = vst [vmem:[#allocation3 + $0x51] sm:$0xff] %v8596_v9  ;;  %v8603_v32 = vmax.f32 %v4172_v6, 0.0  ;;  %v4199_v1 = vpack.c.bf16 %v4192_v36, %v4191_v62  ;;  %v8605_v45 = vld [vmem:[#allocation3 + $0x12] sm:$0xff]  ;;  %v8609_v28 = vpack.c.bf16 %v8596_v9, %v8570_v42  ;;  %v4242_v58 = vld [vmem:[#allocation3 + $0x40] sm:$0xff] }
 0x333   : > { %4190 = vst [vmem:[#allocation3 + $0x81] sm:$0xff] %v8600_v51  ;;  %v4240_v41 = vld [vmem:[#allocation3 + $0x20] sm:$0xff]  ;;  %v4266_v22 = vpack.c.bf16 %v8600_v51, %v8593_v18  ;;  %v4231_v7 = vpack.c.bf16 %v8605_v45, %v4223_v47  ;;  %v4248_v8 = vpack.c.bf16 %v4242_v58, %v4241_v43  ;;  %v8628_v55 = vld [vmem:[#allocation3 + $0x32] sm:$0xff] }
 0x334   : > { %4188 = vst [vmem:[#allocation3 + $0x61] sm:$0xff] %v8603_v32  ;;  %4987 = vmatmul.mubr.bf16.vlgmr.msra.gmra.mrb[176].mxu1 %v4199_v1  ;;  %v4247_v52 = vpack.c.bf16 %v4240_v41, %v4192_v36  ;;  %v8617_v26 = vpack.c.bf16 %v8593_v18, %v8603_v32  ;;  %v4265_v11 = vpack.c.bf16 %v8603_v32, %v8596_v9  ;;  %v8625_v4 = vld [vmem:[#allocation3 + $0x22] sm:$0xff]  ;;  %v6886_v5 = vld [vmem:[#allocation15 + $0x170] sm:$0xff]   ;;  %v6890_v1 = vld [vmem:[#allocation15 + $0x178] sm:$0xff]  }
 0x335   : > { %4994 = vmatprep.mubr.bf16.mxu1 %v8585_v60  ;;  %6410 = vmatpush3.bf16.msra.mxu1 %v6863_v29  ;;  %v8623_v10 = vpack.c.bf16 %v4241_v43, %v4240_v41  ;;  %v8633_v44 = vpack.c.bf16 %v8628_v55, %v8625_v4  ;;  %v4227_v27 = vld [vmem:[#allocation3 + $0x42] sm:$0xff]  ;;  %v6887_v62 = vld [vmem:[#allocation15 + $0x130] sm:$0xff]   ;;  %v4279_v47 = vpack.c.bf16 %v8625_v4, %v8605_v45  ;;  %v6893_v43 = vld [vmem:[#allocation15 + $0x1b8] sm:$0xff]  }
 0x336   : > { %5051 = vmatprep.mubr.bf16.mxu0 %v4247_v52  ;;  %6411 = vmatprep.subr.bf16.mxu1 %v6866_v48  ;;  %v6888_v29 = vld [vmem:[#allocation15 + $0x1f0] sm:$0xff]   ;;  %v6891_v52 = vld [vmem:[#allocation15 + $0x138] sm:$0xff]   ;;  %v6895_v45 = vld [vmem:[#allocation15 + $0x208] sm:$0xff]  }
 0x337   : > { %5052 = vmatmul.mubr.bf16.vlgmr.msra.gmra.mrb[184].mxu0 %v4231_v7  ;;  %v6889_v41 = vld [vmem:[#allocation15 + $0x1b0] sm:$0xff]   ;;  %v6894_v7 = vld [vmem:[#allocation15 + $0x200] sm:$0xff]  }
 0x338   : > { %5059 = vmatprep.mubr.bf16.mxu0 %v4248_v8  ;;  %6450 = vmatpush3.bf16.msra.mxu0 %v6865_v46  ;;  %v4245_v40 = vld [vmem:[#allocation3 + $0x70] sm:$0xff]  ;;  %v6892_v46 = vld [vmem:[#allocation15 + $0x1f8] sm:$0xff]  }
 0x339   : > { %6412 = vmatpush3.bf16.msra.mxu1 %v6867_v59  ;;  %6451 = vmatprep.subr.bf16.mxu0 %v6868_v12  ;;  %v4243_v2 = vld [vmem:[#allocation3 + $0x50] sm:$0xff]  ;;  %v4280_v59 = vpack.c.bf16 %v4227_v27, %v8628_v55 }
 0x33a   : > { %6413 = vmatprep.subr.bf16.mxu1 %v6870_v0  ;;  %v8636_v54 = vpack.c.bf16 %v4243_v2, %v4242_v58  ;;  %v8638_v57 = vld [vmem:[#allocation3 + $0x52] sm:$0xff]  ;;  %v8640_v49 = vld [vmem:[#allocation3 + $0x80] sm:$0xff]  ;;  %v5604_v18 = vld [vmem:[%s8806_s20] ss:$0 sm:$0xff] }
 0x33b   : > { %v4244_v38 = vld [vmem:[#allocation3 + $0x60] sm:$0xff]  ;;  %v8645_v16 = vpack.c.bf16 %v8638_v57, %v4227_v27  ;;  %v4250_v15 = vpack.c.bf16 %v8640_v49, %v4245_v40  ;;  %v4230_v48 = vld [vmem:[#allocation3 + $0x72] sm:$0xff] }
 0x33c   : > { %6452 = vmatpush3.bf16.msra.mxu0 %v6869_v24  ;;  %4995 = vmatmul.mubr.bf16.gmra.mrb[180].mxu1 %v8623_v10  ;;  %v4249_v53 = vpack.c.bf16 %v4244_v38, %v4243_v2  ;;  %v4202_v6 = vpack.c.bf16 %v4245_v40, %v4244_v38  ;;  %v4229_v36 = vld [vmem:[#allocation3 + $0x62] sm:$0xff]  ;;  %v6896_v12 = vld [vmem:[#allocation15 + $0x210] sm:$0xff]  }
 0x33d   : > { %5002 = vmatprep.mubr.bf16.mxu1 %v8609_v28  ;;  %6414 = vmatpush3.bf16.msra.mxu1 %v6871_v25  ;;  %v4234_v58 = vpack.c.bf16 %v4230_v48, %v4229_v36  ;;  %v4281_v8 = vpack.c.bf16 %v4229_v36, %v8638_v57  ;;  %v4278_v34 = vld [vmem:[#allocation3 + $0x82] sm:$0xff]  ;;  %v4310_v0 = vld [vmem:[#allocation3 + $0x91] sm:$0xff] }
 0x33e   : > { %6453 = vmatprep.subr.bf16.mxu0 %v6872_v33  ;;  %6415 = vmatprep.subr.bf16.mxu1 %v6874_v35  ;;  %v4314_v3 = vpack.c.bf16 %v4310_v0, %v8600_v51  ;;  %v6900_v42 = vld [vmem:[#allocation15 + $0x230] sm:$0xff]  }
 0x33f   : > { %5060 = vmatmul.mubr.bf16.gmra.mrb[188].mxu0 %v8633_v44  ;;  %v4326_v32 = vld [vmem:[#allocation3 + $0x92] sm:$0xff] }
 0x340   : > { %5067 = vmatprep.mubr.bf16.mxu0 %v4249_v53  ;;  %6454 = vmatpush3.bf16.msra.mxu0 %v6873_v23 }
 0x341   : > { %6416 = vmatpush3.bf16.msra.mxu1 %v6875_v56  ;;  %6455 = vmatprep.subr.bf16.mxu0 %v6876_v63 }
 0x342   : > { %6417 = vmatprep.subr.bf16.mxu1 %v6878_v30 }
 0x344   : > { %6456 = vmatpush3.bf16.msra.mxu0 %v6877_v14  ;;  %5003 = vmatmul.mubr.bf16.gmra.mrb[184].mxu1 %v8636_v54 }
 0x345   : > { %5010 = vmatprep.mubr.bf16.mxu1 %v8617_v26  ;;  %6418 = vmatpush3.bf16.msra.mxu1 %v6879_v31 }
 0x346   : > { %6457 = vmatprep.subr.bf16.mxu0 %v6880_v13  ;;  %6419 = vmatprep.subr.bf16.mxu1 %v6882_v39 }
 0x347   : > { %5068 = vmatmul.mubr.bf16.gmra.mrb[192].mxu0 %v8645_v16 }
 0x348   : > { %5075 = vmatprep.mubr.bf16.mxu0 %v4250_v15  ;;  %6458 = vmatpush3.bf16.msra.mxu0 %v6881_v61 }
 0x349   : > { %6420 = vmatpush3.bf16.msra.mxu1 %v6883_v21  ;;  %6459 = vmatprep.subr.bf16.mxu0 %v6884_v19 }
 0x34a   : > { %6421 = vmatprep.subr.bf16.mxu1 %v6886_v5 }
 0x34c   : > { %6460 = vmatpush3.bf16.msra.mxu0 %v6885_v37  ;;  %5011 = vmatmul.mubr.bf16.gmra.mrb[188].mxu1 %v4202_v6 }
 0x34d   : > { %6422 = vmatpush3.bf16.msra.mxu1 %v6887_v62  ;;  %5116 = vmatprep.mubr.bf16.mxu1 %v4279_v47 }
 0x34e   : > { %6461 = vmatprep.subr.bf16.mxu0 %v6888_v29  ;;  %6423 = vmatprep.subr.bf16.mxu1 %v6890_v1 }
 0x34f   : > { %5076 = vmatmul.mubr.bf16.gmra.mrb[196].mxu0 %v4234_v58 }
 0x350   : > { %6462 = vmatpush3.bf16.msra.mxu0 %v6889_v41  ;;  %5181 = vmatprep.mubr.bf16.mxu0 %v8585_v60  ;;  %v6897_v60 = vld [vmem:[#allocation15 + $0x218] sm:$0xff]  }
 0x351   : > { %6424 = vmatpush3.bf16.msra.mxu1 %v6891_v52  ;;  %6463 = vmatprep.subr.bf16.mxu0 %v6892_v46 }
 0x352   : > { %6573 = vmatprep.subr.bf16.mxu1 %v6894_v7 }
 0x354   : > { %6464 = vmatpush3.bf16.msra.mxu0 %v6893_v43  ;;  %5117 = vmatmul.mubr.bf16.vlgmr.msra.gmra.mrb[192].mxu1 %v4263_v20  ;;  %v6899_v20 = vld [vmem:[#allocation15 + $0x228] sm:$0xff]  }
 0x355   : > { %5124 = vmatprep.mubr.bf16.mxu1 %v4280_v59  ;;  %6574 = vmatpush3.bf16.msra.mxu1 %v6894_v7 }
 0x356   : > { %6575 = vmatprep.subr.bf16.mxu1 %v6895_v45 }
 0x357   : > { %5182 = vmatmul.mubr.bf16.vlgmr.msra.gmra.mrb[200].mxu0 %v8623_v10 }
 0x358   : > { %5189 = vmatprep.mubr.bf16.mxu0 %v8609_v28  ;;  %v4282_v28 = vpack.c.bf16 %v4278_v34, %v4230_v48 }
 0x359   : > { %6576 = vmatpush3.bf16.msra.mxu1 %v6895_v45 }
 0x35a   : > { %6577 = vmatprep.subr.bf16.mxu1 %v6896_v12 }
 0x35c   : > { %5125 = vmatmul.mubr.bf16.gmra.mrb[196].mxu1 %v4264_v50  ;;  %v4294_v50 = vld [vmem:[#allocation3 + $0x90] sm:$0xff] }
 0x35d   : > { %5132 = vmatprep.mubr.bf16.mxu1 %v4281_v8  ;;  %6578 = vmatpush3.bf16.msra.mxu1 %v6896_v12  ;;  %v4298_v9 = vpack.c.bf16 %v4294_v50, %v8640_v49 }
 0x35e   : > { %6579 = vmatprep.subr.bf16.mxu1 %v6897_v60 }
 0x35f   : > { %5190 = vmatmul.mubr.bf16.gmra.mrb[204].mxu0 %v8636_v54 }
 0x360   : > { %5197 = vmatprep.mubr.bf16.mxu0 %v8617_v26  ;;  %v6901_v26 = vld [vmem:[#allocation15 + $0x238] sm:$0xff]  }
 0x361   : > { %6580 = vmatpush3.bf16.msra.mxu1 %v6897_v60 }
 0x362   : > { %6581 = vmatprep.subr.bf16.mxu1 %v6898_v17 }
 0x364   : > { %5133 = vmatmul.mubr.bf16.gmra.mrb[200].mxu1 %v4265_v11  ;;  %v4330_v11 = vpack.c.bf16 %v4326_v32, %v4278_v34 }
 0x365   : > { %5140 = vmatprep.mubr.bf16.mxu1 %v4282_v28  ;;  %6582 = vmatpush3.bf16.msra.mxu1 %v6898_v17 }
 0x366   : > { %6583 = vmatprep.subr.bf16.mxu1 %v6899_v20 }
 0x367   : > { %5198 = vmatmul.mubr.bf16.gmra.mrb[208].mxu0 %v4202_v6 }
 0x368   : > { %5205 = vmatprep.mubr.bf16.mxu0 %v4314_v3 }
 0x369   : > { %6584 = vmatpush3.bf16.msra.mxu1 %v6899_v20 }
 0x36a   : > { %6585 = vmatprep.subr.bf16.mxu1 %v6900_v42 }
 0x36c   : > { %5141 = vmatmul.mubr.bf16.gmra.mrb[204].mxu1 %v4266_v22 }
 0x36d   : > { %6586 = vmatpush3.bf16.msra.mxu1 %v6900_v42  ;;  %6589 = vmatprep.mubr.bf16.mxu1 %v8633_v44 }
 0x36e   : > { %6587 = vmatprep.subr.bf16.mxu1 %v6901_v26 }
 0x36f   : > { %5206 = vmatmul.mubr.bf16.gmra.mrb[212].mxu0 %v4298_v9 }
 0x371   : > { %6588 = vmatpush3.bf16.msra.mxu1 %v6901_v26 }
 0x374   : > { %6590 = vmatmul.mubr.bf16.vlgmr.msra.gmra.mrb[208].mxu1 %v8645_v16 }
 0x375   : > { %6593 = vmatprep.mubr.bf16.mxu1 %v4234_v58 }
 0x37c   : > { %6594 = vmatmul.mubr.bf16.gmra.mrb[212].mxu1 %v4330_v11 }
 0x407   : > { %v6345_v24 = vpop.f32.mrb[176].mxu1 }
 0x408   : > { %v6346_v51 = vpop.f32.mrb[177].mxu1 }
 0x409   : > { %v6347_v22 = vadd.f32 %v6346_v51, %v6345_v24  ;;  %v6348_v25 = vpop.f32.mrb[178].mxu1 }
 0x40a   : > { %v6385_v10 = vpop.f32.mrb[184].mxu0  ;;  %v6349_v4 = vpop.f32.mrb[179].mxu1 }
 0x40b   : > { %v4989_v33 = vadd.f32 %v6347_v22, %v5604_v18  ;;  %v6350_v35 = vadd.f32 %v6349_v4, %v6348_v25  ;;  %v6386_v38 = vpop.f32.mrb[185].mxu0 }
 0x40c   : > { %v6387_v55 = vadd.f32 %v6386_v38, %v6385_v10  ;;  %v6388_v23 = vpop.f32.mrb[186].mxu0 }
 0x40d   : > { %v4992_v44 = vadd.f32 %v6350_v35, %v5604_v18  ;;  %v6389_v2 = vpop.f32.mrb[187].mxu0 }
 0x40e   : > { %v5054_v56 = vadd.f32 %v6387_v55, %v4989_v33  ;;  %v6390_v63 = vadd.f32 %v6389_v2, %v6388_v23 }
 0x40f   : > { %v6351_v53 = vpop.f32.mrb[180].mxu1 }
 0x410   : > { %v5057_v30 = vadd.f32 %v6390_v63, %v4992_v44  ;;  %v6352_v14 = vpop.f32.mrb[181].mxu1 }
 0x411   : > { %v6353_v31 = vadd.f32 %v6352_v14, %v6351_v53  ;;  %v6354_v54 = vpop.f32.mrb[182].mxu1 }
 0x412   : > { %v6391_v57 = vpop.f32.mrb[188].mxu0  ;;  %v6355_v13 = vpop.f32.mrb[183].mxu1 }
 0x413   : > { %v4997_v39 = vadd.f32 %v6353_v31, %v5604_v18  ;;  %v6356_v49 = vadd.f32 %v6355_v13, %v6354_v54  ;;  %v6392_v27 = vpop.f32.mrb[189].mxu0 }
 0x414   : > { %v6393_v61 = vadd.f32 %v6392_v27, %v6391_v57  ;;  %v6394_v16 = vpop.f32.mrb[190].mxu0 }
 0x415   : > { %v5000_v40 = vadd.f32 %v6356_v49, %v5604_v18  ;;  %v6395_v21 = vpop.f32.mrb[191].mxu0 }
 0x416   : > { %v5062_v19 = vadd.f32 %v6393_v61, %v4997_v39  ;;  %v6396_v15 = vadd.f32 %v6395_v21, %v6394_v16 }
 0x417   : > { %v6357_v5 = vpop.f32.mrb[184].mxu1 }
 0x418   : > { %v5065_v37 = vadd.f32 %v6396_v15, %v5000_v40  ;;  %v6358_v62 = vpop.f32.mrb[185].mxu1 }
 0x419   : > { %v6359_v6 = vadd.f32 %v6358_v62, %v6357_v5  ;;  %v6360_v36 = vpop.f32.mrb[186].mxu1 }
 0x41a   : > { %v6397_v29 = vpop.f32.mrb[192].mxu0  ;;  %v6361_v1 = vpop.f32.mrb[187].mxu1 }
 0x41b   : > { %v5005_v47 = vadd.f32 %v6359_v6, %v5604_v18  ;;  %v6362_v48 = vadd.f32 %v6361_v1, %v6360_v36  ;;  %v6398_v41 = vpop.f32.mrb[193].mxu0 }
 0x41c   : > { %v6399_v58 = vadd.f32 %v6398_v41, %v6397_v29  ;;  %v6400_v52 = vpop.f32.mrb[194].mxu0 }
 0x41d   : > { %v5008_v46 = vadd.f32 %v6362_v48, %v5604_v18  ;;  %v6401_v7 = vpop.f32.mrb[195].mxu0 }
 0x41e   : > { %v5070_v43 = vadd.f32 %v6399_v58, %v5005_v47  ;;  %v6402_v45 = vadd.f32 %v6401_v7, %v6400_v52 }
 0x41f   : > { %v6363_v59 = vpop.f32.mrb[188].mxu1 }
 0x420   : > { %v5073_v12 = vadd.f32 %v6402_v45, %v5008_v46  ;;  %v6364_v60 = vpop.f32.mrb[189].mxu1 }
 0x421   : > { %v6365_v8 = vadd.f32 %v6364_v60, %v6363_v59  ;;  %v6366_v17 = vpop.f32.mrb[190].mxu1 }
 0x422   : > { %v6403_v34 = vpop.f32.mrb[196].mxu0  ;;  %v6367_v20 = vpop.f32.mrb[191].mxu1 }
 0x423   : > { %v5013_v28 = vadd.f32 %v6365_v8, %v5604_v18  ;;  %v6368_v0 = vadd.f32 %v6367_v20, %v6366_v17  ;;  %v6404_v3 = vpop.f32.mrb[197].mxu0 }
 0x424   : > { %v6405_v42 = vadd.f32 %v6404_v3, %v6403_v34  ;;  %v6406_v50 = vpop.f32.mrb[198].mxu0 }
 0x425   : > { %v5016_v26 = vadd.f32 %v6368_v0, %v5604_v18  ;;  %v6407_v9 = vpop.f32.mrb[199].mxu0 }
 0x426   : > { %v5078_v32 = vadd.f32 %v6405_v42, %v5013_v28  ;;  %v6408_v11 = vadd.f32 %v6407_v9, %v6406_v50 }
 0x427   : > { %v6425_v24 = vpop.f32.mrb[192].mxu1 }
 0x428   : > { %v5081_v51 = vadd.f32 %v6408_v11, %v5016_v26  ;;  %v6426_v22 = vpop.f32.mrb[193].mxu1 }
 0x429   : > { %v6427_v25 = vadd.f32 %v6426_v22, %v6425_v24  ;;  %v6428_v10 = vpop.f32.mrb[194].mxu1 }
 0x42a   : > { %v6465_v4 = vpop.f32.mrb[200].mxu0  ;;  %v6429_v33 = vpop.f32.mrb[195].mxu1 }
 0x42b   : > { %v5119_v35 = vadd.f32 %v6427_v25, %v5054_v56  ;;  %v6430_v38 = vadd.f32 %v6429_v33, %v6428_v10  ;;  %v6466_v55 = vpop.f32.mrb[201].mxu0 }
 0x42c   : > { %v6467_v23 = vadd.f32 %v6466_v55, %v6465_v4  ;;  %v6468_v44 = vpop.f32.mrb[202].mxu0 }
 0x42d   : > { %v5122_v2 = vadd.f32 %v6430_v38, %v5057_v30  ;;  %v6469_v63 = vpop.f32.mrb[203].mxu0  ;;  %v6912_v38 = vld [vmem:[%s7493_s23 + $0x10] sm:$0xff] }
 0x42e   : > { %v6470_v53 = vadd.f32 %v6469_v63, %v6468_v44  ;;  %v5184_v14 = vadd.f32 %v6467_v23, %v5119_v35  ;;  %v6913_v44 = vld [vmem:[%s7493_s23] sm:$0xff] }
 0x42f   : > { %v6431_v18 = vpop.f32.mrb[196].mxu1 }
 0x430   : > { %v6432_v31 = vpop.f32.mrb[197].mxu1  ;;  %v5187_v54 = vadd.f32 %v6470_v53, %v5122_v2 }
 0x431   : > { %v6433_v57 = vadd.f32 %v6432_v31, %v6431_v18  ;;  %v6434_v13 = vpop.f32.mrb[198].mxu1 }
 0x432   : > { %v6471_v39 = vpop.f32.mrb[204].mxu0  ;;  %v6435_v49 = vpop.f32.mrb[199].mxu1 }
 0x433   : > { %v5127_v27 = vadd.f32 %v6433_v57, %v5062_v19  ;;  %v6436_v61 = vadd.f32 %v6435_v49, %v6434_v13  ;;  %v6472_v16 = vpop.f32.mrb[205].mxu0  ;;  %v6916_v49 = vld [vmem:[%s7493_s23 + $0x30] sm:$0xff] }
 0x434   : > { %v6473_v40 = vadd.f32 %v6472_v16, %v6471_v39  ;;  %v6474_v56 = vpop.f32.mrb[206].mxu0 }
 0x435   : > { %v5130_v21 = vadd.f32 %v6436_v61, %v5065_v37  ;;  %v6475_v15 = vpop.f32.mrb[207].mxu0 }
 0x436   : > { %v6476_v5 = vadd.f32 %v6475_v15, %v6474_v56  ;;  %v5192_v62 = vadd.f32 %v6473_v40, %v5127_v27  ;;  %v6917_v40 = vld [vmem:[%s7493_s23 + $0x20] sm:$0xff]  ;;  %v6918_v15 = vld [vmem:[%s7493_s23 + $0x38] sm:$0xff] }
 0x437   : > { %v6437_v30 = vpop.f32.mrb[200].mxu1 }
 0x438   : > { %v6438_v6 = vpop.f32.mrb[201].mxu1  ;;  %v5195_v36 = vadd.f32 %v6476_v5, %v5130_v21 }
 0x439   : > { %v6439_v29 = vadd.f32 %v6438_v6, %v6437_v30  ;;  %v6440_v1 = vpop.f32.mrb[202].mxu1 }
 0x43a   : > { %v6477_v47 = vpop.f32.mrb[208].mxu0  ;;  %v6441_v48 = vpop.f32.mrb[203].mxu1 }
 0x43b   : > { %v5135_v41 = vadd.f32 %v6439_v29, %v5070_v43  ;;  %v6442_v58 = vadd.f32 %v6441_v48, %v6440_v1  ;;  %v6478_v52 = vpop.f32.mrb[209].mxu0 }
 0x43c   : > { %v6479_v46 = vadd.f32 %v6478_v52, %v6477_v47  ;;  %v6480_v19 = vpop.f32.mrb[210].mxu0 }
 0x43d   : > { %v5138_v7 = vadd.f32 %v6442_v58, %v5073_v12  ;;  %v6481_v45 = vpop.f32.mrb[211].mxu0 }
 0x43e   : > { %v6482_v59 = vadd.f32 %v6481_v45, %v6480_v19  ;;  %v5200_v60 = vadd.f32 %v6479_v46, %v5135_v41 }
 0x43f   : > { %v6443_v37 = vpop.f32.mrb[204].mxu1 }
 0x440   : > { %v6444_v8 = vpop.f32.mrb[205].mxu1  ;;  %v5203_v17 = vadd.f32 %v6482_v59, %v5138_v7 }
 0x441   : > { %v6445_v34 = vadd.f32 %v6444_v8, %v6443_v37  ;;  %v6446_v20 = vpop.f32.mrb[206].mxu1 }
 0x442   : > { %v6483_v28 = vpop.f32.mrb[212].mxu0  ;;  %v6447_v0 = vpop.f32.mrb[207].mxu1 }
 0x443   : > { %v5143_v3 = vadd.f32 %v6445_v34, %v5078_v32  ;;  %v6448_v42 = vadd.f32 %v6447_v0, %v6446_v20  ;;  %v6484_v50 = vpop.f32.mrb[213].mxu0 }
 0x444   : > { %v6485_v43 = vadd.f32 %v6484_v50, %v6483_v28  ;;  %v6486_v26 = vpop.f32.mrb[214].mxu0 }
 0x445   : > { %v5146_v9 = vadd.f32 %v6448_v42, %v5081_v51  ;;  %v6487_v11 = vpop.f32.mrb[215].mxu0  ;;  %v6914_v51 = vld [vmem:[%s7493_s23 + $0x18] sm:$0xff] }
 0x446   : > { %v6488_v12 = vadd.f32 %v6487_v11, %v6486_v26  ;;  %v5208_v24 = vadd.f32 %v6485_v43, %v5143_v3 }
 0x447   : > { %v6591_v22 = vpop.f32.mrb[208].mxu1 }
 0x448   : > { %v5257_v25 = vadd.f32 %v6591_v22, %v5192_v62  ;;  %v5248_v10 = vpop.f32.mrb[209].mxu1  ;;  %v5211_v4 = vadd.f32 %v6488_v12, %v5146_v9  ;;  %v6919_v62 = vld [vmem:[%s7493_s23 + $0x28] sm:$0xff] }
 0x449   : > { %v5249_v33 = vadd.f32 %v5248_v10, %v5184_v14  ;;  %v6592_v35 = vpop.f32.mrb[210].mxu1  ;;  %v6915_v14 = vld [vmem:[%s7493_s23 + $0x8] sm:$0xff] }
 0x44a   : > { %v5281_v32 = vmul.f32 %v6912_v38, %v5257_v25  ;;  %v5260_v55 = vadd.f32 %v6592_v35, %v5195_v36  ;;  %v5251_v23 = vpop.f32.mrb[211].mxu1 }
 0x44b   : > { %v5279_v2 = vmul.f32 %v6913_v44, %v5249_v33  ;;  %v5252_v63 = vadd.f32 %v5251_v23, %v5187_v54 }
 0x44c   : > { %5289 = vst [vmem:[%s8681_s22 + $0x10] sm:$0xff] %v5281_v32  ;;  %v5282_v53 = vmul.f32 %v6914_v51, %v5260_v55 }
 0x44d   : > { %5287 = vst [vmem:[%s8681_s22] sm:$0xff] %v5279_v2  ;;  %v5280_v18 = vmul.f32 %v6915_v14, %v5252_v63 }
 0x44e   : > { %5290 = vst [vmem:[%s8681_s22 + $0x18] sm:$0xff] %v5282_v53 }
 0x44f   : > { %5288 = vst [vmem:[%s8681_s22 + $0x8] sm:$0xff] %v5280_v18  ;;  %v6595_v31 = vpop.f32.mrb[212].mxu1 }
 0x450   : > { %v5273_v54 = vadd.f32 %v6595_v31, %v5208_v24  ;;  %v5264_v57 = vpop.f32.mrb[213].mxu1 }
 0x451   : > { %v5265_v13 = vadd.f32 %v5264_v57, %v5200_v60  ;;  %v6596_v39 = vpop.f32.mrb[214].mxu1 }
 0x452   : > { %v5285_v27 = vmul.f32 %v6916_v49, %v5273_v54  ;;  %v5276_v61 = vadd.f32 %v6596_v39, %v5211_v4  ;;  %v5267_v16 = vpop.f32.mrb[215].mxu1 }
 0x453   : > { %v5283_v56 = vmul.f32 %v6917_v40, %v5265_v13  ;;  %v5268_v21 = vadd.f32 %v5267_v16, %v5203_v17 }
 0x454   : > { %5293 = vst [vmem:[%s8681_s22 + $0x30] sm:$0xff] %v5285_v27  ;;  %v5286_v5 = vmul.f32 %v6918_v15, %v5276_v61 }
 0x455   : > { %5291 = vst [vmem:[%s8681_s22 + $0x20] sm:$0xff] %v5283_v56  ;;  %v5284_v30 = vmul.f32 %v6919_v62, %v5268_v21 }
 0x456   : > { %5294 = vst [vmem:[%s8681_s22 + $0x38] sm:$0xff] %v5286_v5 }
 0x457   : > { %5292 = vst [vmem:[%s8681_s22 + $0x28] sm:$0xff] %v5284_v30 }
 0x458   : > { %7077 = shalt.err (!%p7074_p3)
}
 0x459   : > { %s7078_s23 = scalar_lea.hbm %s8700_s4, 1024  ;;  %s7082_s26 = scalar_lea.hbm %s8807_s25, 2048 }
 0x45a   : > { %p7079_p9 = scmp.ne.s32.totalorder %s8700_s4, %s7078_s23  ;;  %p7083_p7 = scmp.lt.u32.totalorder %s8700_s4, %s8807_s25 }
 0x45b   : > { %p7084_p12 = scmp.lt.u32.totalorder %s7082_s26, %s7078_s23  ;;  %p7086_p2 = scmp.lt.u32.totalorder %s7078_s23, %s8700_s4 }
 0x45c   : > { %p7080_p13 = pnand %p7079_p9, %p7386_p5 }
 0x45d   : > { %p7085_p1 = por %p7084_p12, %p7083_p7 }
 0x45e   : > { %p7081_p11 = pneg %p7080_p13 }
 0x45f   : > { %p7087_p4 = por %p7086_p2, %p7085_p1 }
 0x461   : > { %p7088_p0 = pnand %p7087_p4, %p7081_p11 }
 0x463   : > { %7091 = shalt.err (!%p7088_p0)
}
 0x464   : > { %s7155_s22 = smov 128   ;;  %s7156_s9 = smov 8  }
 0x465   : > { %6613 = dma.vmem_to_hbm [thread:$0]  (%p7386_p5), %s8692_s8, 1024, %s8700_s4, %s5296_s21, %s7155_s22, %s7155_s22, %s7156_s9  }
 0x466 PF: > { %s8808_s18 = sld [smem:[#allocation22_spill]]  ;;  %s8809_s17 = sld [smem:[#allocation23_spill]] }
 0x467   : > { %p8811_p6 = scmp.ge.s32.totalorder %s7142_s16, 2 }
 0x46c   : > { %s5324_s19 = sand.u32 1, %s8808_s18   ;;  %p8810_p8 = scmp.ne.s32.totalorder %s8809_s17, 0 }
 0x46d   : > { %s5325_s5 = scalar_lea.sflag [#allocation9], %s5324_s19 }
 0x46e   : > { %p6633_p10 = pnand %p8811_p6, %p8810_p8 }
 0x470   : > { %7125 = dma.done.wait (!%p6633_p10), %s5325_s5, 1024  }
 0x471   : > { %7127 = vsyncadd (!%p6633_p10), %s5325_s5, 4294966272  ;;  %p31_p3 = scmp.ge.s32.totalorder %s7372_s13, 4   ;;  %s8812_s29 = smov %s7134_s30 }
 0x472   : > { %s8813_s30 = smov %s7138_s15  ;;  %s8814_s15 = smov %s7382_s10 }
 0x473   : > { %s8815_s16 = smov %s7372_s13  ;;  %33 = sbr.rel (!%p31_p3) target bundleno = 19 (0x13), region = 167 }
 0x47a   :  { %5330 = vsyncpa [#allocation8], 1 }
 0x47b   :  { %5332 = vsyncpa [#allocation8 + $0x1], 1 }
 0x47c   :  { %5333 = vsyncpa [#allocation11], 1 }
 0x47d   :  { %5335 = vsyncpa [#allocation11 + $0x1], 1 }
 0x47e   :  { %5336 = vsyncpa [#allocation14], 1 }
 0x47f   :  { %5337 = vsyncpa [#allocation9], 1 }
 0x480   :  { %5339 = vsyncpa [#allocation9 + $0x1], 1 }

</bundles_post_ra>
